<compile_context>
chip_gen: v7x
topology: tpu7x:2x2x1
jax: 0.10.0
libtpu: 0.0.40
codegen_flags: <defaults>
</compile_context>

<pallas_src>
import numpy as np

import jax
import jax.numpy as jnp
from jax.experimental import pallas as pl
from jax.experimental.pallas import tpu as pltpu


# ----------------------------- Pallas kernel -------------------------------

def _expand_1x1(w, x):
    """(M, C) x (C, HW) -> (M, HW) as C broadcast-FMAs on the VPU (C is tiny)."""
    _, C = w.shape
    acc = w[:, 0:1] * x[0:1, :]
    for c in range(1, C):
        acc = acc + w[:, c:c + 1] * x[c:c + 1, :]
    return acc


def _rescale_fused_kernel(xs_ref, smat_ref, *refs):
    # refs = 27 weight refs (3 blocks x 9 tensors, order: w1,s1,b1,dw,s2,b2,w2,s3,b3) + o_ref
    o_ref = refs[-1]
    wrefs = refs[:-1]
    blk1, blk2, blk3 = wrefs[0:9], wrefs[9:18], wrefs[18:27]

    HW = o_ref.shape[2]
    M = blk1[0].shape[0]

    # ---- block 1: 1x1 expand -> BN+ReLU -> depthwise 2x2 s=2 -> BN+ReLU
    #      -> 1x1 project -> BN (no residual, stride != 1) ----
    w1 = blk1[0][...]                    # (M, C)
    s1 = blk1[1][...]                    # (M, 1)  hoisted out of the tap loop
    b1 = blk1[2][...]
    dw = blk1[3][...]                    # (M, 4)  taps p = dy*2 + dx
    acc = jnp.zeros((M, HW), jnp.float32)
    for p in range(4):                   # input already de-interleaved (space-to-depth)
        xp = xs_ref[0, p]                # (C, HW)
        t = jnp.maximum(_expand_1x1(w1, xp) * s1 + b1, 0.0)
        acc = acc + t * dw[:, p:p + 1]
    t2 = jnp.maximum(acc * blk1[4][...] + blk1[5][...], 0.0)
    y = jnp.dot(blk1[6][...], t2, preferred_element_type=jnp.float32)   # (C, HW)
    y = y * blk1[7][...] + blk1[8][...]

    # ---- blocks 2 & 3: k=3, stride=1, pad=1, with residual ----
    for grp in (blk2, blk3):
        w1 = grp[0][...]
        s1 = grp[1][...]
        b1 = grp[2][...]
        dw = grp[3][...]                 # (M, 9)  taps t = (dy+1)*3 + (dx+1)
        t1 = jnp.maximum(_expand_1x1(w1, y) * s1 + b1, 0.0)             # (M, HW)
        acc = jnp.zeros((M, HW), jnp.float32)
        for tap in range(9):
            # Exact 0/1 shift matrix (folds the zero padding) applied on the MXU.
            sh = jnp.dot(t1, smat_ref[tap], preferred_element_type=jnp.float32)
            acc = acc + sh * dw[:, tap:tap + 1]
        t2 = jnp.maximum(acc * grp[4][...] + grp[5][...], 0.0)
        z = jnp.dot(grp[6][...], t2, preferred_element_type=jnp.float32)  # (C, HW)
        y = z * grp[7][...] + grp[8][...] + y                             # BN3 + residual

    o_ref[0] = y.astype(o_ref.dtype)


# ------------------------------- wrapper ------------------------------------

_W_ORDER = ("w1", "s1", "b1", "dw", "s2", "b2", "w2", "s3", "b3")


def _full_spec(a):
    nd = a.ndim
    return pl.BlockSpec(a.shape, lambda n, nd=nd: (0,) * nd)


def _make_shift_mats(Ho, Wo):
    """S[t] with (x @ S[t])[m, y*Wo + x] = x[m, (y+dy)*Wo + (x+dx)] if in-bounds else 0."""
    HW = Ho * Wo
    S = np.zeros((9, HW, HW), np.float32)
    for dy in (-1, 0, 1):
        for dx in (-1, 0, 1):
            t = (dy + 1) * 3 + (dx + 1)
            for y in range(Ho):
                for x in range(Wo):
                    yy, xx = y + dy, x + dx
                    if 0 <= yy < Ho and 0 <= xx < Wo:
                        S[t, yy * Wo + xx, y * Wo + x] = 1.0
    return jnp.asarray(S)


def rescale_forward(x_nchw, params):
    """_Rescale forward. x_nchw: (N, C, H, W) float32 -> (N, C, H//2, W//2)."""
    N, C, H, W = x_nchw.shape
    Ho, Wo = H // 2, W // 2
    HW = Ho * Wo

    # Space-to-depth: one contiguous (N, 4, C, Ho*Wo) array, position p = dy*2 + dx.
    xs = jnp.transpose(x_nchw.reshape(N, C, Ho, 2, Wo, 2), (0, 3, 5, 1, 2, 4))
    xs = xs.reshape(N, 4, C, HW)
    smat = _make_shift_mats(Ho, Wo)                       # (9, HW, HW) constant

    weights = [p[k] for p in params for k in _W_ORDER]

    out = pl.pallas_call(
        _rescale_fused_kernel,
        out_shape=jax.ShapeDtypeStruct((N, C, HW), x_nchw.dtype),
        grid=(N,),
        in_specs=([pl.BlockSpec((1, 4, C, HW), lambda n: (n, 0, 0, 0)),
                   _full_spec(smat)]
                  + [_full_spec(a) for a in weights]),
        out_specs=pl.BlockSpec((1, C, HW), lambda n: (n, 0, 0)),
        compiler_params=pltpu.CompilerParams(dimension_semantics=("parallel",)),
    )(xs, smat, *weights)
    return out.reshape(N, C, Ho, Wo)


# ------------------------- parameters (deterministic) ----------------------

def make_block_params(key, c, k, expansion=6, eps=1e-5):
    m = c * expansion
    ks = jax.random.split(key, 15)
    w1 = jax.random.normal(ks[0], (m, c), jnp.float32) / jnp.sqrt(float(c))   # 1x1 (out, in)
    dw = jax.random.normal(ks[1], (m, k * k), jnp.float32) / float(k)         # depthwise taps
    w2 = jax.random.normal(ks[2], (c, m), jnp.float32) / jnp.sqrt(float(m))   # 1x1 (out, in)

    def folded_bn(kg, kb, km, kv, n):
        gamma = 1.0 + 0.1 * jax.random.normal(kg, (n,), jnp.float32)
        beta = 0.1 * jax.random.normal(kb, (n,), jnp.float32)
        mean = 0.1 * jax.random.normal(km, (n,), jnp.float32)
        var = 0.5 + jax.random.uniform(kv, (n,), jnp.float32)
        scale = gamma / jnp.sqrt(var + eps)
        shift = beta - mean * scale
        return scale.reshape(n, 1), shift.reshape(n, 1)

    s1, b1 = folded_bn(ks[3], ks[4], ks[5], ks[6], m)
    s2, b2 = folded_bn(ks[7], ks[8], ks[9], ks[10], m)
    s3, b3 = folded_bn(ks[11], ks[12], ks[13], ks[14], c)
    return dict(w1=w1, s1=s1, b1=b1, dw=dw, s2=s2, b2=b2, w2=w2, s3=s3, b3=b3)


# ----------------------------- pure-JAX reference --------------------------

def _ref_block(x, p, k, stride, pad, residual):
    N, C, H, W = x.shape
    M = p["w1"].shape[0]
    hi = jax.lax.Precision.HIGHEST
    t = jnp.einsum("mc,nchw->nmhw", p["w1"], x, precision=hi)
    t = jnp.maximum(t * p["s1"].reshape(1, M, 1, 1) + p["b1"].reshape(1, M, 1, 1), 0.0)
    tp = jnp.pad(t, ((0, 0), (0, 0), (pad, pad), (pad, pad)))
    Ho = (H + 2 * pad - k) // stride + 1
    Wo = (W + 2 * pad - k) // stride + 1
    dwk = p["dw"].reshape(M, k, k)
    acc = jnp.zeros((N, M, Ho, Wo), jnp.float32)
    for dy in range(k):
        for dx in range(k):
            win = tp[:, :, dy:dy + stride * (Ho - 1) + 1:stride,
                     dx:dx + stride * (Wo - 1) + 1:stride]
            acc = acc + win * dwk[:, dy, dx].reshape(1, M, 1, 1)
    t2 = jnp.maximum(acc * p["s2"].reshape(1, M, 1, 1) + p["b2"].reshape(1, M, 1, 1), 0.0)
    y = jnp.einsum("cm,nmhw->nchw", p["w2"], t2, precision=hi)
    y = y * p["s3"].reshape(1, C, 1, 1) + p["b3"].reshape(1, C, 1, 1)
    return y + x if residual else y


def ref_rescale(x, params):
    y = _ref_block(x, params[0], 2, 2, 0, False)
    y = _ref_block(y, params[1], 3, 1, 1, True)
    y = _ref_block(y, params[2], 3, 1, 1, True)
    return y


# --------------------------------- main -------------------------------------

if __name__ == "__main__":
    N, C, H, W = 2, 4, 16, 16
    key = jax.random.PRNGKey(0)
    kx, kp1, kp2, kp3 = jax.random.split(key, 4)

    x = jax.random.normal(kx, (N, C, H, W), jnp.float32)   # PyTorch-style NCHW input

    params = [make_block_params(kp1, C, 2),
              make_block_params(kp2, C, 3),
              make_block_params(kp3, C, 3)]

    y = jax.jit(rescale_forward)(x, params)
    y = jax.block_until_ready(y)

    assert y.shape == (N, C, H // 2, W // 2), y.shape
    y_ref = ref_rescale(x, params)
    max_err = float(jnp.max(jnp.abs(y - y_ref)))
    if max_err > 5e-2:
        raise SystemExit(f"mismatch vs reference: max abs err = {max_err}")
    print("KERNEL_OK")
</pallas_src>

<mosaic_0001>
module attributes {stable_mosaic.version = 11 : i64} {
  func.func @_rescale_fused_kernel(%arg0: i32, %arg1: memref<1x4x4x64xf32, #tpu.memory_space<vmem>>, %arg2: memref<9x64x64xf32, #tpu.memory_space<vmem>>, %arg3: memref<24x4xf32, #tpu.memory_space<vmem>>, %arg4: memref<24x1xf32, #tpu.memory_space<vmem>>, %arg5: memref<24x1xf32, #tpu.memory_space<vmem>>, %arg6: memref<24x4xf32, #tpu.memory_space<vmem>>, %arg7: memref<24x1xf32, #tpu.memory_space<vmem>>, %arg8: memref<24x1xf32, #tpu.memory_space<vmem>>, %arg9: memref<4x24xf32, #tpu.memory_space<vmem>>, %arg10: memref<4x1xf32, #tpu.memory_space<vmem>>, %arg11: memref<4x1xf32, #tpu.memory_space<vmem>>, %arg12: memref<24x4xf32, #tpu.memory_space<vmem>>, %arg13: memref<24x1xf32, #tpu.memory_space<vmem>>, %arg14: memref<24x1xf32, #tpu.memory_space<vmem>>, %arg15: memref<24x9xf32, #tpu.memory_space<vmem>>, %arg16: memref<24x1xf32, #tpu.memory_space<vmem>>, %arg17: memref<24x1xf32, #tpu.memory_space<vmem>>, %arg18: memref<4x24xf32, #tpu.memory_space<vmem>>, %arg19: memref<4x1xf32, #tpu.memory_space<vmem>>, %arg20: memref<4x1xf32, #tpu.memory_space<vmem>>, %arg21: memref<24x4xf32, #tpu.memory_space<vmem>>, %arg22: memref<24x1xf32, #tpu.memory_space<vmem>>, %arg23: memref<24x1xf32, #tpu.memory_space<vmem>>, %arg24: memref<24x9xf32, #tpu.memory_space<vmem>>, %arg25: memref<24x1xf32, #tpu.memory_space<vmem>>, %arg26: memref<24x1xf32, #tpu.memory_space<vmem>>, %arg27: memref<4x24xf32, #tpu.memory_space<vmem>>, %arg28: memref<4x1xf32, #tpu.memory_space<vmem>>, %arg29: memref<4x1xf32, #tpu.memory_space<vmem>>, %arg30: memref<1x4x64xf32, #tpu.memory_space<vmem>>) attributes {dimension_semantics = [#tpu.dimension_semantics<parallel>], iteration_bounds = array<i64: 2>, scalar_prefetch = 0 : i64, scratch_operands = 0 : i64, tpu.core_type = #tpu.core_type<tc>, window_params = [{transform_indices = @transform_0, window_bounds = array<i64: 1, 4, 4, 64>}, {pipeline_mode = #tpu.pipeline_mode<synchronous>, transform_indices = @transform_1, window_bounds = array<i64: 9, 64, 64>}, {pipeline_mode = #tpu.pipeline_mode<synchronous>, transform_indices = @transform_2, window_bounds = array<i64: 24, 4>}, {pipeline_mode = #tpu.pipeline_mode<synchronous>, transform_indices = @transform_3, window_bounds = array<i64: 24, 1>}, {pipeline_mode = #tpu.pipeline_mode<synchronous>, transform_indices = @transform_4, window_bounds = array<i64: 24, 1>}, {pipeline_mode = #tpu.pipeline_mode<synchronous>, transform_indices = @transform_5, window_bounds = array<i64: 24, 4>}, {pipeline_mode = #tpu.pipeline_mode<synchronous>, transform_indices = @transform_6, window_bounds = array<i64: 24, 1>}, {pipeline_mode = #tpu.pipeline_mode<synchronous>, transform_indices = @transform_7, window_bounds = array<i64: 24, 1>}, {pipeline_mode = #tpu.pipeline_mode<synchronous>, transform_indices = @transform_8, window_bounds = array<i64: 4, 24>}, {pipeline_mode = #tpu.pipeline_mode<synchronous>, transform_indices = @transform_9, window_bounds = array<i64: 4, 1>}, {pipeline_mode = #tpu.pipeline_mode<synchronous>, transform_indices = @transform_10, window_bounds = array<i64: 4, 1>}, {pipeline_mode = #tpu.pipeline_mode<synchronous>, transform_indices = @transform_11, window_bounds = array<i64: 24, 4>}, {pipeline_mode = #tpu.pipeline_mode<synchronous>, transform_indices = @transform_12, window_bounds = array<i64: 24, 1>}, {pipeline_mode = #tpu.pipeline_mode<synchronous>, transform_indices = @transform_13, window_bounds = array<i64: 24, 1>}, {pipeline_mode = #tpu.pipeline_mode<synchronous>, transform_indices = @transform_14, window_bounds = array<i64: 24, 9>}, {pipeline_mode = #tpu.pipeline_mode<synchronous>, transform_indices = @transform_15, window_bounds = array<i64: 24, 1>}, {pipeline_mode = #tpu.pipeline_mode<synchronous>, transform_indices = @transform_16, window_bounds = array<i64: 24, 1>}, {pipeline_mode = #tpu.pipeline_mode<synchronous>, transform_indices = @transform_17, window_bounds = array<i64: 4, 24>}, {pipeline_mode = #tpu.pipeline_mode<synchronous>, transform_indices = @transform_18, window_bounds = array<i64: 4, 1>}, {pipeline_mode = #tpu.pipeline_mode<synchronous>, transform_indices = @transform_19, window_bounds = array<i64: 4, 1>}, {pipeline_mode = #tpu.pipeline_mode<synchronous>, transform_indices = @transform_20, window_bounds = array<i64: 24, 4>}, {pipeline_mode = #tpu.pipeline_mode<synchronous>, transform_indices = @transform_21, window_bounds = array<i64: 24, 1>}, {pipeline_mode = #tpu.pipeline_mode<synchronous>, transform_indices = @transform_22, window_bounds = array<i64: 24, 1>}, {pipeline_mode = #tpu.pipeline_mode<synchronous>, transform_indices = @transform_23, window_bounds = array<i64: 24, 9>}, {pipeline_mode = #tpu.pipeline_mode<synchronous>, transform_indices = @transform_24, window_bounds = array<i64: 24, 1>}, {pipeline_mode = #tpu.pipeline_mode<synchronous>, transform_indices = @transform_25, window_bounds = array<i64: 24, 1>}, {pipeline_mode = #tpu.pipeline_mode<synchronous>, transform_indices = @transform_26, window_bounds = array<i64: 4, 24>}, {pipeline_mode = #tpu.pipeline_mode<synchronous>, transform_indices = @transform_27, window_bounds = array<i64: 4, 1>}, {pipeline_mode = #tpu.pipeline_mode<synchronous>, transform_indices = @transform_28, window_bounds = array<i64: 4, 1>}, {transform_indices = @transform_29, window_bounds = array<i64: 1, 4, 64>}]} {
    %c0 = arith.constant 0 : index
    %c0_0 = arith.constant 0 : index
    %0 = vector.load %arg3[%c0, %c0_0] : memref<24x4xf32, #tpu.memory_space<vmem>>, vector<24x4xf32>
    %c0_1 = arith.constant 0 : index
    %c0_2 = arith.constant 0 : index
    %1 = vector.load %arg4[%c0_1, %c0_2] : memref<24x1xf32, #tpu.memory_space<vmem>>, vector<24x1xf32>
    %c0_3 = arith.constant 0 : index
    %c0_4 = arith.constant 0 : index
    %2 = vector.load %arg5[%c0_3, %c0_4] : memref<24x1xf32, #tpu.memory_space<vmem>>, vector<24x1xf32>
    %c0_5 = arith.constant 0 : index
    %c0_6 = arith.constant 0 : index
    %3 = vector.load %arg6[%c0_5, %c0_6] : memref<24x4xf32, #tpu.memory_space<vmem>>, vector<24x4xf32>
    %cst = arith.constant 0.000000e+00 : f32
    %4 = vector.broadcast %cst : f32 to vector<24x64xf32>
    %c0_7 = arith.constant 0 : index
    %c0_8 = arith.constant 0 : index
    %c0_9 = arith.constant 0 : index
    %c0_10 = arith.constant 0 : index
    %5 = vector.load %arg1[%c0_7, %c0_8, %c0_9, %c0_10] : memref<1x4x4x64xf32, #tpu.memory_space<vmem>>, vector<1x1x4x64xf32>
    %6 = vector.shape_cast %5 : vector<1x1x4x64xf32> to vector<4x64xf32>
    %7 = vector.extract_strided_slice %0 {offsets = [0, 0], sizes = [24, 1], strides = [1, 1]} : vector<24x4xf32> to vector<24x1xf32>
    %8 = vector.extract_strided_slice %6 {offsets = [0, 0], sizes = [1, 64], strides = [1, 1]} : vector<4x64xf32> to vector<1x64xf32>
    %9 = vector.broadcast %7 : vector<24x1xf32> to vector<24x64xf32>
    %10 = vector.broadcast %8 : vector<1x64xf32> to vector<24x64xf32>
    %11 = arith.mulf %9, %10 : vector<24x64xf32>
    %12 = vector.extract_strided_slice %0 {offsets = [0, 1], sizes = [24, 1], strides = [1, 1]} : vector<24x4xf32> to vector<24x1xf32>
    %13 = vector.extract_strided_slice %6 {offsets = [1, 0], sizes = [1, 64], strides = [1, 1]} : vector<4x64xf32> to vector<1x64xf32>
    %14 = vector.broadcast %12 : vector<24x1xf32> to vector<24x64xf32>
    %15 = vector.broadcast %13 : vector<1x64xf32> to vector<24x64xf32>
    %16 = arith.mulf %14, %15 : vector<24x64xf32>
    %17 = arith.addf %11, %16 : vector<24x64xf32>
    %18 = vector.extract_strided_slice %0 {offsets = [0, 2], sizes = [24, 1], strides = [1, 1]} : vector<24x4xf32> to vector<24x1xf32>
    %19 = vector.extract_strided_slice %6 {offsets = [2, 0], sizes = [1, 64], strides = [1, 1]} : vector<4x64xf32> to vector<1x64xf32>
    %20 = vector.broadcast %18 : vector<24x1xf32> to vector<24x64xf32>
    %21 = vector.broadcast %19 : vector<1x64xf32> to vector<24x64xf32>
    %22 = arith.mulf %20, %21 : vector<24x64xf32>
    %23 = arith.addf %17, %22 : vector<24x64xf32>
    %24 = vector.extract_strided_slice %0 {offsets = [0, 3], sizes = [24, 1], strides = [1, 1]} : vector<24x4xf32> to vector<24x1xf32>
    %25 = vector.extract_strided_slice %6 {offsets = [3, 0], sizes = [1, 64], strides = [1, 1]} : vector<4x64xf32> to vector<1x64xf32>
    %26 = vector.broadcast %24 : vector<24x1xf32> to vector<24x64xf32>
    %27 = vector.broadcast %25 : vector<1x64xf32> to vector<24x64xf32>
    %28 = arith.mulf %26, %27 : vector<24x64xf32>
    %29 = arith.addf %23, %28 : vector<24x64xf32>
    %30 = vector.broadcast %1 : vector<24x1xf32> to vector<24x64xf32>
    %31 = arith.mulf %29, %30 : vector<24x64xf32>
    %32 = vector.broadcast %2 : vector<24x1xf32> to vector<24x64xf32>
    %33 = arith.addf %31, %32 : vector<24x64xf32>
    %cst_11 = arith.constant 0.000000e+00 : f32
    %34 = vector.broadcast %cst_11 : f32 to vector<24x64xf32>
    %35 = arith.maximumf %33, %34 : vector<24x64xf32>
    %36 = vector.extract_strided_slice %3 {offsets = [0, 0], sizes = [24, 1], strides = [1, 1]} : vector<24x4xf32> to vector<24x1xf32>
    %37 = vector.broadcast %36 : vector<24x1xf32> to vector<24x64xf32>
    %38 = arith.mulf %35, %37 : vector<24x64xf32>
    %39 = arith.addf %4, %38 : vector<24x64xf32>
    %c0_12 = arith.constant 0 : index
    %c1 = arith.constant 1 : index
    %c0_13 = arith.constant 0 : index
    %c0_14 = arith.constant 0 : index
    %40 = vector.load %arg1[%c0_12, %c1, %c0_13, %c0_14] : memref<1x4x4x64xf32, #tpu.memory_space<vmem>>, vector<1x1x4x64xf32>
    %41 = vector.shape_cast %40 : vector<1x1x4x64xf32> to vector<4x64xf32>
    %42 = vector.extract_strided_slice %0 {offsets = [0, 0], sizes = [24, 1], strides = [1, 1]} : vector<24x4xf32> to vector<24x1xf32>
    %43 = vector.extract_strided_slice %41 {offsets = [0, 0], sizes = [1, 64], strides = [1, 1]} : vector<4x64xf32> to vector<1x64xf32>
    %44 = vector.broadcast %42 : vector<24x1xf32> to vector<24x64xf32>
    %45 = vector.broadcast %43 : vector<1x64xf32> to vector<24x64xf32>
    %46 = arith.mulf %44, %45 : vector<24x64xf32>
    %47 = vector.extract_strided_slice %0 {offsets = [0, 1], sizes = [24, 1], strides = [1, 1]} : vector<24x4xf32> to vector<24x1xf32>
    %48 = vector.extract_strided_slice %41 {offsets = [1, 0], sizes = [1, 64], strides = [1, 1]} : vector<4x64xf32> to vector<1x64xf32>
    %49 = vector.broadcast %47 : vector<24x1xf32> to vector<24x64xf32>
    %50 = vector.broadcast %48 : vector<1x64xf32> to vector<24x64xf32>
    %51 = arith.mulf %49, %50 : vector<24x64xf32>
    %52 = arith.addf %46, %51 : vector<24x64xf32>
    %53 = vector.extract_strided_slice %0 {offsets = [0, 2], sizes = [24, 1], strides = [1, 1]} : vector<24x4xf32> to vector<24x1xf32>
    %54 = vector.extract_strided_slice %41 {offsets = [2, 0], sizes = [1, 64], strides = [1, 1]} : vector<4x64xf32> to vector<1x64xf32>
    %55 = vector.broadcast %53 : vector<24x1xf32> to vector<24x64xf32>
    %56 = vector.broadcast %54 : vector<1x64xf32> to vector<24x64xf32>
    %57 = arith.mulf %55, %56 : vector<24x64xf32>
    %58 = arith.addf %52, %57 : vector<24x64xf32>
    %59 = vector.extract_strided_slice %0 {offsets = [0, 3], sizes = [24, 1], strides = [1, 1]} : vector<24x4xf32> to vector<24x1xf32>
    %60 = vector.extract_strided_slice %41 {offsets = [3, 0], sizes = [1, 64], strides = [1, 1]} : vector<4x64xf32> to vector<1x64xf32>
    %61 = vector.broadcast %59 : vector<24x1xf32> to vector<24x64xf32>
    %62 = vector.broadcast %60 : vector<1x64xf32> to vector<24x64xf32>
    %63 = arith.mulf %61, %62 : vector<24x64xf32>
    %64 = arith.addf %58, %63 : vector<24x64xf32>
    %65 = vector.broadcast %1 : vector<24x1xf32> to vector<24x64xf32>
    %66 = arith.mulf %64, %65 : vector<24x64xf32>
    %67 = vector.broadcast %2 : vector<24x1xf32> to vector<24x64xf32>
    %68 = arith.addf %66, %67 : vector<24x64xf32>
    %cst_15 = arith.constant 0.000000e+00 : f32
    %69 = vector.broadcast %cst_15 : f32 to vector<24x64xf32>
    %70 = arith.maximumf %68, %69 : vector<24x64xf32>
    %71 = vector.extract_strided_slice %3 {offsets = [0, 1], sizes = [24, 1], strides = [1, 1]} : vector<24x4xf32> to vector<24x1xf32>
    %72 = vector.broadcast %71 : vector<24x1xf32> to vector<24x64xf32>
    %73 = arith.mulf %70, %72 : vector<24x64xf32>
    %74 = arith.addf %39, %73 : vector<24x64xf32>
    %c0_16 = arith.constant 0 : index
    %c2 = arith.constant 2 : index
    %c0_17 = arith.constant 0 : index
    %c0_18 = arith.constant 0 : index
    %75 = vector.load %arg1[%c0_16, %c2, %c0_17, %c0_18] : memref<1x4x4x64xf32, #tpu.memory_space<vmem>>, vector<1x1x4x64xf32>
    %76 = vector.shape_cast %75 : vector<1x1x4x64xf32> to vector<4x64xf32>
    %77 = vector.extract_strided_slice %0 {offsets = [0, 0], sizes = [24, 1], strides = [1, 1]} : vector<24x4xf32> to vector<24x1xf32>
    %78 = vector.extract_strided_slice %76 {offsets = [0, 0], sizes = [1, 64], strides = [1, 1]} : vector<4x64xf32> to vector<1x64xf32>
    %79 = vector.broadcast %77 : vector<24x1xf32> to vector<24x64xf32>
    %80 = vector.broadcast %78 : vector<1x64xf32> to vector<24x64xf32>
    %81 = arith.mulf %79, %80 : vector<24x64xf32>
    %82 = vector.extract_strided_slice %0 {offsets = [0, 1], sizes = [24, 1], strides = [1, 1]} : vector<24x4xf32> to vector<24x1xf32>
    %83 = vector.extract_strided_slice %76 {offsets = [1, 0], sizes = [1, 64], strides = [1, 1]} : vector<4x64xf32> to vector<1x64xf32>
    %84 = vector.broadcast %82 : vector<24x1xf32> to vector<24x64xf32>
    %85 = vector.broadcast %83 : vector<1x64xf32> to vector<24x64xf32>
    %86 = arith.mulf %84, %85 : vector<24x64xf32>
    %87 = arith.addf %81, %86 : vector<24x64xf32>
    %88 = vector.extract_strided_slice %0 {offsets = [0, 2], sizes = [24, 1], strides = [1, 1]} : vector<24x4xf32> to vector<24x1xf32>
    %89 = vector.extract_strided_slice %76 {offsets = [2, 0], sizes = [1, 64], strides = [1, 1]} : vector<4x64xf32> to vector<1x64xf32>
    %90 = vector.broadcast %88 : vector<24x1xf32> to vector<24x64xf32>
    %91 = vector.broadcast %89 : vector<1x64xf32> to vector<24x64xf32>
    %92 = arith.mulf %90, %91 : vector<24x64xf32>
    %93 = arith.addf %87, %92 : vector<24x64xf32>
    %94 = vector.extract_strided_slice %0 {offsets = [0, 3], sizes = [24, 1], strides = [1, 1]} : vector<24x4xf32> to vector<24x1xf32>
    %95 = vector.extract_strided_slice %76 {offsets = [3, 0], sizes = [1, 64], strides = [1, 1]} : vector<4x64xf32> to vector<1x64xf32>
    %96 = vector.broadcast %94 : vector<24x1xf32> to vector<24x64xf32>
    %97 = vector.broadcast %95 : vector<1x64xf32> to vector<24x64xf32>
    %98 = arith.mulf %96, %97 : vector<24x64xf32>
    %99 = arith.addf %93, %98 : vector<24x64xf32>
    %100 = vector.broadcast %1 : vector<24x1xf32> to vector<24x64xf32>
    %101 = arith.mulf %99, %100 : vector<24x64xf32>
    %102 = vector.broadcast %2 : vector<24x1xf32> to vector<24x64xf32>
    %103 = arith.addf %101, %102 : vector<24x64xf32>
    %cst_19 = arith.constant 0.000000e+00 : f32
    %104 = vector.broadcast %cst_19 : f32 to vector<24x64xf32>
    %105 = arith.maximumf %103, %104 : vector<24x64xf32>
    %106 = vector.extract_strided_slice %3 {offsets = [0, 2], sizes = [24, 1], strides = [1, 1]} : vector<24x4xf32> to vector<24x1xf32>
    %107 = vector.broadcast %106 : vector<24x1xf32> to vector<24x64xf32>
    %108 = arith.mulf %105, %107 : vector<24x64xf32>
    %109 = arith.addf %74, %108 : vector<24x64xf32>
    %c0_20 = arith.constant 0 : index
    %c3 = arith.constant 3 : index
    %c0_21 = arith.constant 0 : index
    %c0_22 = arith.constant 0 : index
    %110 = vector.load %arg1[%c0_20, %c3, %c0_21, %c0_22] : memref<1x4x4x64xf32, #tpu.memory_space<vmem>>, vector<1x1x4x64xf32>
    %111 = vector.shape_cast %110 : vector<1x1x4x64xf32> to vector<4x64xf32>
    %112 = vector.extract_strided_slice %0 {offsets = [0, 0], sizes = [24, 1], strides = [1, 1]} : vector<24x4xf32> to vector<24x1xf32>
    %113 = vector.extract_strided_slice %111 {offsets = [0, 0], sizes = [1, 64], strides = [1, 1]} : vector<4x64xf32> to vector<1x64xf32>
    %114 = vector.broadcast %112 : vector<24x1xf32> to vector<24x64xf32>
    %115 = vector.broadcast %113 : vector<1x64xf32> to vector<24x64xf32>
    %116 = arith.mulf %114, %115 : vector<24x64xf32>
    %117 = vector.extract_strided_slice %0 {offsets = [0, 1], sizes = [24, 1], strides = [1, 1]} : vector<24x4xf32> to vector<24x1xf32>
    %118 = vector.extract_strided_slice %111 {offsets = [1, 0], sizes = [1, 64], strides = [1, 1]} : vector<4x64xf32> to vector<1x64xf32>
    %119 = vector.broadcast %117 : vector<24x1xf32> to vector<24x64xf32>
    %120 = vector.broadcast %118 : vector<1x64xf32> to vector<24x64xf32>
    %121 = arith.mulf %119, %120 : vector<24x64xf32>
    %122 = arith.addf %116, %121 : vector<24x64xf32>
    %123 = vector.extract_strided_slice %0 {offsets = [0, 2], sizes = [24, 1], strides = [1, 1]} : vector<24x4xf32> to vector<24x1xf32>
    %124 = vector.extract_strided_slice %111 {offsets = [2, 0], sizes = [1, 64], strides = [1, 1]} : vector<4x64xf32> to vector<1x64xf32>
    %125 = vector.broadcast %123 : vector<24x1xf32> to vector<24x64xf32>
    %126 = vector.broadcast %124 : vector<1x64xf32> to vector<24x64xf32>
    %127 = arith.mulf %125, %126 : vector<24x64xf32>
    %128 = arith.addf %122, %127 : vector<24x64xf32>
    %129 = vector.extract_strided_slice %0 {offsets = [0, 3], sizes = [24, 1], strides = [1, 1]} : vector<24x4xf32> to vector<24x1xf32>
    %130 = vector.extract_strided_slice %111 {offsets = [3, 0], sizes = [1, 64], strides = [1, 1]} : vector<4x64xf32> to vector<1x64xf32>
    %131 = vector.broadcast %129 : vector<24x1xf32> to vector<24x64xf32>
    %132 = vector.broadcast %130 : vector<1x64xf32> to vector<24x64xf32>
    %133 = arith.mulf %131, %132 : vector<24x64xf32>
    %134 = arith.addf %128, %133 : vector<24x64xf32>
    %135 = vector.broadcast %1 : vector<24x1xf32> to vector<24x64xf32>
    %136 = arith.mulf %134, %135 : vector<24x64xf32>
    %137 = vector.broadcast %2 : vector<24x1xf32> to vector<24x64xf32>
    %138 = arith.addf %136, %137 : vector<24x64xf32>
    %cst_23 = arith.constant 0.000000e+00 : f32
    %139 = vector.broadcast %cst_23 : f32 to vector<24x64xf32>
    %140 = arith.maximumf %138, %139 : vector<24x64xf32>
    %141 = vector.extract_strided_slice %3 {offsets = [0, 3], sizes = [24, 1], strides = [1, 1]} : vector<24x4xf32> to vector<24x1xf32>
    %142 = vector.broadcast %141 : vector<24x1xf32> to vector<24x64xf32>
    %143 = arith.mulf %140, %142 : vector<24x64xf32>
    %144 = arith.addf %109, %143 : vector<24x64xf32>
    %c0_24 = arith.constant 0 : index
    %c0_25 = arith.constant 0 : index
    %145 = vector.load %arg7[%c0_24, %c0_25] : memref<24x1xf32, #tpu.memory_space<vmem>>, vector<24x1xf32>
    %146 = vector.broadcast %145 : vector<24x1xf32> to vector<24x64xf32>
    %147 = arith.mulf %144, %146 : vector<24x64xf32>
    %c0_26 = arith.constant 0 : index
    %c0_27 = arith.constant 0 : index
    %148 = vector.load %arg8[%c0_26, %c0_27] : memref<24x1xf32, #tpu.memory_space<vmem>>, vector<24x1xf32>
    %149 = vector.broadcast %148 : vector<24x1xf32> to vector<24x64xf32>
    %150 = arith.addf %147, %149 : vector<24x64xf32>
    %cst_28 = arith.constant 0.000000e+00 : f32
    %151 = vector.broadcast %cst_28 : f32 to vector<24x64xf32>
    %152 = arith.maximumf %150, %151 : vector<24x64xf32>
    %c0_29 = arith.constant 0 : index
    %c0_30 = arith.constant 0 : index
    %153 = vector.load %arg9[%c0_29, %c0_30] : memref<4x24xf32, #tpu.memory_space<vmem>>, vector<4x24xf32>
    %cst_31 = arith.constant dense<0.000000e+00> : vector<4x64xf32>
    %154 = tpu.matmul %153, %152, %cst_31 {dimension_numbers = #tpu.dot_dimension_numbers<[1], [0], [0], [1], [0, 0, 1, 1], [], []>} : vector<4x24xf32>, vector<24x64xf32>, vector<4x64xf32> -> vector<4x64xf32>
    %c0_32 = arith.constant 0 : index
    %c0_33 = arith.constant 0 : index
    %155 = vector.load %arg10[%c0_32, %c0_33] : memref<4x1xf32, #tpu.memory_space<vmem>>, vector<4x1xf32>
    %156 = vector.broadcast %155 : vector<4x1xf32> to vector<4x64xf32>
    %157 = arith.mulf %154, %156 : vector<4x64xf32>
    %c0_34 = arith.constant 0 : index
    %c0_35 = arith.constant 0 : index
    %158 = vector.load %arg11[%c0_34, %c0_35] : memref<4x1xf32, #tpu.memory_space<vmem>>, vector<4x1xf32>
    %159 = vector.broadcast %158 : vector<4x1xf32> to vector<4x64xf32>
    %160 = arith.addf %157, %159 : vector<4x64xf32>
    %c0_36 = arith.constant 0 : index
    %c0_37 = arith.constant 0 : index
    %161 = vector.load %arg12[%c0_36, %c0_37] : memref<24x4xf32, #tpu.memory_space<vmem>>, vector<24x4xf32>
    %c0_38 = arith.constant 0 : index
    %c0_39 = arith.constant 0 : index
    %162 = vector.load %arg13[%c0_38, %c0_39] : memref<24x1xf32, #tpu.memory_space<vmem>>, vector<24x1xf32>
    %c0_40 = arith.constant 0 : index
    %c0_41 = arith.constant 0 : index
    %163 = vector.load %arg14[%c0_40, %c0_41] : memref<24x1xf32, #tpu.memory_space<vmem>>, vector<24x1xf32>
    %c0_42 = arith.constant 0 : index
    %c0_43 = arith.constant 0 : index
    %164 = vector.load %arg15[%c0_42, %c0_43] : memref<24x9xf32, #tpu.memory_space<vmem>>, vector<24x9xf32>
    %165 = vector.extract_strided_slice %161 {offsets = [0, 0], sizes = [24, 1], strides = [1, 1]} : vector<24x4xf32> to vector<24x1xf32>
    %166 = vector.extract_strided_slice %160 {offsets = [0, 0], sizes = [1, 64], strides = [1, 1]} : vector<4x64xf32> to vector<1x64xf32>
    %167 = vector.broadcast %165 : vector<24x1xf32> to vector<24x64xf32>
    %168 = vector.broadcast %166 : vector<1x64xf32> to vector<24x64xf32>
    %169 = arith.mulf %167, %168 : vector<24x64xf32>
    %170 = vector.extract_strided_slice %161 {offsets = [0, 1], sizes = [24, 1], strides = [1, 1]} : vector<24x4xf32> to vector<24x1xf32>
    %171 = vector.extract_strided_slice %160 {offsets = [1, 0], sizes = [1, 64], strides = [1, 1]} : vector<4x64xf32> to vector<1x64xf32>
    %172 = vector.broadcast %170 : vector<24x1xf32> to vector<24x64xf32>
    %173 = vector.broadcast %171 : vector<1x64xf32> to vector<24x64xf32>
    %174 = arith.mulf %172, %173 : vector<24x64xf32>
    %175 = arith.addf %169, %174 : vector<24x64xf32>
    %176 = vector.extract_strided_slice %161 {offsets = [0, 2], sizes = [24, 1], strides = [1, 1]} : vector<24x4xf32> to vector<24x1xf32>
    %177 = vector.extract_strided_slice %160 {offsets = [2, 0], sizes = [1, 64], strides = [1, 1]} : vector<4x64xf32> to vector<1x64xf32>
    %178 = vector.broadcast %176 : vector<24x1xf32> to vector<24x64xf32>
    %179 = vector.broadcast %177 : vector<1x64xf32> to vector<24x64xf32>
    %180 = arith.mulf %178, %179 : vector<24x64xf32>
    %181 = arith.addf %175, %180 : vector<24x64xf32>
    %182 = vector.extract_strided_slice %161 {offsets = [0, 3], sizes = [24, 1], strides = [1, 1]} : vector<24x4xf32> to vector<24x1xf32>
    %183 = vector.extract_strided_slice %160 {offsets = [3, 0], sizes = [1, 64], strides = [1, 1]} : vector<4x64xf32> to vector<1x64xf32>
    %184 = vector.broadcast %182 : vector<24x1xf32> to vector<24x64xf32>
    %185 = vector.broadcast %183 : vector<1x64xf32> to vector<24x64xf32>
    %186 = arith.mulf %184, %185 : vector<24x64xf32>
    %187 = arith.addf %181, %186 : vector<24x64xf32>
    %188 = vector.broadcast %162 : vector<24x1xf32> to vector<24x64xf32>
    %189 = arith.mulf %187, %188 : vector<24x64xf32>
    %190 = vector.broadcast %163 : vector<24x1xf32> to vector<24x64xf32>
    %191 = arith.addf %189, %190 : vector<24x64xf32>
    %cst_44 = arith.constant 0.000000e+00 : f32
    %192 = vector.broadcast %cst_44 : f32 to vector<24x64xf32>
    %193 = arith.maximumf %191, %192 : vector<24x64xf32>
    %cst_45 = arith.constant 0.000000e+00 : f32
    %194 = vector.broadcast %cst_45 : f32 to vector<24x64xf32>
    %c0_46 = arith.constant 0 : index
    %c0_47 = arith.constant 0 : index
    %c0_48 = arith.constant 0 : index
    %195 = vector.load %arg2[%c0_46, %c0_47, %c0_48] : memref<9x64x64xf32, #tpu.memory_space<vmem>>, vector<1x64x64xf32>
    %196 = vector.shape_cast %195 : vector<1x64x64xf32> to vector<64x64xf32>
    %cst_49 = arith.constant dense<0.000000e+00> : vector<24x64xf32>
    %197 = tpu.matmul %193, %196, %cst_49 {dimension_numbers = #tpu.dot_dimension_numbers<[1], [0], [0], [1], [0, 0, 1, 1], [], []>} : vector<24x64xf32>, vector<64x64xf32>, vector<24x64xf32> -> vector<24x64xf32>
    %198 = vector.extract_strided_slice %164 {offsets = [0, 0], sizes = [24, 1], strides = [1, 1]} : vector<24x9xf32> to vector<24x1xf32>
    %199 = vector.broadcast %198 : vector<24x1xf32> to vector<24x64xf32>
    %200 = arith.mulf %197, %199 : vector<24x64xf32>
    %201 = arith.addf %194, %200 : vector<24x64xf32>
    %c1_50 = arith.constant 1 : index
    %c0_51 = arith.constant 0 : index
    %c0_52 = arith.constant 0 : index
    %202 = vector.load %arg2[%c1_50, %c0_51, %c0_52] : memref<9x64x64xf32, #tpu.memory_space<vmem>>, vector<1x64x64xf32>
    %203 = vector.shape_cast %202 : vector<1x64x64xf32> to vector<64x64xf32>
    %cst_53 = arith.constant dense<0.000000e+00> : vector<24x64xf32>
    %204 = tpu.matmul %193, %203, %cst_53 {dimension_numbers = #tpu.dot_dimension_numbers<[1], [0], [0], [1], [0, 0, 1, 1], [], []>} : vector<24x64xf32>, vector<64x64xf32>, vector<24x64xf32> -> vector<24x64xf32>
    %205 = vector.extract_strided_slice %164 {offsets = [0, 1], sizes = [24, 1], strides = [1, 1]} : vector<24x9xf32> to vector<24x1xf32>
    %206 = vector.broadcast %205 : vector<24x1xf32> to vector<24x64xf32>
    %207 = arith.mulf %204, %206 : vector<24x64xf32>
    %208 = arith.addf %201, %207 : vector<24x64xf32>
    %c2_54 = arith.constant 2 : index
    %c0_55 = arith.constant 0 : index
    %c0_56 = arith.constant 0 : index
    %209 = vector.load %arg2[%c2_54, %c0_55, %c0_56] : memref<9x64x64xf32, #tpu.memory_space<vmem>>, vector<1x64x64xf32>
    %210 = vector.shape_cast %209 : vector<1x64x64xf32> to vector<64x64xf32>
    %cst_57 = arith.constant dense<0.000000e+00> : vector<24x64xf32>
    %211 = tpu.matmul %193, %210, %cst_57 {dimension_numbers = #tpu.dot_dimension_numbers<[1], [0], [0], [1], [0, 0, 1, 1], [], []>} : vector<24x64xf32>, vector<64x64xf32>, vector<24x64xf32> -> vector<24x64xf32>
    %212 = vector.extract_strided_slice %164 {offsets = [0, 2], sizes = [24, 1], strides = [1, 1]} : vector<24x9xf32> to vector<24x1xf32>
    %213 = vector.broadcast %212 : vector<24x1xf32> to vector<24x64xf32>
    %214 = arith.mulf %211, %213 : vector<24x64xf32>
    %215 = arith.addf %208, %214 : vector<24x64xf32>
    %c3_58 = arith.constant 3 : index
    %c0_59 = arith.constant 0 : index
    %c0_60 = arith.constant 0 : index
    %216 = vector.load %arg2[%c3_58, %c0_59, %c0_60] : memref<9x64x64xf32, #tpu.memory_space<vmem>>, vector<1x64x64xf32>
    %217 = vector.shape_cast %216 : vector<1x64x64xf32> to vector<64x64xf32>
    %cst_61 = arith.constant dense<0.000000e+00> : vector<24x64xf32>
    %218 = tpu.matmul %193, %217, %cst_61 {dimension_numbers = #tpu.dot_dimension_numbers<[1], [0], [0], [1], [0, 0, 1, 1], [], []>} : vector<24x64xf32>, vector<64x64xf32>, vector<24x64xf32> -> vector<24x64xf32>
    %219 = vector.extract_strided_slice %164 {offsets = [0, 3], sizes = [24, 1], strides = [1, 1]} : vector<24x9xf32> to vector<24x1xf32>
    %220 = vector.broadcast %219 : vector<24x1xf32> to vector<24x64xf32>
    %221 = arith.mulf %218, %220 : vector<24x64xf32>
    %222 = arith.addf %215, %221 : vector<24x64xf32>
    %c4 = arith.constant 4 : index
    %c0_62 = arith.constant 0 : index
    %c0_63 = arith.constant 0 : index
    %223 = vector.load %arg2[%c4, %c0_62, %c0_63] : memref<9x64x64xf32, #tpu.memory_space<vmem>>, vector<1x64x64xf32>
    %224 = vector.shape_cast %223 : vector<1x64x64xf32> to vector<64x64xf32>
    %cst_64 = arith.constant dense<0.000000e+00> : vector<24x64xf32>
    %225 = tpu.matmul %193, %224, %cst_64 {dimension_numbers = #tpu.dot_dimension_numbers<[1], [0], [0], [1], [0, 0, 1, 1], [], []>} : vector<24x64xf32>, vector<64x64xf32>, vector<24x64xf32> -> vector<24x64xf32>
    %226 = vector.extract_strided_slice %164 {offsets = [0, 4], sizes = [24, 1], strides = [1, 1]} : vector<24x9xf32> to vector<24x1xf32>
    %227 = vector.broadcast %226 : vector<24x1xf32> to vector<24x64xf32>
    %228 = arith.mulf %225, %227 : vector<24x64xf32>
    %229 = arith.addf %222, %228 : vector<24x64xf32>
    %c5 = arith.constant 5 : index
    %c0_65 = arith.constant 0 : index
    %c0_66 = arith.constant 0 : index
    %230 = vector.load %arg2[%c5, %c0_65, %c0_66] : memref<9x64x64xf32, #tpu.memory_space<vmem>>, vector<1x64x64xf32>
    %231 = vector.shape_cast %230 : vector<1x64x64xf32> to vector<64x64xf32>
    %cst_67 = arith.constant dense<0.000000e+00> : vector<24x64xf32>
    %232 = tpu.matmul %193, %231, %cst_67 {dimension_numbers = #tpu.dot_dimension_numbers<[1], [0], [0], [1], [0, 0, 1, 1], [], []>} : vector<24x64xf32>, vector<64x64xf32>, vector<24x64xf32> -> vector<24x64xf32>
    %233 = vector.extract_strided_slice %164 {offsets = [0, 5], sizes = [24, 1], strides = [1, 1]} : vector<24x9xf32> to vector<24x1xf32>
    %234 = vector.broadcast %233 : vector<24x1xf32> to vector<24x64xf32>
    %235 = arith.mulf %232, %234 : vector<24x64xf32>
    %236 = arith.addf %229, %235 : vector<24x64xf32>
    %c6 = arith.constant 6 : index
    %c0_68 = arith.constant 0 : index
    %c0_69 = arith.constant 0 : index
    %237 = vector.load %arg2[%c6, %c0_68, %c0_69] : memref<9x64x64xf32, #tpu.memory_space<vmem>>, vector<1x64x64xf32>
    %238 = vector.shape_cast %237 : vector<1x64x64xf32> to vector<64x64xf32>
    %cst_70 = arith.constant dense<0.000000e+00> : vector<24x64xf32>
    %239 = tpu.matmul %193, %238, %cst_70 {dimension_numbers = #tpu.dot_dimension_numbers<[1], [0], [0], [1], [0, 0, 1, 1], [], []>} : vector<24x64xf32>, vector<64x64xf32>, vector<24x64xf32> -> vector<24x64xf32>
    %240 = vector.extract_strided_slice %164 {offsets = [0, 6], sizes = [24, 1], strides = [1, 1]} : vector<24x9xf32> to vector<24x1xf32>
    %241 = vector.broadcast %240 : vector<24x1xf32> to vector<24x64xf32>
    %242 = arith.mulf %239, %241 : vector<24x64xf32>
    %243 = arith.addf %236, %242 : vector<24x64xf32>
    %c7 = arith.constant 7 : index
    %c0_71 = arith.constant 0 : index
    %c0_72 = arith.constant 0 : index
    %244 = vector.load %arg2[%c7, %c0_71, %c0_72] : memref<9x64x64xf32, #tpu.memory_space<vmem>>, vector<1x64x64xf32>
    %245 = vector.shape_cast %244 : vector<1x64x64xf32> to vector<64x64xf32>
    %cst_73 = arith.constant dense<0.000000e+00> : vector<24x64xf32>
    %246 = tpu.matmul %193, %245, %cst_73 {dimension_numbers = #tpu.dot_dimension_numbers<[1], [0], [0], [1], [0, 0, 1, 1], [], []>} : vector<24x64xf32>, vector<64x64xf32>, vector<24x64xf32> -> vector<24x64xf32>
    %247 = vector.extract_strided_slice %164 {offsets = [0, 7], sizes = [24, 1], strides = [1, 1]} : vector<24x9xf32> to vector<24x1xf32>
    %248 = vector.broadcast %247 : vector<24x1xf32> to vector<24x64xf32>
    %249 = arith.mulf %246, %248 : vector<24x64xf32>
    %250 = arith.addf %243, %249 : vector<24x64xf32>
    %c8 = arith.constant 8 : index
    %c0_74 = arith.constant 0 : index
    %c0_75 = arith.constant 0 : index
    %251 = vector.load %arg2[%c8, %c0_74, %c0_75] : memref<9x64x64xf32, #tpu.memory_space<vmem>>, vector<1x64x64xf32>
    %252 = vector.shape_cast %251 : vector<1x64x64xf32> to vector<64x64xf32>
    %cst_76 = arith.constant dense<0.000000e+00> : vector<24x64xf32>
    %253 = tpu.matmul %193, %252, %cst_76 {dimension_numbers = #tpu.dot_dimension_numbers<[1], [0], [0], [1], [0, 0, 1, 1], [], []>} : vector<24x64xf32>, vector<64x64xf32>, vector<24x64xf32> -> vector<24x64xf32>
    %254 = vector.extract_strided_slice %164 {offsets = [0, 8], sizes = [24, 1], strides = [1, 1]} : vector<24x9xf32> to vector<24x1xf32>
    %255 = vector.broadcast %254 : vector<24x1xf32> to vector<24x64xf32>
    %256 = arith.mulf %253, %255 : vector<24x64xf32>
    %257 = arith.addf %250, %256 : vector<24x64xf32>
    %c0_77 = arith.constant 0 : index
    %c0_78 = arith.constant 0 : index
    %258 = vector.load %arg16[%c0_77, %c0_78] : memref<24x1xf32, #tpu.memory_space<vmem>>, vector<24x1xf32>
    %259 = vector.broadcast %258 : vector<24x1xf32> to vector<24x64xf32>
    %260 = arith.mulf %257, %259 : vector<24x64xf32>
    %c0_79 = arith.constant 0 : index
    %c0_80 = arith.constant 0 : index
    %261 = vector.load %arg17[%c0_79, %c0_80] : memref<24x1xf32, #tpu.memory_space<vmem>>, vector<24x1xf32>
    %262 = vector.broadcast %261 : vector<24x1xf32> to vector<24x64xf32>
    %263 = arith.addf %260, %262 : vector<24x64xf32>
    %cst_81 = arith.constant 0.000000e+00 : f32
    %264 = vector.broadcast %cst_81 : f32 to vector<24x64xf32>
    %265 = arith.maximumf %263, %264 : vector<24x64xf32>
    %c0_82 = arith.constant 0 : index
    %c0_83 = arith.constant 0 : index
    %266 = vector.load %arg18[%c0_82, %c0_83] : memref<4x24xf32, #tpu.memory_space<vmem>>, vector<4x24xf32>
    %cst_84 = arith.constant dense<0.000000e+00> : vector<4x64xf32>
    %267 = tpu.matmul %266, %265, %cst_84 {dimension_numbers = #tpu.dot_dimension_numbers<[1], [0], [0], [1], [0, 0, 1, 1], [], []>} : vector<4x24xf32>, vector<24x64xf32>, vector<4x64xf32> -> vector<4x64xf32>
    %c0_85 = arith.constant 0 : index
    %c0_86 = arith.constant 0 : index
    %268 = vector.load %arg19[%c0_85, %c0_86] : memref<4x1xf32, #tpu.memory_space<vmem>>, vector<4x1xf32>
    %269 = vector.broadcast %268 : vector<4x1xf32> to vector<4x64xf32>
    %270 = arith.mulf %267, %269 : vector<4x64xf32>
    %c0_87 = arith.constant 0 : index
    %c0_88 = arith.constant 0 : index
    %271 = vector.load %arg20[%c0_87, %c0_88] : memref<4x1xf32, #tpu.memory_space<vmem>>, vector<4x1xf32>
    %272 = vector.broadcast %271 : vector<4x1xf32> to vector<4x64xf32>
    %273 = arith.addf %270, %272 : vector<4x64xf32>
    %274 = arith.addf %273, %160 : vector<4x64xf32>
    %c0_89 = arith.constant 0 : index
    %c0_90 = arith.constant 0 : index
    %275 = vector.load %arg21[%c0_89, %c0_90] : memref<24x4xf32, #tpu.memory_space<vmem>>, vector<24x4xf32>
    %c0_91 = arith.constant 0 : index
    %c0_92 = arith.constant 0 : index
    %276 = vector.load %arg22[%c0_91, %c0_92] : memref<24x1xf32, #tpu.memory_space<vmem>>, vector<24x1xf32>
    %c0_93 = arith.constant 0 : index
    %c0_94 = arith.constant 0 : index
    %277 = vector.load %arg23[%c0_93, %c0_94] : memref<24x1xf32, #tpu.memory_space<vmem>>, vector<24x1xf32>
    %c0_95 = arith.constant 0 : index
    %c0_96 = arith.constant 0 : index
    %278 = vector.load %arg24[%c0_95, %c0_96] : memref<24x9xf32, #tpu.memory_space<vmem>>, vector<24x9xf32>
    %279 = vector.extract_strided_slice %275 {offsets = [0, 0], sizes = [24, 1], strides = [1, 1]} : vector<24x4xf32> to vector<24x1xf32>
    %280 = vector.extract_strided_slice %274 {offsets = [0, 0], sizes = [1, 64], strides = [1, 1]} : vector<4x64xf32> to vector<1x64xf32>
    %281 = vector.broadcast %279 : vector<24x1xf32> to vector<24x64xf32>
    %282 = vector.broadcast %280 : vector<1x64xf32> to vector<24x64xf32>
    %283 = arith.mulf %281, %282 : vector<24x64xf32>
    %284 = vector.extract_strided_slice %275 {offsets = [0, 1], sizes = [24, 1], strides = [1, 1]} : vector<24x4xf32> to vector<24x1xf32>
    %285 = vector.extract_strided_slice %274 {offsets = [1, 0], sizes = [1, 64], strides = [1, 1]} : vector<4x64xf32> to vector<1x64xf32>
    %286 = vector.broadcast %284 : vector<24x1xf32> to vector<24x64xf32>
    %287 = vector.broadcast %285 : vector<1x64xf32> to vector<24x64xf32>
    %288 = arith.mulf %286, %287 : vector<24x64xf32>
    %289 = arith.addf %283, %288 : vector<24x64xf32>
    %290 = vector.extract_strided_slice %275 {offsets = [0, 2], sizes = [24, 1], strides = [1, 1]} : vector<24x4xf32> to vector<24x1xf32>
    %291 = vector.extract_strided_slice %274 {offsets = [2, 0], sizes = [1, 64], strides = [1, 1]} : vector<4x64xf32> to vector<1x64xf32>
    %292 = vector.broadcast %290 : vector<24x1xf32> to vector<24x64xf32>
    %293 = vector.broadcast %291 : vector<1x64xf32> to vector<24x64xf32>
    %294 = arith.mulf %292, %293 : vector<24x64xf32>
    %295 = arith.addf %289, %294 : vector<24x64xf32>
    %296 = vector.extract_strided_slice %275 {offsets = [0, 3], sizes = [24, 1], strides = [1, 1]} : vector<24x4xf32> to vector<24x1xf32>
    %297 = vector.extract_strided_slice %274 {offsets = [3, 0], sizes = [1, 64], strides = [1, 1]} : vector<4x64xf32> to vector<1x64xf32>
    %298 = vector.broadcast %296 : vector<24x1xf32> to vector<24x64xf32>
    %299 = vector.broadcast %297 : vector<1x64xf32> to vector<24x64xf32>
    %300 = arith.mulf %298, %299 : vector<24x64xf32>
    %301 = arith.addf %295, %300 : vector<24x64xf32>
    %302 = vector.broadcast %276 : vector<24x1xf32> to vector<24x64xf32>
    %303 = arith.mulf %301, %302 : vector<24x64xf32>
    %304 = vector.broadcast %277 : vector<24x1xf32> to vector<24x64xf32>
    %305 = arith.addf %303, %304 : vector<24x64xf32>
    %cst_97 = arith.constant 0.000000e+00 : f32
    %306 = vector.broadcast %cst_97 : f32 to vector<24x64xf32>
    %307 = arith.maximumf %305, %306 : vector<24x64xf32>
    %cst_98 = arith.constant 0.000000e+00 : f32
    %308 = vector.broadcast %cst_98 : f32 to vector<24x64xf32>
    %c0_99 = arith.constant 0 : index
    %c0_100 = arith.constant 0 : index
    %c0_101 = arith.constant 0 : index
    %309 = vector.load %arg2[%c0_99, %c0_100, %c0_101] : memref<9x64x64xf32, #tpu.memory_space<vmem>>, vector<1x64x64xf32>
    %310 = vector.shape_cast %309 : vector<1x64x64xf32> to vector<64x64xf32>
    %cst_102 = arith.constant dense<0.000000e+00> : vector<24x64xf32>
    %311 = tpu.matmul %307, %310, %cst_102 {dimension_numbers = #tpu.dot_dimension_numbers<[1], [0], [0], [1], [0, 0, 1, 1], [], []>} : vector<24x64xf32>, vector<64x64xf32>, vector<24x64xf32> -> vector<24x64xf32>
    %312 = vector.extract_strided_slice %278 {offsets = [0, 0], sizes = [24, 1], strides = [1, 1]} : vector<24x9xf32> to vector<24x1xf32>
    %313 = vector.broadcast %312 : vector<24x1xf32> to vector<24x64xf32>
    %314 = arith.mulf %311, %313 : vector<24x64xf32>
    %315 = arith.addf %308, %314 : vector<24x64xf32>
    %c1_103 = arith.constant 1 : index
    %c0_104 = arith.constant 0 : index
    %c0_105 = arith.constant 0 : index
    %316 = vector.load %arg2[%c1_103, %c0_104, %c0_105] : memref<9x64x64xf32, #tpu.memory_space<vmem>>, vector<1x64x64xf32>
    %317 = vector.shape_cast %316 : vector<1x64x64xf32> to vector<64x64xf32>
    %cst_106 = arith.constant dense<0.000000e+00> : vector<24x64xf32>
    %318 = tpu.matmul %307, %317, %cst_106 {dimension_numbers = #tpu.dot_dimension_numbers<[1], [0], [0], [1], [0, 0, 1, 1], [], []>} : vector<24x64xf32>, vector<64x64xf32>, vector<24x64xf32> -> vector<24x64xf32>
    %319 = vector.extract_strided_slice %278 {offsets = [0, 1], sizes = [24, 1], strides = [1, 1]} : vector<24x9xf32> to vector<24x1xf32>
    %320 = vector.broadcast %319 : vector<24x1xf32> to vector<24x64xf32>
    %321 = arith.mulf %318, %320 : vector<24x64xf32>
    %322 = arith.addf %315, %321 : vector<24x64xf32>
    %c2_107 = arith.constant 2 : index
    %c0_108 = arith.constant 0 : index
    %c0_109 = arith.constant 0 : index
    %323 = vector.load %arg2[%c2_107, %c0_108, %c0_109] : memref<9x64x64xf32, #tpu.memory_space<vmem>>, vector<1x64x64xf32>
    %324 = vector.shape_cast %323 : vector<1x64x64xf32> to vector<64x64xf32>
    %cst_110 = arith.constant dense<0.000000e+00> : vector<24x64xf32>
    %325 = tpu.matmul %307, %324, %cst_110 {dimension_numbers = #tpu.dot_dimension_numbers<[1], [0], [0], [1], [0, 0, 1, 1], [], []>} : vector<24x64xf32>, vector<64x64xf32>, vector<24x64xf32> -> vector<24x64xf32>
    %326 = vector.extract_strided_slice %278 {offsets = [0, 2], sizes = [24, 1], strides = [1, 1]} : vector<24x9xf32> to vector<24x1xf32>
    %327 = vector.broadcast %326 : vector<24x1xf32> to vector<24x64xf32>
    %328 = arith.mulf %325, %327 : vector<24x64xf32>
    %329 = arith.addf %322, %328 : vector<24x64xf32>
    %c3_111 = arith.constant 3 : index
    %c0_112 = arith.constant 0 : index
    %c0_113 = arith.constant 0 : index
    %330 = vector.load %arg2[%c3_111, %c0_112, %c0_113] : memref<9x64x64xf32, #tpu.memory_space<vmem>>, vector<1x64x64xf32>
    %331 = vector.shape_cast %330 : vector<1x64x64xf32> to vector<64x64xf32>
    %cst_114 = arith.constant dense<0.000000e+00> : vector<24x64xf32>
    %332 = tpu.matmul %307, %331, %cst_114 {dimension_numbers = #tpu.dot_dimension_numbers<[1], [0], [0], [1], [0, 0, 1, 1], [], []>} : vector<24x64xf32>, vector<64x64xf32>, vector<24x64xf32> -> vector<24x64xf32>
    %333 = vector.extract_strided_slice %278 {offsets = [0, 3], sizes = [24, 1], strides = [1, 1]} : vector<24x9xf32> to vector<24x1xf32>
    %334 = vector.broadcast %333 : vector<24x1xf32> to vector<24x64xf32>
    %335 = arith.mulf %332, %334 : vector<24x64xf32>
    %336 = arith.addf %329, %335 : vector<24x64xf32>
    %c4_115 = arith.constant 4 : index
    %c0_116 = arith.constant 0 : index
    %c0_117 = arith.constant 0 : index
    %337 = vector.load %arg2[%c4_115, %c0_116, %c0_117] : memref<9x64x64xf32, #tpu.memory_space<vmem>>, vector<1x64x64xf32>
    %338 = vector.shape_cast %337 : vector<1x64x64xf32> to vector<64x64xf32>
    %cst_118 = arith.constant dense<0.000000e+00> : vector<24x64xf32>
    %339 = tpu.matmul %307, %338, %cst_118 {dimension_numbers = #tpu.dot_dimension_numbers<[1], [0], [0], [1], [0, 0, 1, 1], [], []>} : vector<24x64xf32>, vector<64x64xf32>, vector<24x64xf32> -> vector<24x64xf32>
    %340 = vector.extract_strided_slice %278 {offsets = [0, 4], sizes = [24, 1], strides = [1, 1]} : vector<24x9xf32> to vector<24x1xf32>
    %341 = vector.broadcast %340 : vector<24x1xf32> to vector<24x64xf32>
    %342 = arith.mulf %339, %341 : vector<24x64xf32>
    %343 = arith.addf %336, %342 : vector<24x64xf32>
    %c5_119 = arith.constant 5 : index
    %c0_120 = arith.constant 0 : index
    %c0_121 = arith.constant 0 : index
    %344 = vector.load %arg2[%c5_119, %c0_120, %c0_121] : memref<9x64x64xf32, #tpu.memory_space<vmem>>, vector<1x64x64xf32>
    %345 = vector.shape_cast %344 : vector<1x64x64xf32> to vector<64x64xf32>
    %cst_122 = arith.constant dense<0.000000e+00> : vector<24x64xf32>
    %346 = tpu.matmul %307, %345, %cst_122 {dimension_numbers = #tpu.dot_dimension_numbers<[1], [0], [0], [1], [0, 0, 1, 1], [], []>} : vector<24x64xf32>, vector<64x64xf32>, vector<24x64xf32> -> vector<24x64xf32>
    %347 = vector.extract_strided_slice %278 {offsets = [0, 5], sizes = [24, 1], strides = [1, 1]} : vector<24x9xf32> to vector<24x1xf32>
    %348 = vector.broadcast %347 : vector<24x1xf32> to vector<24x64xf32>
    %349 = arith.mulf %346, %348 : vector<24x64xf32>
    %350 = arith.addf %343, %349 : vector<24x64xf32>
    %c6_123 = arith.constant 6 : index
    %c0_124 = arith.constant 0 : index
    %c0_125 = arith.constant 0 : index
    %351 = vector.load %arg2[%c6_123, %c0_124, %c0_125] : memref<9x64x64xf32, #tpu.memory_space<vmem>>, vector<1x64x64xf32>
    %352 = vector.shape_cast %351 : vector<1x64x64xf32> to vector<64x64xf32>
    %cst_126 = arith.constant dense<0.000000e+00> : vector<24x64xf32>
    %353 = tpu.matmul %307, %352, %cst_126 {dimension_numbers = #tpu.dot_dimension_numbers<[1], [0], [0], [1], [0, 0, 1, 1], [], []>} : vector<24x64xf32>, vector<64x64xf32>, vector<24x64xf32> -> vector<24x64xf32>
    %354 = vector.extract_strided_slice %278 {offsets = [0, 6], sizes = [24, 1], strides = [1, 1]} : vector<24x9xf32> to vector<24x1xf32>
    %355 = vector.broadcast %354 : vector<24x1xf32> to vector<24x64xf32>
    %356 = arith.mulf %353, %355 : vector<24x64xf32>
    %357 = arith.addf %350, %356 : vector<24x64xf32>
    %c7_127 = arith.constant 7 : index
    %c0_128 = arith.constant 0 : index
    %c0_129 = arith.constant 0 : index
    %358 = vector.load %arg2[%c7_127, %c0_128, %c0_129] : memref<9x64x64xf32, #tpu.memory_space<vmem>>, vector<1x64x64xf32>
    %359 = vector.shape_cast %358 : vector<1x64x64xf32> to vector<64x64xf32>
    %cst_130 = arith.constant dense<0.000000e+00> : vector<24x64xf32>
    %360 = tpu.matmul %307, %359, %cst_130 {dimension_numbers = #tpu.dot_dimension_numbers<[1], [0], [0], [1], [0, 0, 1, 1], [], []>} : vector<24x64xf32>, vector<64x64xf32>, vector<24x64xf32> -> vector<24x64xf32>
    %361 = vector.extract_strided_slice %278 {offsets = [0, 7], sizes = [24, 1], strides = [1, 1]} : vector<24x9xf32> to vector<24x1xf32>
    %362 = vector.broadcast %361 : vector<24x1xf32> to vector<24x64xf32>
    %363 = arith.mulf %360, %362 : vector<24x64xf32>
    %364 = arith.addf %357, %363 : vector<24x64xf32>
    %c8_131 = arith.constant 8 : index
    %c0_132 = arith.constant 0 : index
    %c0_133 = arith.constant 0 : index
    %365 = vector.load %arg2[%c8_131, %c0_132, %c0_133] : memref<9x64x64xf32, #tpu.memory_space<vmem>>, vector<1x64x64xf32>
    %366 = vector.shape_cast %365 : vector<1x64x64xf32> to vector<64x64xf32>
    %cst_134 = arith.constant dense<0.000000e+00> : vector<24x64xf32>
    %367 = tpu.matmul %307, %366, %cst_134 {dimension_numbers = #tpu.dot_dimension_numbers<[1], [0], [0], [1], [0, 0, 1, 1], [], []>} : vector<24x64xf32>, vector<64x64xf32>, vector<24x64xf32> -> vector<24x64xf32>
    %368 = vector.extract_strided_slice %278 {offsets = [0, 8], sizes = [24, 1], strides = [1, 1]} : vector<24x9xf32> to vector<24x1xf32>
    %369 = vector.broadcast %368 : vector<24x1xf32> to vector<24x64xf32>
    %370 = arith.mulf %367, %369 : vector<24x64xf32>
    %371 = arith.addf %364, %370 : vector<24x64xf32>
    %c0_135 = arith.constant 0 : index
    %c0_136 = arith.constant 0 : index
    %372 = vector.load %arg25[%c0_135, %c0_136] : memref<24x1xf32, #tpu.memory_space<vmem>>, vector<24x1xf32>
    %373 = vector.broadcast %372 : vector<24x1xf32> to vector<24x64xf32>
    %374 = arith.mulf %371, %373 : vector<24x64xf32>
    %c0_137 = arith.constant 0 : index
    %c0_138 = arith.constant 0 : index
    %375 = vector.load %arg26[%c0_137, %c0_138] : memref<24x1xf32, #tpu.memory_space<vmem>>, vector<24x1xf32>
    %376 = vector.broadcast %375 : vector<24x1xf32> to vector<24x64xf32>
    %377 = arith.addf %374, %376 : vector<24x64xf32>
    %cst_139 = arith.constant 0.000000e+00 : f32
    %378 = vector.broadcast %cst_139 : f32 to vector<24x64xf32>
    %379 = arith.maximumf %377, %378 : vector<24x64xf32>
    %c0_140 = arith.constant 0 : index
    %c0_141 = arith.constant 0 : index
    %380 = vector.load %arg27[%c0_140, %c0_141] : memref<4x24xf32, #tpu.memory_space<vmem>>, vector<4x24xf32>
    %cst_142 = arith.constant dense<0.000000e+00> : vector<4x64xf32>
    %381 = tpu.matmul %380, %379, %cst_142 {dimension_numbers = #tpu.dot_dimension_numbers<[1], [0], [0], [1], [0, 0, 1, 1], [], []>} : vector<4x24xf32>, vector<24x64xf32>, vector<4x64xf32> -> vector<4x64xf32>
    %c0_143 = arith.constant 0 : index
    %c0_144 = arith.constant 0 : index
    %382 = vector.load %arg28[%c0_143, %c0_144] : memref<4x1xf32, #tpu.memory_space<vmem>>, vector<4x1xf32>
    %383 = vector.broadcast %382 : vector<4x1xf32> to vector<4x64xf32>
    %384 = arith.mulf %381, %383 : vector<4x64xf32>
    %c0_145 = arith.constant 0 : index
    %c0_146 = arith.constant 0 : index
    %385 = vector.load %arg29[%c0_145, %c0_146] : memref<4x1xf32, #tpu.memory_space<vmem>>, vector<4x1xf32>
    %386 = vector.broadcast %385 : vector<4x1xf32> to vector<4x64xf32>
    %387 = arith.addf %384, %386 : vector<4x64xf32>
    %388 = arith.addf %387, %274 : vector<4x64xf32>
    %c0_147 = arith.constant 0 : index
    %c0_148 = arith.constant 0 : index
    %c0_149 = arith.constant 0 : index
    %389 = vector.load %arg30[%c0_147, %c0_148, %c0_149] : memref<1x4x64xf32, #tpu.memory_space<vmem>>, vector<1x4x64xf32>
    %390 = vector.shape_cast %389 : vector<1x4x64xf32> to vector<4x64xf32>
    %391 = vector.shape_cast %388 : vector<4x64xf32> to vector<1x4x64xf32>
    tpu.vector_store %arg30[%c0_147, %c0_148, %c0_149], %391 {strides = array<i32>} : memref<1x4x64xf32, #tpu.memory_space<vmem>>, vector<1x4x64xf32>,
    return
  }
  func.func @transform_0(%arg0: i32) -> (i32, i32, i32, i32) {
    %c0_i32 = arith.constant 0 : i32
    %c0_i32_0 = arith.constant 0 : i32
    %c0_i32_1 = arith.constant 0 : i32
    %c0_i32_2 = arith.constant 0 : i32
    return %arg0, %c0_i32, %c0_i32_0, %c0_i32_1 : i32, i32, i32, i32
  }
  func.func @transform_1(%arg0: i32) -> (i32, i32, i32) {
    %c0_i32 = arith.constant 0 : i32
    %c0_i32_0 = arith.constant 0 : i32
    %c0_i32_1 = arith.constant 0 : i32
    %c0_i32_2 = arith.constant 0 : i32
    return %c0_i32, %c0_i32_0, %c0_i32_1 : i32, i32, i32
  }
  func.func @transform_2(%arg0: i32) -> (i32, i32) {
    %c0_i32 = arith.constant 0 : i32
    %c0_i32_0 = arith.constant 0 : i32
    %c0_i32_1 = arith.constant 0 : i32
    return %c0_i32, %c0_i32_0 : i32, i32
  }
  func.func @transform_3(%arg0: i32) -> (i32, i32) {
    %c0_i32 = arith.constant 0 : i32
    %c0_i32_0 = arith.constant 0 : i32
    %c0_i32_1 = arith.constant 0 : i32
    return %c0_i32, %c0_i32_0 : i32, i32
  }
  func.func @transform_4(%arg0: i32) -> (i32, i32) {
    %c0_i32 = arith.constant 0 : i32
    %c0_i32_0 = arith.constant 0 : i32
    %c0_i32_1 = arith.constant 0 : i32
    return %c0_i32, %c0_i32_0 : i32, i32
  }
  func.func @transform_5(%arg0: i32) -> (i32, i32) {
    %c0_i32 = arith.constant 0 : i32
    %c0_i32_0 = arith.constant 0 : i32
    %c0_i32_1 = arith.constant 0 : i32
    return %c0_i32, %c0_i32_0 : i32, i32
  }
  func.func @transform_6(%arg0: i32) -> (i32, i32) {
    %c0_i32 = arith.constant 0 : i32
    %c0_i32_0 = arith.constant 0 : i32
    %c0_i32_1 = arith.constant 0 : i32
    return %c0_i32, %c0_i32_0 : i32, i32
  }
  func.func @transform_7(%arg0: i32) -> (i32, i32) {
    %c0_i32 = arith.constant 0 : i32
    %c0_i32_0 = arith.constant 0 : i32
    %c0_i32_1 = arith.constant 0 : i32
    return %c0_i32, %c0_i32_0 : i32, i32
  }
  func.func @transform_8(%arg0: i32) -> (i32, i32) {
    %c0_i32 = arith.constant 0 : i32
    %c0_i32_0 = arith.constant 0 : i32
    %c0_i32_1 = arith.constant 0 : i32
    return %c0_i32, %c0_i32_0 : i32, i32
  }
  func.func @transform_9(%arg0: i32) -> (i32, i32) {
    %c0_i32 = arith.constant 0 : i32
    %c0_i32_0 = arith.constant 0 : i32
    %c0_i32_1 = arith.constant 0 : i32
    return %c0_i32, %c0_i32_0 : i32, i32
  }
  func.func @transform_10(%arg0: i32) -> (i32, i32) {
    %c0_i32 = arith.constant 0 : i32
    %c0_i32_0 = arith.constant 0 : i32
    %c0_i32_1 = arith.constant 0 : i32
    return %c0_i32, %c0_i32_0 : i32, i32
  }
  func.func @transform_11(%arg0: i32) -> (i32, i32) {
    %c0_i32 = arith.constant 0 : i32
    %c0_i32_0 = arith.constant 0 : i32
    %c0_i32_1 = arith.constant 0 : i32
    return %c0_i32, %c0_i32_0 : i32, i32
  }
  func.func @transform_12(%arg0: i32) -> (i32, i32) {
    %c0_i32 = arith.constant 0 : i32
    %c0_i32_0 = arith.constant 0 : i32
    %c0_i32_1 = arith.constant 0 : i32
    return %c0_i32, %c0_i32_0 : i32, i32
  }
  func.func @transform_13(%arg0: i32) -> (i32, i32) {
    %c0_i32 = arith.constant 0 : i32
    %c0_i32_0 = arith.constant 0 : i32
    %c0_i32_1 = arith.constant 0 : i32
    return %c0_i32, %c0_i32_0 : i32, i32
  }
  func.func @transform_14(%arg0: i32) -> (i32, i32) {
    %c0_i32 = arith.constant 0 : i32
    %c0_i32_0 = arith.constant 0 : i32
    %c0_i32_1 = arith.constant 0 : i32
    return %c0_i32, %c0_i32_0 : i32, i32
  }
  func.func @transform_15(%arg0: i32) -> (i32, i32) {
    %c0_i32 = arith.constant 0 : i32
    %c0_i32_0 = arith.constant 0 : i32
    %c0_i32_1 = arith.constant 0 : i32
    return %c0_i32, %c0_i32_0 : i32, i32
  }
  func.func @transform_16(%arg0: i32) -> (i32, i32) {
    %c0_i32 = arith.constant 0 : i32
    %c0_i32_0 = arith.constant 0 : i32
    %c0_i32_1 = arith.constant 0 : i32
    return %c0_i32, %c0_i32_0 : i32, i32
  }
  func.func @transform_17(%arg0: i32) -> (i32, i32) {
    %c0_i32 = arith.constant 0 : i32
    %c0_i32_0 = arith.constant 0 : i32
    %c0_i32_1 = arith.constant 0 : i32
    return %c0_i32, %c0_i32_0 : i32, i32
  }
  func.func @transform_18(%arg0: i32) -> (i32, i32) {
    %c0_i32 = arith.constant 0 : i32
    %c0_i32_0 = arith.constant 0 : i32
    %c0_i32_1 = arith.constant 0 : i32
    return %c0_i32, %c0_i32_0 : i32, i32
  }
  func.func @transform_19(%arg0: i32) -> (i32, i32) {
    %c0_i32 = arith.constant 0 : i32
    %c0_i32_0 = arith.constant 0 : i32
    %c0_i32_1 = arith.constant 0 : i32
    return %c0_i32, %c0_i32_0 : i32, i32
  }
  func.func @transform_20(%arg0: i32) -> (i32, i32) {
    %c0_i32 = arith.constant 0 : i32
    %c0_i32_0 = arith.constant 0 : i32
    %c0_i32_1 = arith.constant 0 : i32
    return %c0_i32, %c0_i32_0 : i32, i32
  }
  func.func @transform_21(%arg0: i32) -> (i32, i32) {
    %c0_i32 = arith.constant 0 : i32
    %c0_i32_0 = arith.constant 0 : i32
    %c0_i32_1 = arith.constant 0 : i32
    return %c0_i32, %c0_i32_0 : i32, i32
  }
  func.func @transform_22(%arg0: i32) -> (i32, i32) {
    %c0_i32 = arith.constant 0 : i32
    %c0_i32_0 = arith.constant 0 : i32
    %c0_i32_1 = arith.constant 0 : i32
    return %c0_i32, %c0_i32_0 : i32, i32
  }
  func.func @transform_23(%arg0: i32) -> (i32, i32) {
    %c0_i32 = arith.constant 0 : i32
    %c0_i32_0 = arith.constant 0 : i32
    %c0_i32_1 = arith.constant 0 : i32
    return %c0_i32, %c0_i32_0 : i32, i32
  }
  func.func @transform_24(%arg0: i32) -> (i32, i32) {
    %c0_i32 = arith.constant 0 : i32
    %c0_i32_0 = arith.constant 0 : i32
    %c0_i32_1 = arith.constant 0 : i32
    return %c0_i32, %c0_i32_0 : i32, i32
  }
  func.func @transform_25(%arg0: i32) -> (i32, i32) {
    %c0_i32 = arith.constant 0 : i32
    %c0_i32_0 = arith.constant 0 : i32
    %c0_i32_1 = arith.constant 0 : i32
    return %c0_i32, %c0_i32_0 : i32, i32
  }
  func.func @transform_26(%arg0: i32) -> (i32, i32) {
    %c0_i32 = arith.constant 0 : i32
    %c0_i32_0 = arith.constant 0 : i32
    %c0_i32_1 = arith.constant 0 : i32
    return %c0_i32, %c0_i32_0 : i32, i32
  }
  func.func @transform_27(%arg0: i32) -> (i32, i32) {
    %c0_i32 = arith.constant 0 : i32
    %c0_i32_0 = arith.constant 0 : i32
    %c0_i32_1 = arith.constant 0 : i32
    return %c0_i32, %c0_i32_0 : i32, i32
  }
  func.func @transform_28(%arg0: i32) -> (i32, i32) {
    %c0_i32 = arith.constant 0 : i32
    %c0_i32_0 = arith.constant 0 : i32
    %c0_i32_1 = arith.constant 0 : i32
    return %c0_i32, %c0_i32_0 : i32, i32
  }
  func.func @transform_29(%arg0: i32) -> (i32, i32, i32) {
    %c0_i32 = arith.constant 0 : i32
    %c0_i32_0 = arith.constant 0 : i32
    %c0_i32_1 = arith.constant 0 : i32
    return %arg0, %c0_i32, %c0_i32_0 : i32, i32, i32
  }
}

</mosaic_0001>

<bundles_post_ra>
// kernel: rescale_forward.1
= control target key start
LH: loop header
LB: loop body
LE: loop exit
PB: predicated region body
PF: predicated region fallthrough
CT: control target
= control target key end

     0   :  { %s5078_s6 = smov 1   ;;  %s5079_s10 = smov 2   ;;  %s6340_s0 = inlined_call_operand.smem [shape: u32[30], index: -1, kind: input, shape index: {}] }
   0x1   :  { %s5127_s5 = sld [smem:[%s6340_s0]]   ;;  %s5080_s14 = smov 3  }
   0x2   :  { %s5132_s9 = sld [smem:[%s6340_s0 + %s5078_s6]]   ;;  %s5081_s18 = smov 4  }
   0x3   :  { %s5137_s13 = sld [smem:[%s6340_s0 + %s5079_s10]]   ;;  %s5082_s22 = smov 5  }
   0x4   :  { %s5142_s17 = sld [smem:[%s6340_s0 + %s5080_s14]]   ;;  %s5083_s26 = smov 6  }
   0x5   :  { %s5147_s21 = sld [smem:[%s6340_s0 + %s5081_s18]]   ;;  %s5084_s30 = smov 7  }
   0x6   :  { %s5152_s25 = sld [smem:[%s6340_s0 + %s5082_s22]]   ;;  %s5085_s4 = smov 8  }
   0x7   :  { %s5157_s29 = sld [smem:[%s6340_s0 + %s5083_s26]]   ;;  %s5086_s10 = smov 9  }
   0x8   :  { %6401 = sst [smem:[#allocation2_spill]] %s5132_s9  ;;  %s5087_s15 = smov 10  }
   0x9   :  { %s5162_s3 = sld [smem:[%s6340_s0 + %s5084_s30]]   ;;  %s5088_s20 = smov 11  }
   0xa   :  { %s5167_s8 = sld [smem:[%s6340_s0 + %s5085_s4]]   ;;  %s5089_s26 = smov 12  }
   0xb   :  { %s5172_s14 = sld [smem:[%s6340_s0 + %s5086_s10]]   ;;  %s5090_s1 = smov 13  }
   0xc   :  { %s5177_s19 = sld [smem:[%s6340_s0 + %s5087_s15]]   ;;  %s5091_s7 = smov 14  }
   0xd   :  { %s5182_s24 = sld [smem:[%s6340_s0 + %s5088_s20]]   ;;  %s5092_s15 = smov 15  }
   0xe   :  { %s5187_s30 = sld [smem:[%s6340_s0 + %s5089_s26]]   ;;  %s5093_s22 = smov 16  }
   0xf   :  { %s5192_s6 = sld [smem:[%s6340_s0 + %s5090_s1]]   ;;  %s5094_s28 = smov 17  }
  0x10   :  { %s5197_s12 = sld [smem:[%s6340_s0 + %s5091_s7]]   ;;  %s5095_s7 = smov 18  }
  0x11   :  { %s5202_s20 = sld [smem:[%s6340_s0 + %s5092_s15]]   ;;  %s5096_s15 = smov 19  }
  0x12   :  { %s5207_s27 = sld [smem:[%s6340_s0 + %s5093_s22]]   ;;  %s5097_s22 = smov 20  }
  0x13   :  { %s5212_s4 = sld [smem:[%s6340_s0 + %s5094_s28]]   ;;  %s5098_s28 = smov 21  }
  0x14   :  { %s5217_s9 = sld [smem:[%s6340_s0 + %s5095_s7]]   ;;  %s5099_s7 = smov 22  }
  0x17   :  { %6402 = sst [smem:[#allocation3_spill]] %s5202_s20 }
  0x18   :  { %6403 = sst [smem:[#allocation4_spill]] %s5207_s27 }
  0x19   :  { %6404 = sst [smem:[#allocation5_spill]] %s5212_s4 }
  0x1a   :  { %6405 = sst [smem:[#allocation6_spill]] %s5217_s9 }
  0x1b   :  { %s5222_s20 = sld [smem:[%s6340_s0 + %s5096_s15]]   ;;  %s5100_s15 = smov 23  }
  0x1c   :  { %s5227_s27 = sld [smem:[%s6340_s0 + %s5097_s22]]   ;;  %s5101_s22 = smov 24  }
  0x1d   :  { %s5232_s4 = sld [smem:[%s6340_s0 + %s5098_s28]]   ;;  %s5102_s28 = smov 25  }
  0x1e   :  { %s5237_s9 = sld [smem:[%s6340_s0 + %s5099_s7]]   ;;  %s5103_s7 = smov 26  }
  0x21   :  { %6406 = sst [smem:[#allocation7_spill]] %s5222_s20 }
  0x22   :  { %6407 = sst [smem:[#allocation8_spill]] %s5227_s27 }
  0x23   :  { %6408 = sst [smem:[#allocation9_spill]] %s5232_s4 }
  0x24   :  { %6409 = sst [smem:[#allocation10_spill]] %s5237_s9 }
  0x25   :  { %s5242_s20 = sld [smem:[%s6340_s0 + %s5100_s15]]   ;;  %s5104_s15 = smov 27  }
  0x26   :  { %s5247_s27 = sld [smem:[%s6340_s0 + %s5101_s22]]   ;;  %s5105_s22 = smov 28  }
  0x27   :  { %s5252_s4 = sld [smem:[%s6340_s0 + %s5102_s28]]   ;;  %s5106_s28 = smov 29  }
  0x28   :  { %s5257_s9 = sld [smem:[%s6340_s0 + %s5103_s7]]   ;;  %s5274_s7 = smov 0  }
  0x2b   :  { %6410 = sst [smem:[#allocation11_spill]] %s5242_s20 }
  0x2c   :  { %6411 = sst [smem:[#allocation12_spill]] %s5247_s27 }
  0x2d   :  { %6412 = sst [smem:[#allocation13_spill]] %s5252_s4 }
  0x2e   :  { %s5262_s20 = sld [smem:[%s6340_s0 + %s5104_s15]]  }
  0x2f   :  { %s5267_s27 = sld [smem:[%s6340_s0 + %s5105_s22]]  }
  0x30   :  { %s5272_s4 = sld [smem:[%s6340_s0 + %s5106_s28]]  }
  0x31 LB: > { %s3893_s10 = sadd.s32 4294967295, %s5076_s7   ;;  %p3897_p0 = scmp.ge.s32.totalorder %s5076_s7, 1  ;;  %s5076_s7 = sphi %s5274_s7, %s69_s7  }
  0x32   : > { %p817_p1 = scmp.lt.s32.totalorder %s5076_s7, 3 }
  0x34   : > { %p818_p2 = pnand %p3897_p0, %p817_p1 }
  0x36   : > { %821 = sbr.rel (%p818_p2) target bundleno = 1577 (0x629), region = 136 }
  0x3d   : > { %v902_v0 = vld [vmem:[%s5137_s13 + $0x8] sm:$0xff]  ;;  %v901_v1 = vld [vmem:[%s5137_s13] sm:$0xff]  ;;  %v6352_v2 = vmov 3   ;;  %v6350_v3 = vmov 1   ;;  %v903_v4 = vld [vmem:[%s5137_s13 + $0x10] sm:$0xff]  ;;  %v6360_v5 = vmov 0   ;;  %v929_v48 = vlaneseq }
  0x3e   : > { %4992 = vset.pattern.permute.xlu0 %v6352_v2  ;;  %4989 = vset.pattern.permute.xlu1 %v6350_v3  ;;  %v6354_v6 = vmov 2   ;;  %v906_v7 = vld [vmem:[%s5142_s17 + $0x10] sm:$0xff]  ;;  %v910_v8 = vld [vmem:[%s5152_s25] sm:$0xff]  ;;  %v905_v10 = vld [vmem:[%s5142_s17 + $0x8] sm:$0xff]  ;;  %v6356_v26 = vmov 0.0|0.0   ;;  %vm5112_vm0 = vmmov 0  }
  0x3f   : > { %985 = vperm.xlu0 %4992, %v902_v0   ;;  %937 = vperm.xlu1 %4989, %v901_v1   ;;  %v904_v9 = vld [vmem:[%s5142_s17] sm:$0xff]  ;;  %v912_v12 = vld [vmem:[%s5152_s25 + $0x10] sm:$0xff]  ;;  %v908_v13 = vld [vmem:[%s5147_s21 + $0x8] sm:$0xff]  ;;  %v6358_v27 = vmov 0.0   ;;  %p892_p3 = scmp.lt.s32.totalorder %s3893_s10, 1  ;;  %v930_v51 = vshrl.u32 %v929_v48, 7 }
  0x40   : > { %v907_v11 = vld [vmem:[%s5147_s21] sm:$0xff]  ;;  %v911_v14 = vld [vmem:[%s5152_s25 + $0x8] sm:$0xff]  ;;  %v1262_v15 = vld [vmem:[%s5157_s29 + $0x10] sm:$0xff]  ;;  %4715 = vmatprep.subr.bf16.mxu0 %v6356_v26  ;;  %4718 = vmatprep.subr.bf16.mxu1 %v6356_v26  ;;  %s6436_s15 = sld [smem:[#allocation2_spill]]  ;;  %vm1306_vm1 = vcmask 195584   ;;  %s6443_s16 = sld [smem:[#allocation3_spill]] }
  0x41   : > { %v1387_v16 = vld [vmem:[%s5177_s19] sm:$0xf]  ;;  %v909_v17 = vld [vmem:[%s5147_s21 + $0x10] sm:$0xff]  ;;  %v5311_v18 = vld [vmem:[%s5182_s24 + $0x8] sm:$0xff]  ;;  %4244 = vmatprep.mubr.msk.f32.mxu0 %vm5112_vm0, %v6358_v27  ;;  %4263 = vmatprep.mubr.msk.f32.mxu1 %vm5112_vm0, %v6358_v27  ;;  %s6492_s10 = smov (!%p892_p3, %s3893_s10), 1  ;;  %v5403_v54 = vsub.s32 1, %v930_v51 }
  0x42   : > { %v1394_v19 = vld [vmem:[%s5182_s24] sm:$0xff]  ;;  %v1261_v21 = vld [vmem:[%s5157_s29 + $0x8] sm:$0xff]  ;;  %v1283_v24 = vld [vmem:[%s5162_s3 + $0x10] sm:$0xff]  ;;  %s4027_s0 = sshll.u32 %s6492_s10, 4  ;;  %v5408_v58 = vsub.s32 3, %v930_v51  ;;  %v5411_v61 = vsub.s32 0, %v930_v51 }
  0x43   : > { %989 = vperm.xlu0 %4992, %v903_v4   ;;  %941 = vperm.xlu1 %4989, %v902_v0   ;;  %v1260_v20 = vld [vmem:[%s5157_s29] sm:$0xff]  ;;  %v1282_v23 = vld [vmem:[%s5162_s3 + $0x8] sm:$0xff]  ;;  %v1396_v28 = vld [vmem:[%s5182_s24 + $0x10] sm:$0xff]  ;;  %s896_s11 = scalar_lea.vmem %s5127_s5, %s4027_s0  ;;  %6418 = vst [vmem:[#allocation19_spill] sm:$0xff] %v5403_v54  ;;  %v5413_v62 = vsub.s32 2, %v930_v51  ;;  %s6444_s18 = sld [smem:[#allocation4_spill]] }
  0x44   : > { %v1281_v22 = vld [vmem:[%s5162_s3] sm:$0xff]  ;;  %v1399_v29 = vld [vmem:[%s5187_s30 + $0x10] sm:$0xff]  ;;  %v5342_v30 = vld [vmem:[%s5197_s12 + $0x8] sm:$0xff]  ;;  %6420 = vst [vmem:[#allocation21_spill] sm:$0xff] %v5408_v58  ;;  %s6449_s22 = sld [smem:[#allocation7_spill]]  ;;  %s6451_s23 = sld [smem:[#allocation8_spill]] }
  0x45   : > { %v1380_v25 = vld [vmem:[%s5172_s14] sm:$0xf]  ;;  %6413 = vst [vmem:[#allocation14_spill] sm:$0xff] %v5342_v30  ;;  %v1398_v39 = vld [vmem:[%s5187_s30 + $0x8] sm:$0xff]  ;;  %v1402_v44 = vld [vmem:[%s5192_s6 + $0x10] sm:$0xff]  ;;  %vm1541_vm2 = vcmask 523264  }
  0x46   : > { %v1397_v31 = vld [vmem:[%s5187_s30] sm:$0xff]  ;;  %v1401_v41 = vld [vmem:[%s5192_s6 + $0x8] sm:$0xff]  ;;  %6421 = vst [vmem:[#allocation22_spill] sm:$0xff] %v5411_v61  ;;  %6422 = vst [vmem:[#allocation23_spill] sm:$0xff] %v5413_v62  ;;  %s6463_s26 = sld [smem:[#allocation6_spill]]  ;;  %s6467_s28 = sld [smem:[#allocation9_spill]] }
  0x47   : > { %4996 = vset.pattern.permute.xlu0 %v6360_v5  ;;  %4990 = vset.pattern.permute.xlu1 %v6354_v6  ;;  %v1400_v33 = vld [vmem:[%s5192_s6] sm:$0xff]  ;;  %v3902_v59 = vld [vmem:[%s896_s11 + $0x8] sm:$0xf]  ;;  %v3903_v60 = vld [vmem:[%s896_s11 + $0xc] sm:$0xf]  ;;  %s6468_s1 = sld [smem:[#allocation10_spill]] }
  0x48   : > { %916 = vperm.xlu0 %4996, %v901_v1   ;;  %963 = vperm.xlu1 %4990, %v902_v0   ;;  %v5384_v47 = vld [vmem:[%s5197_s12] sm:$0xff]  ;;  %s6469_s2 = sld [smem:[#allocation11_spill]]  ;;  %s6470_s0 = sld [smem:[#allocation5_spill]]  ;;  %vm3809_vm3 = vcmask 519168  }
  0x49   : > { %6415 = vst [vmem:[#allocation16_spill] sm:$0xff] %v5384_v47  ;;  %v913_v56 = vld [vmem:[%s896_s11] sm:$0xf]  ;;  %v3901_v57 = vld [vmem:[%s896_s11 + $0x4] sm:$0xf]  ;;  %s6473_s11 = sld [smem:[#allocation12_spill]] }
  0x4c   : > { %921 = vperm.xlu0 %4996, %v902_v0   ;;  %4991 = vset.pattern.permute.xlu1 %v6352_v2  ;;  %v5418_v0 = vrot.slane %v913_v56, %v5403_v54 }
  0x4d   : > { %981 = vperm.xlu1 %4991, %v901_v1  }
  0x50   : > { %1014 = vperm.xlu0 %4996, %v906_v7   ;;  %v5424_v7 = vrot.slane %v3902_v59, %v5403_v54 }
  0x51   : > { %4993 = vset.pattern.permute.xlu1 %v6360_v5 }
  0x52   : > { %926 = vperm.xlu1 %4993, %v903_v4  }
  0x54   : > { %4997 = vset.pattern.permute.xlu0 %v6350_v3 }
  0x55   : > { %1111 = vperm.xlu0 %4997, %v910_v8  }
  0x56   : > { %4994 = vset.pattern.permute.xlu1 %v6350_v3 }
  0x57   : > { %945 = vperm.xlu1 %4994, %v903_v4  }
  0x59   : > { %4998 = vset.pattern.permute.xlu0 %v6354_v6 }
  0x5a   : > { %959 = vperm.xlu0 %4998, %v901_v1  }
  0x5b   : > { %4995 = vset.pattern.permute.xlu1 %v6360_v5 }
  0x5c   : > { %1004 = vperm.xlu1 %4995, %v904_v9   ;;  %v995_v9 = vrot.slane %v913_v56, %v5408_v58 }
  0x5e   : > { %967 = vperm.xlu0 %4998, %v903_v4   ;;  %v1074_v4 = vrot.slane %v3901_v57, %v5403_v54 }
  0x60   : > { %1009 = vperm.xlu1 %4995, %v905_v10   ;;  %v1094_v10 = vrot.slane %v3901_v57, %v5408_v58 }
  0x62   : > { %1177 = vperm.xlu0 %4998, %v910_v8  }
  0x64   : > { %1022 = vperm.xlu1 %4995, %v907_v11   ;;  %v5433_v11 = vrot.slane %v3902_v59, %v5408_v58 }
  0x66   : > { %1185 = vperm.xlu0 %4998, %v912_v12  }
  0x68   : > { %1027 = vperm.xlu1 %4995, %v908_v13   ;;  %v932_v13 = vrot.slane %v913_v56, %v5411_v61 }
  0x6a   : > { %5005 = vset.pattern.permute.xlu0 %v6352_v2 }
  0x6b   : > { %1247 = vperm.xlu0 %5005, %v911_v14  }
  0x6c   : > { %1043 = vperm.xlu1 %4995, %v910_v8  }
  0x6f   : > { %1251 = vperm.xlu0 %5005, %v912_v12  }
  0x70   : > { %1048 = vperm.xlu1 %4995, %v911_v14  }
  0x73   : > { %5007 = vset.pattern.permute.xlu0 %v6360_v5 }
  0x74   : > { %4999 = vset.pattern.permute.xlu1 %v6350_v3  ;;  %1275 = vperm.xlu0 %5007, %v1262_v15   ;;  %v5441_v15 = vrot.slane %v3902_v59, %v5411_v61 }
  0x75   : > { %1115 = vperm.xlu1 %4999, %v911_v14  }
  0x78   : > { %1390 = vperm.xlu0 %5007, %v1387_v16   ;;  %v5444_v16 = vrot.slane %v3903_v60, %v5411_v61 }
  0x79   : > { %5000 = vset.pattern.permute.xlu1 %v6360_v5 }
  0x7a   : > { %1032 = vperm.xlu1 %5000, %v909_v17   ;;  %v973_v17 = vrot.slane %v913_v56, %v5413_v62 }
  0x7c   : > { %1413 = vperm.xlu0 %5007, %v5311_v18  }
  0x7e   : > { %5001 = vset.pattern.permute.xlu1 %v6354_v6 }
  0x7f   : > { %1181 = vperm.xlu1 %5001, %v911_v14   ;;  %v1067_v14 = vrot.slane %v3901_v57, %v5411_v61 }
  0x80   : > { %5012 = vset.pattern.permute.xlu0 %v6354_v6 }
  0x81   : > { %1455 = vperm.xlu0 %5012, %v5311_v18  }
  0x83   : > { %5002 = vset.pattern.permute.xlu1 %v6352_v2 }
  0x84   : > { %1243 = vperm.xlu1 %5002, %v910_v8   ;;  %v5427_v8 = vrot.slane %v3903_v60, %v5403_v54 }
  0x85   : > { %5013 = vset.pattern.permute.xlu0 %v6350_v3 }
  0x86   : > { %1429 = vperm.xlu0 %5013, %v1394_v19  }
  0x88   : > { %5003 = vset.pattern.permute.xlu1 %v6360_v5 }
  0x89   : > { %1053 = vperm.xlu1 %5003, %v912_v12  }
  0x8a   : > { %1437 = vperm.xlu0 %5013, %v1396_v28  }
  0x8d   : > { %5004 = vset.pattern.permute.xlu1 %v6350_v3 }
  0x8e   : > { %1119 = vperm.xlu1 %5004, %v912_v12   ;;  %5016 = vset.pattern.permute.xlu0 %v6352_v2  ;;  %v5436_v12 = vrot.slane %v3903_v60, %v5408_v58  ;;  %v6427_v58 = vmov 0  }
  0x8f   : > { %1481 = vperm.xlu0 %5016, %v1396_v28  }
  0x92   : > { %5006 = vset.pattern.permute.xlu1 %v6360_v5 }
  0x93   : > { %1265 = vperm.xlu1 %5006, %v1260_v20   ;;  %5018 = vset.pattern.permute.xlu0 %v6360_v5  ;;  %v5451_v20 = vrot.slane %v3902_v59, %v5413_v62 }
  0x94   : > { %1506 = vperm.xlu0 %5018, %v1399_v29  }
  0x97   : > { %1270 = vperm.xlu1 %5006, %v1261_v21   ;;  %v5454_v21 = vrot.slane %v3903_v60, %v5413_v62 }
  0x98   : > { %1638 = vperm.xlu0 %5018, %v5342_v30  }
  0x9b   : > { %1286 = vperm.xlu1 %5006, %v1281_v22  }
  0x9c   : > { %5020 = vset.pattern.permute.xlu0 %v6350_v3 }
  0x9d   : > { %1746 = vperm.xlu0 %5020, %v5342_v30  }
  0x9f   : > { %1291 = vperm.xlu1 %5006, %v1282_v23  }
  0xa3   : > { %1296 = vperm.xlu1 %5006, %v1283_v24  }
  0xa7   : > { %1383 = vperm.xlu1 %5006, %v1380_v25  }
  0xab   : > { %1408 = vperm.xlu1 %5006, %v1394_v19  }
  0xaf   : > { %5008 = vset.pattern.permute.xlu1 %v6354_v6 }
  0xb0   : > { %1451 = vperm.xlu1 %5008, %v1394_v19  }
  0xb4   : > { %5009 = vset.pattern.permute.xlu1 %v6352_v2 }
  0xb5   : > { %1473 = vperm.xlu1 %5009, %v1394_v19   ;;  %v1084_v19 = vrot.slane %v3901_v57, %v5413_v62 }
  0xb9   : > { %5010 = vset.pattern.permute.xlu1 %v6350_v3 }
  0xba   : > { %1433 = vperm.xlu1 %5010, %v5311_v18  }
  0xbe   : > { %v5348_v32 = vpop.permute.xlu1 %937  ;;  %5011 = vset.pattern.permute.xlu1 %v6360_v5  ;;  %v5365_v38 = vpop.permute.xlu0 %985 }
  0xbf   : > { %1496 = vperm.xlu1 %5011, %v1397_v31   ;;  %v1075_v22 = vmul.f32 %v1074_v4, %v5348_v32  ;;  %v1141_v23 = vmul.f32 %v5424_v7, %v5348_v32  ;;  %v1207_v24 = vmul.f32 %v5427_v8, %v5348_v32  ;;  %v5462_v25 = vmul.f32 %v995_v9, %v5365_v38 }
  0xc0   : > { %v5468_v31 = vmul.f32 %v1094_v10, %v5365_v38 }
  0xc2   : > { %v5354_v34 = vpop.permute.xlu1 %941  ;;  %v5372_v42 = vpop.permute.xlu0 %989 }
  0xc3   : > { %1514 = vperm.xlu1 %5011, %v1400_v33   ;;  %v5472_v33 = vmul.f32 %v5433_v11, %v5365_v38  ;;  %v1208_v56 = vmul.f32 %v5427_v8, %v5354_v34  ;;  %v1097_v60 = vmul.f32 %v1094_v10, %v5372_v42 }
  0xc7   : > { %v5356_v35 = vpop.permute.xlu1 %963  ;;  %1418 = vperm.xlu1 %5011, %v1396_v28   ;;  %v5379_v45 = vpop.permute.xlu0 %916 }
  0xc8   : > { %v933_v48 = vmul.f32 %v932_v13, %v5379_v45  ;;  %v1068_v51 = vmul.f32 %v1067_v14, %v5379_v45  ;;  %v1134_v57 = vmul.f32 %v5441_v15, %v5379_v45  ;;  %v1200_v59 = vmul.f32 %v5444_v16, %v5379_v45 }
  0xc9   : > { %v1152_v26 = vmul.f32 %v5451_v20, %v5356_v35  ;;  %v1218_v27 = vmul.f32 %v5454_v21, %v5356_v35 }
  0xca   : > { %v1078_v61 = vadd.f32 %v1075_v22, %v1068_v51 }
  0xcb   : > { %5014 = vset.pattern.permute.xlu1 %v6352_v2  ;;  %v5393_v50 = vpop.permute.xlu0 %921 }
  0xcc   : > { %v5359_v36 = vpop.permute.xlu1 %981  ;;  %1477 = vperm.xlu1 %5014, %v5311_v18   ;;  %v952_v18 = vmul.f32 %v5418_v0, %v5348_v32  ;;  %v953_v32 = vmul.f32 %v5418_v0, %v5354_v34  ;;  %v934_v45 = vmul.f32 %v932_v13, %v5393_v50 }
  0xce   : > { %v955_v62 = vadd.f32 %v952_v18, %v933_v48  ;;  %v956_v18 = vadd.f32 %v953_v32, %v934_v45 }
  0xcf   : > { %v5400_v53 = vpop.permute.xlu0 %1014 }
  0xd0   : > { %5015 = vset.pattern.permute.xlu1 %v6354_v6  ;;  %6417 = vst [vmem:[#allocation18_spill] sm:$0xff] %v5400_v53 }
  0xd1   : > { %v5363_v37 = vpop.permute.xlu1 %926  ;;  %1459 = vperm.xlu1 %5015, %v1396_v28  }
  0xd2   : > { %v1070_v22 = vmul.f32 %v1067_v14, %v5363_v37 }
  0xd4   : > { %v5415_v63 = vpop.permute.xlu0 %1111 }
  0xd5   : > { %5017 = vset.pattern.permute.xlu1 %v6360_v5  ;;  %6423 = vst [vmem:[#allocation24_spill] sm:$0xff] %v5415_v63  ;;  %v1144_v63 = vadd.f32 %v1141_v23, %v1134_v57 }
  0xd6   : > { %v5369_v40 = vpop.permute.xlu1 %945  ;;  %1501 = vperm.xlu1 %5017, %v1398_v39   ;;  %v5476_v39 = vmul.f32 %v5436_v12, %v5365_v38  ;;  %v5489_v38 = vmul.f32 %v995_v9, %v5372_v42 }
  0xd7   : > { %v954_v48 = vmul.f32 %v5418_v0, %v5369_v40  ;;  %v6429_v45 = vld [vmem:[#allocation18_spill] sm:$0xff] }
  0xd9   : > { %v960_v28 = vpop.permute.xlu0 %959 }
  0xda   : > { %1519 = vperm.xlu1 %5017, %v1401_v41   ;;  %v1076_v41 = vmul.f32 %v1074_v4, %v5354_v34  ;;  %v974_v54 = vmul.f32 %v973_v17, %v960_v28 }
  0xdb   : > { %v5374_v43 = vpop.permute.xlu1 %1004 }
  0xdc   : > { %v977_v53 = vadd.f32 %v974_v54, %v955_v62  ;;  %v1136_v54 = vmul.f32 %v5441_v15, %v5363_v37 }
  0xde   : > { %1524 = vperm.xlu1 %5017, %v1402_v44   ;;  %v1142_v44 = vmul.f32 %v5424_v7, %v5354_v34  ;;  %v1086_v34 = vmul.f32 %v1084_v19, %v5356_v35 }
  0xdf   : > { %v5381_v46 = vpop.permute.xlu1 %1009 }
  0xe0   : > { %6414 = vst [vmem:[#allocation15_spill] sm:$0xff] %v5381_v46 }
  0xe2   : > { %1633 = vperm.xlu1 %5017, %v5384_v47  }
  0xe3   : > { %v5391_v49 = vpop.permute.xlu1 %1022 }
  0xe6   : > { %5019 = vset.pattern.permute.xlu1 %v6350_v3  ;;  %v5498_v3 = vmul.f32 %v5433_v11, %v5372_v42 }
  0xe7   : > { %v5397_v52 = vpop.permute.xlu1 %1027  ;;  %1742 = vperm.xlu1 %5019, %v5384_v47  }
  0xe8   : > { %6416 = vst [vmem:[#allocation17_spill] sm:$0xff] %v5397_v52 }
  0xeb   : > { %v5405_v55 = vpop.permute.xlu1 %1043  ;;  %5021 = vset.pattern.permute.xlu1 %v6354_v6  ;;  %v1069_v6 = vmul.f32 %v1067_v14, %v5393_v50 }
  0xec   : > { %6419 = vst [vmem:[#allocation20_spill] sm:$0xff] %v5405_v55  ;;  %1849 = vperm.xlu1 %5021, %v5384_v47   ;;  %v968_v47 = vpop.permute.xlu0 %967  ;;  %v1210_v55 = vadd.f32 %v1207_v24, %v1200_v59 }
  0xed   : > { %v1079_v52 = vadd.f32 %v1076_v41, %v1069_v6  ;;  %v1087_v51 = vmul.f32 %v1084_v19, %v968_v47  ;;  %v1217_v6 = vmul.f32 %v5454_v21, %v960_v28  ;;  %v1153_v0 = vmul.f32 %v5451_v20, %v968_v47 }
  0xef   : > { %v5420_v1 = vpop.permute.xlu1 %1048  ;;  %v1089_v14 = vadd.f32 %v1086_v34, %v1079_v52 }
  0xf0   : > { %6424 = vst [vmem:[#allocation25_spill] sm:$0xff] %v5420_v1  ;;  %1853 = vperm.xlu1 %5021, %v5342_v30   ;;  %v1135_v1 = vmul.f32 %v5441_v15, %v5393_v50 }
  0xf2   : > { %v1145_v32 = vadd.f32 %v1142_v44, %v1135_v1 }
  0xf4   : > { %v5464_v29 = vpop.permute.xlu1 %1115  ;;  %5022 = vset.pattern.permute.xlu1 %v6352_v2  ;;  %v975_v2 = vmul.f32 %v973_v17, %v5356_v35  ;;  %v1201_v35 = vmul.f32 %v5444_v16, %v5393_v50  ;;  %v935_v50 = vmul.f32 %v932_v13, %v5363_v37  ;;  %v1155_v44 = vadd.f32 %v1152_v26, %v1145_v32 }
  0xf5   : > { %6425 = vst [vmem:[#allocation26_spill] sm:$0xff] %v5464_v29  ;;  %1960 = vperm.xlu1 %5022, %v5342_v30   ;;  %v1085_v30 = vmul.f32 %v1084_v19, %v960_v28  ;;  %v1077_v29 = vmul.f32 %v1074_v4, %v5369_v40  ;;  %v1151_v4 = vmul.f32 %v5451_v20, %v960_v28  ;;  %v1178_v20 = vpop.permute.xlu0 %1177 }
  0xf6   : > { %v1211_v41 = vadd.f32 %v1208_v56, %v1201_v35  ;;  %v1220_v28 = vadd.f32 %v1217_v6, %v1210_v55  ;;  %v978_v15 = vadd.f32 %v975_v2, %v956_v18  ;;  %v1229_v2 = vmul.f32 %v5436_v12, %v5372_v42  ;;  %v6428_v42 = vld [vmem:[#allocation15_spill] sm:$0xff] }
  0xf7   : > { %v1088_v46 = vadd.f32 %v1085_v30, %v1078_v61  ;;  %v1080_v24 = vadd.f32 %v1077_v29, %v1070_v22  ;;  %v1209_v30 = vmul.f32 %v5427_v8, %v5369_v40  ;;  %v957_v61 = vadd.f32 %v954_v48, %v935_v50 }
  0xf8   : > { %v1154_v13 = vadd.f32 %v1151_v4, %v1144_v63  ;;  %v1165_v56 = vadd.f32 %v5472_v33, %v1155_v44 }
  0xf9   : > { %v5508_v5 = vpop.permute.xlu1 %1032  ;;  %5023 = vset.pattern.permute.xlu1 %v6427_v58  ;;  %v1095_v58 = vmul.f32 %v1094_v10, %v5359_v36  ;;  %v976_v10 = vmul.f32 %v973_v17, %v968_v47  ;;  %v1090_v62 = vadd.f32 %v1087_v51, %v1080_v24  ;;  %v1219_v17 = vmul.f32 %v5454_v21, %v968_v47  ;;  %v1186_v32 = vpop.permute.xlu0 %1185 }
  0xfa   : > { %6426 = vst [vmem:[#allocation27_spill] sm:$0xff] %v5508_v5  ;;  %v996_v5 = vmul.f32 %v995_v9, %v5359_v36  ;;  %v1143_v9 = vmul.f32 %v5424_v7, %v5369_v40  ;;  %v1202_v7 = vmul.f32 %v5444_v16, %v5363_v37  ;;  %v1161_v40 = vmul.f32 %v5433_v11, %v5359_v36 }
  0xfb   : > { %v1098_v19 = vadd.f32 %v1095_v58, %v1088_v46  ;;  %v979_v52 = vadd.f32 %v976_v10, %v957_v61  ;;  %v1227_v46 = vmul.f32 %v5436_v12, %v5359_v36  ;;  %v1099_v16 = vadd.f32 %v5468_v31, %v1089_v14 }
  0xfc   : > { %v999_v57 = vadd.f32 %v996_v5, %v977_v53  ;;  %v1146_v1 = vadd.f32 %v1143_v9, %v1136_v54  ;;  %v1212_v55 = vadd.f32 %v1209_v30, %v1202_v7  ;;  %v1221_v5 = vadd.f32 %v1218_v27, %v1211_v41  ;;  %v6432_v54 = vld [vmem:[#allocation20_spill] sm:$0xff] }
  0xfd   : > { %v1100_v53 = vadd.f32 %v1097_v60, %v1090_v62  ;;  %v1164_v63 = vadd.f32 %v1161_v40, %v1154_v13  ;;  %v1101_v37 = vmul.f32 %v1098_v19, %v5374_v43  ;;  %v1230_v47 = vadd.f32 %v1227_v46, %v1220_v28  ;;  %v6433_v7 = vld [vmem:[#allocation24_spill] sm:$0xff] }
  0xfe   : > { %v5523_v23 = vpop.permute.xlu1 %1181  ;;  %v1156_v58 = vadd.f32 %v1153_v0, %v1146_v1  ;;  %v1017_v8 = vmul.f32 %v5374_v43, %v999_v57  ;;  %v1222_v26 = vadd.f32 %v1219_v17, %v1212_v55  ;;  %v1001_v11 = vadd.f32 %v5489_v38, %v979_v52  ;;  %v6434_v17 = vld [vmem:[#allocation26_spill] sm:$0xff]  ;;  %v6435_v55 = vld [vmem:[#allocation25_spill] sm:$0xff] }
  0xff   : > { %v1104_v27 = vadd.f32 %v1101_v37, %v5391_v49  ;;  %v1000_v21 = vadd.f32 %v5462_v25, %v978_v15  ;;  %v1231_v34 = vadd.f32 %v5476_v39, %v1221_v5  ;;  %v1102_v12 = vmul.f32 %v1099_v16, %v6428_v42  ;;  %v6430_v25 = vld [vmem:[#allocation17_spill] sm:$0xff] }
 0x100   : > { %v1035_v36 = vadd.f32 %v5391_v49, %v1017_v8  ;;  %v1166_v60 = vadd.f32 %v5498_v3, %v1156_v58  ;;  %v1103_v31 = vmul.f32 %v1100_v53, %v6429_v45  ;;  %v1167_v38 = vmul.f32 %v1164_v63, %v5374_v43 }
 0x101   : > { %v1018_v35 = vmul.f32 %v6428_v42, %v1000_v21  ;;  %v1168_v18 = vmul.f32 %v1165_v56, %v6428_v42  ;;  %v1233_v22 = vmul.f32 %v1230_v47, %v5374_v43  ;;  %v1105_v48 = vadd.f32 %v1102_v12, %v6430_v25  ;;  %v6431_v3 = vld [vmem:[#allocation27_spill] sm:$0xff] }
 0x102   : > { %v1232_v33 = vadd.f32 %v1229_v2, %v1222_v26  ;;  %v1019_v51 = vmul.f32 %v6429_v45, %v1001_v11  ;;  %v1106_v4 = vadd.f32 %v1103_v31, %v6431_v3  ;;  %v1170_v39 = vadd.f32 %v1167_v38, %v5391_v49  ;;  %v1248_v2 = vpop.permute.xlu0 %1247 }
 0x103   : > { %v5536_v29 = vpop.permute.xlu1 %1243  ;;  %v1038_v6 = vmax.f32 %v1035_v36, 0.0  ;;  %v1107_v50 = vmax.f32 %v1104_v27, 0.0  ;;  %v1036_v9 = vadd.f32 %v6430_v25, %v1018_v35  ;;  %v1169_v10 = vmul.f32 %v1166_v60, %v6429_v45 }
 0x104   : > { %v1171_v24 = vadd.f32 %v1168_v18, %v6430_v25  ;;  %v1037_v14 = vadd.f32 %v6431_v3, %v1019_v51  ;;  %v1234_v41 = vmul.f32 %v1231_v34, %v6428_v42  ;;  %v1236_v61 = vadd.f32 %v1233_v22, %v5391_v49 }
 0x105   : > { %v1056_v30 = vmul.f32 %v6432_v54, %v1038_v6  ;;  %v1108_v62 = vmax.f32 %v1105_v48, 0.0  ;;  %v1172_v0 = vadd.f32 %v1169_v10, %v6431_v3  ;;  %v1235_v19 = vmul.f32 %v1232_v33, %v6429_v45 }
 0x106   : > { %v1109_v13 = vmax.f32 %v1106_v4, 0.0  ;;  %v1173_v28 = vmax.f32 %v1170_v39, 0.0  ;;  %v1237_v57 = vadd.f32 %v1234_v41, %v6430_v25  ;;  %v1122_v52 = vmul.f32 %v6433_v7, %v1107_v50  ;;  %v1252_v12 = vpop.permute.xlu0 %1251  ;;  %v3908_v41 = vld [vmem:[%s6436_s15 + $0x40] sm:$0xff] }
 0x107   : > { %v1039_v1 = vmax.f32 %v1036_v9, 0.0  ;;  %v1123_v15 = vmul.f32 %v6434_v17, %v1108_v62  ;;  %v1174_v44 = vmax.f32 %v1171_v24, 0.0  ;;  %v1040_v40 = vmax.f32 %v1037_v14, 0.0  ;;  %v1305_v24 = vld [vmem:[%s5167_s8] sm:$0xf]  ;;  %v1535_v62 = vld [vmem:[%s6436_s15 + $0x10] sm:$0xff] }
 0x108   : > { %v1054_v59 = vpop.permute.xlu1 %1053  ;;  %v1125_v58 = vadd.f32 %v1122_v52, %v1056_v30  ;;  %v1239_v5 = vmax.f32 %v1236_v61, 0.0  ;;  %v1238_v63 = vadd.f32 %v1235_v19, %v6431_v3  ;;  %v1175_v47 = vmax.f32 %v1172_v0, 0.0  ;;  %v3909_v30 = vld [vmem:[%s6436_s15 + $0x48] sm:$0xff]  ;;  %v1536_v0 = vld [vmem:[%s6436_s15 + $0x18] sm:$0xff]  ;;  %v3910_v19 = vld [vmem:[%s6436_s15 + $0x50] sm:$0xff] }
 0x109   : > { %v1057_v49 = vmul.f32 %v6435_v55, %v1039_v1  ;;  %v1189_v37 = vmul.f32 %v5523_v23, %v1174_v44  ;;  %v1058_v8 = vmul.f32 %v1054_v59, %v1040_v40  ;;  %v1188_v26 = vmul.f32 %v1178_v20, %v1173_v28  ;;  %v3911_v28 = vld [vmem:[%s6436_s15 + $0x58] sm:$0xff]  ;;  %v1537_v7 = vld [vmem:[%s6436_s15 + $0x20] sm:$0xff]  ;;  %v1538_v52 = vld [vmem:[%s6436_s15 + $0x28] sm:$0xff] }
 0x10a   : > { %v1240_v16 = vmax.f32 %v1237_v57, 0.0  ;;  %v1254_v36 = vmul.f32 %v5536_v29, %v1239_v5  ;;  %v1241_v56 = vmax.f32 %v1238_v63, 0.0  ;;  %v1190_v42 = vmul.f32 %v1186_v32, %v1175_v47  ;;  %v1276_v48 = vpop.permute.xlu0 %1275  ;;  %v1534_v32 = vld [vmem:[%s6436_s15 + $0x8] sm:$0xff]  ;;  %v3912_v1 = vld [vmem:[%s6436_s15 + $0x60] sm:$0xff]  ;;  %v1539_v40 = vld [vmem:[%s6436_s15 + $0x30] sm:$0xff] }
 0x10b   : > { %v1126_v11 = vadd.f32 %v1123_v15, %v1057_v49  ;;  %v1191_v34 = vadd.f32 %v1188_v26, %v1125_v58  ;;  %v6437_v9 = vmov 0.0   ;;  %v6438_v14 = vmov 0.0|0.0   ;;  %v3913_v15 = vld [vmem:[%s6436_s15 + $0x68] sm:$0xff]  ;;  %v3914_v58 = vld [vmem:[%s6436_s15 + $0x70] sm:$0xff]  ;;  %v3915_v49 = vld [vmem:[%s6436_s15 + $0x78] sm:$0xff] }
 0x10c   : > { %v1255_v45 = vmul.f32 %v1248_v2, %v1240_v16  ;;  %v1256_v23 = vmul.f32 %v1252_v12, %v1241_v56  ;;  %v5592_v61 = vpack.c.bf16 %v3909_v30, %v3908_v41  ;;  %v5604_v57 = vpack.c.bf16 %v3911_v28, %v3910_v19  ;;  %v6440_v16 = vld [vmem:[#allocation16_spill] sm:$0xff] }
 0x10d   : > { %v1120_v43 = vpop.permute.xlu1 %1119  ;;  %v1192_v60 = vadd.f32 %v1189_v37, %v1126_v11  ;;  %v1257_v31 = vadd.f32 %v1254_v36, %v1191_v34  ;;  %v5613_v17 = vpack.c.bf16 %v1538_v52, %v1537_v7  ;;  %v5616_v44 = vpack.c.bf16 %v3913_v15, %v3912_v1  ;;  %v6441_v36 = vld [vmem:[#allocation14_spill] sm:$0xff] }
 0x10e   : > { %v1124_v46 = vmul.f32 %v1120_v43, %v1109_v13  ;;  %v1533_v43 = vld [vmem:[%s6436_s15] sm:$0xff]  ;;  %v5601_v13 = vpack.c.bf16 %v1536_v0, %v1535_v62  ;;  %v5628_v5 = vpack.c.bf16 %v3915_v49, %v3914_v58  ;;  %v6386_v2 = vmov 4  }
 0x10f   : > { %v1258_v18 = vadd.f32 %v1255_v45, %v1192_v60  ;;  %v5589_v54 = vpack.c.bf16 %v1534_v32, %v1533_v43  ;;  %v6439_v26 = vmov 2   ;;  %v6384_v56 = vmov 5   ;;  %v1391_v60 = vpop.permute.xlu0 %1390  ;;  %v6450_v43 = vld [vmem:[#allocation21_spill] sm:$0xff] }
 0x110   : > { %v1127_v27 = vadd.f32 %v1124_v46, %v1058_v8  ;;  %v1540_v46 = vld [vmem:[%s6436_s15 + $0x38] sm:$0xff]  ;;  %v5637_v8 = vld [vmem:[%s5197_s12 + $0x10] sm:$0xff]  ;;  %v6382_v12 = vmov 6   ;;  %v6378_v41 = vmov 8  }
 0x111   : > { %4720 = vmatpush3.bf16.msra.mxu1 %v5589_v54  ;;  %v5625_v55 = vpack.c.bf16 %v1540_v46, %v1539_v40  ;;  %1643 = vperm.xlu1 %5023, %v5637_v8   ;;  %v2634_v40 = vld [vmem:[%s6449_s22] sm:$0xf]  ;;  %s6475_s22 = sld [smem:[#allocation13_spill]] }
 0x112   : > { %v1266_v53 = vpop.permute.xlu1 %1265  ;;  %v1193_v38 = vadd.f32 %v1190_v42, %v1127_v27  ;;  %4721 = vmatprep.subr.bf16.mxu1 %v6438_v14  ;;  %1750 = vperm.xlu0 %5020, %v5637_v8   ;;  %v6442_v27 = vmov 3  }
 0x113   : > { %v1278_v59 = vmul.f32 %v1266_v53, %v1257_v31  ;;  %v1414_v42 = vpop.permute.xlu0 %1413 }
 0x114   : > { %v1259_v20 = vadd.f32 %v1256_v23, %v1193_v38  ;;  %v2509_v23 = vld [vmem:[%s6443_s16 + $0x8] sm:$0xff] }
 0x115   : > { %4723 = vmatpush3.bf16.msra.mxu1 %v5601_v13  ;;  %5024 = vset.pattern.permute.xlu1 %v6386_v2 }
 0x116   : > { %v1271_v21 = vpop.permute.xlu1 %1270  ;;  %v1280_v51 = vmul.f32 %v1276_v48, %v1259_v20  ;;  %4724 = vmatprep.subr.bf16.mxu1 %v6438_v14  ;;  %5025 = vset.pattern.permute.xlu0 %v6439_v26  ;;  %v2530_v48 = vld [vmem:[%s6444_s18 + $0x8] sm:$0xff] }
 0x117   : > { %v1279_v22 = vmul.f32 %v1271_v21, %v1258_v18  ;;  %2063 = vperm.xlu1 %5024, %v6440_v16   ;;  %1857 = vperm.xlu0 %5025, %v5637_v8   ;;  %v1456_v31 = vpop.permute.xlu0 %1455  ;;  %v6445_v18 = vmov 0  }
 0x119   : > { %4726 = vmatpush3.bf16.msra.mxu1 %v5613_v17 }
 0x11a   : > { %v1287_v35 = vpop.permute.xlu1 %1286  ;;  %4727 = vmatprep.subr.bf16.mxu1 %v6438_v14 }
 0x11b   : > { %v1299_v25 = vadd.f32 %v1287_v35, %v1278_v59  ;;  %2067 = vperm.xlu1 %5024, %v6441_v36   ;;  %5026 = vset.pattern.permute.xlu0 %v6442_v27  ;;  %v6380_v35 = vmov 7   ;;  %v1430_v59 = vpop.permute.xlu0 %1429 }
 0x11c   : > { %1956 = vperm.xlu0 %5026, %v6440_v16  }
 0x11d   : > { %v1302_v3 = vmax.f32 %v1299_v25, 0.0  ;;  %4729 = vmatpush3.bf16.msra.mxu1 %v5625_v55 }
 0x11e   : > { %v1292_v29 = vpop.permute.xlu1 %1291  ;;  %4742 = vmatprep.subr.bf16.mxu1 %v6438_v14 }
 0x11f   : > { %v1300_v33 = vadd.f32 %v1292_v29, %v1279_v22  ;;  %5027 = vset.pattern.permute.xlu1 %v6384_v56 }
 0x120   : > { %2170 = vperm.xlu1 %5027, %v6440_v16   ;;  %1964 = vperm.xlu0 %5026, %v5637_v8  }
 0x121   : > { %v1303_v4 = vmax.f32 %v1300_v33, 0.0 }
 0x122   : > { %v1297_v39 = vpop.permute.xlu1 %1296 }
 0x123   : > { %v1301_v6 = vadd.f32 %v1297_v39, %v1280_v51  ;;  %v4716_v50 = vpack.c.bf16 %v1303_v4, %v1302_v3  ;;  %v1438_v51 = vpop.permute.xlu0 %1437  ;;  %v6446_v3 = vld [vmem:[#allocation22_spill] sm:$0xff]  ;;  %v6447_v39 = vld [vmem:[#allocation19_spill] sm:$0xff] }
 0x124   : > { %2174 = vperm.xlu1 %5027, %v6441_v36   ;;  %5029 = vset.pattern.permute.xlu0 %v6386_v2 }
 0x125   : > { %4717 = vmatpush3.bf16.msra.mxu0 %v4716_v50  ;;  %v1304_v10 = vmax.f32 %v1301_v6, 0.0  ;;  %2071 = vperm.xlu0 %5029, %v5637_v8   ;;  %v6448_v50 = vld [vmem:[#allocation23_spill] sm:$0xff] }
 0x126   : > { %4242 = vmatprep.subr.mxu0 %v6437_v9  ;;  %v1384_v53 = vpop.permute.xlu1 %1383 }
 0x127   : > { %v1482_v49 = vpop.permute.xlu0 %1481 }
 0x128   : > { %5028 = vset.pattern.permute.xlu1 %v6382_v12 }
 0x129   : > { %4243 = vmatpush3.msra.mxu0 %v1304_v10  ;;  %2277 = vperm.xlu1 %5028, %v6440_v16  }
 0x12a   : > { %4245 = vmatmul.mubr.msk.f32.vlgmr.msra.gmra.mrb[0].mxu0 %vm1306_vm1, %v1305_v24  ;;  %4730 = vmatprep.subr.bf16.mxu0 %v6438_v14  ;;  %v1409_v63 = vpop.permute.xlu1 %1408  ;;  %v2531_v24 = vld [vmem:[%s6444_s18 + $0x10] sm:$0xff] }
 0x12b   : > { %4288 = vmatprep.mubr.msk.f32.mxu0 %vm5112_vm0, %v6437_v9  ;;  %4732 = vmatpush3.bf16.msra.mxu0 %v5592_v61 }
 0x12c   : > { %4733 = vmatprep.subr.bf16.mxu0 %v6438_v14  ;;  %5031 = vset.pattern.permute.xlu0 %v6384_v56 }
 0x12d   : > { %2178 = vperm.xlu0 %5031, %v5637_v8   ;;  %2281 = vperm.xlu1 %5028, %v6441_v36  }
 0x12f   : > { %4735 = vmatpush3.bf16.msra.mxu0 %v5604_v57  ;;  %v5634_v37 = vpop.permute.xlu1 %1451 }
 0x130   : > { %4736 = vmatprep.subr.bf16.mxu0 %v6438_v14 }
 0x131   : > { %5033 = vset.pattern.permute.xlu0 %v6382_v12  ;;  %5030 = vset.pattern.permute.xlu1 %v6380_v35 }
 0x132   : > { %2285 = vperm.xlu0 %5033, %v5637_v8   ;;  %2384 = vperm.xlu1 %5030, %v6440_v16  }
 0x133   : > { %4738 = vmatpush3.bf16.msra.mxu0 %v5616_v44 }
 0x134   : > { %4739 = vmatprep.subr.bf16.mxu0 %v6438_v14  ;;  %v5639_v47 = vpop.permute.xlu1 %1473 }
 0x136   : > { %5036 = vset.pattern.permute.xlu0 %v6445_v18  ;;  %2388 = vperm.xlu1 %5030, %v6441_v36  }
 0x137   : > { %4741 = vmatpush3.bf16.msra.mxu0 %v5628_v5  ;;  %2518 = vperm.xlu0 %5036, %v2509_v23  }
 0x138   : > { %4754 = vmatprep.subr.bf16.mxu0 %v6438_v14 }
 0x139   : > { %v1434_v11 = vpop.permute.xlu1 %1433 }
 0x13a   : > { %5032 = vset.pattern.permute.xlu1 %v6378_v41 }
 0x13b   : > { %2539 = vperm.xlu0 %5036, %v2530_v48   ;;  %2491 = vperm.xlu1 %5032, %v6440_v16  }
 0x13e   : > { %v5650_v21 = vpop.permute.xlu1 %1496 }
 0x13f   : > { %2544 = vperm.xlu0 %5036, %v2531_v24   ;;  %2495 = vperm.xlu1 %5032, %v6441_v36   ;;  %v3931_v36 = vld [vmem:[%s6436_s15 + $0xc8] sm:$0xff] }
 0x142   : > { %v5655_v34 = vpop.permute.xlu1 %1514 }
 0x143   : > { %2637 = vperm.xlu0 %5036, %v2634_v40   ;;  %5034 = vset.pattern.permute.xlu1 %v6380_v35  ;;  %v3924_v40 = vld [vmem:[%s6436_s15 + $0xa8] sm:$0xff] }
 0x144   : > { %2392 = vperm.xlu1 %5034, %v5637_v8  }
 0x146   : > { %v1419_v45 = vpop.permute.xlu1 %1418 }
 0x148   : > { %5035 = vset.pattern.permute.xlu1 %v6445_v18 }
 0x14b   : > { %v1478_v38 = vpop.permute.xlu1 %1477 }
 0x150   : > { %v1460_v29 = vpop.permute.xlu1 %1459 }
 0x155   : > { %v1502_v7 = vpop.permute.xlu1 %1501 }
 0x1fd   : > { %v1376_v20 = vpop.f32.mrb[0].mxu0 }
 0x1fe   : > { %v1386_v22 = vmul.f32 %v1384_v53, %v1376_v20  ;;  %v4246_v25 = vpop.f32.mrb[1].mxu0  ;;  %v1520_v20 = vpop.permute.xlu1 %1519 }
 0x200   : > { %v5673_v33 = vadd.f32 %v1391_v60, %v1386_v22  ;;  %v3919_v22 = vld [vmem:[%s6436_s15 + $0x80] sm:$0xff] }
 0x202   : > { %v1424_v4 = vrot.slane %v5673_v33, %v6446_v3  ;;  %v1443_v6 = vrot.slane %v5673_v33, %v6447_v39  ;;  %v1465_v10 = vrot.slane %v5673_v33, %v6448_v50  ;;  %v1487_v32 = vrot.slane %v5673_v33, %v6450_v43 }
 0x204   : > { %v1425_v30 = vmul.f32 %v1424_v4, %v1409_v63  ;;  %v1427_v62 = vmul.f32 %v1424_v4, %v1419_v45  ;;  %v1444_v0 = vmul.f32 %v1443_v6, %v1430_v59  ;;  %v1445_v19 = vmul.f32 %v1443_v6, %v1434_v11  ;;  %v5691_v59 = vld [vmem:[%s6451_s23 + $0x8] sm:$0xff] }
 0x205   : > { %v1446_v28 = vmul.f32 %v1443_v6, %v1438_v51  ;;  %v1466_v1 = vmul.f32 %v1465_v10, %v5634_v37  ;;  %v1426_v15 = vmul.f32 %v1424_v4, %v1414_v42  ;;  %v1468_v58 = vmul.f32 %v1465_v10, %v1460_v29  ;;  %v3920_v29 = vld [vmem:[%s6436_s15 + $0x88] sm:$0xff]  ;;  %v1507_v51 = vpop.permute.xlu0 %1506  ;;  %2661 = vperm.xlu0 %5036, %v5691_v59  }
 0x206   : > { %v1447_v52 = vadd.f32 %v1444_v0, %v1425_v30  ;;  %v1488_v63 = vmul.f32 %v1487_v32, %v5639_v47  ;;  %v1467_v16 = vmul.f32 %v1465_v10, %v1456_v31  ;;  %v1490_v37 = vmul.f32 %v1487_v32, %v1482_v49  ;;  %v3930_v31 = vld [vmem:[%s6436_s15 + $0xc0] sm:$0xff]  ;;  %v3921_v10 = vld [vmem:[%s6436_s15 + $0x90] sm:$0xff] }
 0x207   : > { %v1449_v46 = vadd.f32 %v1446_v28, %v1427_v62  ;;  %v1448_v11 = vadd.f32 %v1445_v19, %v1426_v15  ;;  %v1489_v23 = vmul.f32 %v1487_v32, %v1478_v38  ;;  %v5704_v6 = vpack.c.bf16 %v3931_v36, %v3930_v31  ;;  %v3922_v62 = vld [vmem:[%s6436_s15 + $0x98] sm:$0xff]  ;;  %v3932_v0 = vld [vmem:[%s6436_s15 + $0xd0] sm:$0xff]  ;;  %v1525_v28 = vpop.permute.xlu1 %1524 }
 0x208   : > { %v1469_v53 = vadd.f32 %v1466_v1, %v1447_v52  ;;  %v3933_v19 = vld [vmem:[%s6436_s15 + $0xd8] sm:$0xff]  ;;  %v3923_v52 = vld [vmem:[%s6436_s15 + $0xa0] sm:$0xff]  ;;  %v3943_v31 = vld [vmem:[%s6436_s15 + $0x110] sm:$0xff] }
 0x209   : > { %v1471_v60 = vadd.f32 %v1468_v58, %v1449_v46  ;;  %v1470_v45 = vadd.f32 %v1467_v16, %v1448_v11  ;;  %5043 = vset.pattern.permute.xlu0 %v6439_v26  ;;  %v3934_v46 = vld [vmem:[%s6436_s15 + $0xe0] sm:$0xff]  ;;  %v3935_v58 = vld [vmem:[%s6436_s15 + $0xe8] sm:$0xff]  ;;  %v5742_v49 = vpack.c.bf16 %v3924_v40, %v3923_v52  ;;  %v3926_v16 = vld [vmem:[%s6436_s15 + $0xb8] sm:$0xff] }
 0x20a   : > { %v1491_v42 = vadd.f32 %v1488_v63, %v1469_v53  ;;  %v5744_v53 = vpack.c.bf16 %v3935_v58, %v3934_v46  ;;  %v3925_v63 = vld [vmem:[%s6436_s15 + $0xb0] sm:$0xff]  ;;  %2703 = vperm.xlu0 %5043, %v5691_v59   ;;  %v3944_v36 = vld [vmem:[%s6436_s15 + $0x118] sm:$0xff] }
 0x20b   : > { %v1492_v25 = vadd.f32 %v1489_v23, %v1470_v45  ;;  %v1493_v48 = vadd.f32 %v1490_v37, %v1471_v60  ;;  %v3936_v60 = vld [vmem:[%s6436_s15 + $0xf0] sm:$0xff]  ;;  %v3937_v37 = vld [vmem:[%s6436_s15 + $0xf8] sm:$0xff]  ;;  %v3941_v23 = vld [vmem:[%s6436_s15 + $0x100] sm:$0xff] }
 0x20c   : > { %v1509_v47 = vmul.f32 %v5650_v21, %v1491_v42  ;;  %v5702_v21 = vpack.c.bf16 %v3920_v29, %v3919_v22  ;;  %v5764_v42 = vpack.c.bf16 %v3926_v16, %v3925_v63  ;;  %v5766_v45 = vpack.c.bf16 %v3937_v37, %v3936_v60  ;;  %v3942_v22 = vld [vmem:[%s6436_s15 + $0x108] sm:$0xff]  ;;  %v3947_v52 = vld [vmem:[%s6436_s15 + $0x130] sm:$0xff]  ;;  %v3959_v46 = vld [vmem:[%s6436_s15 + $0x178] sm:$0xff] }
 0x20d   : > { %v1510_v4 = vmul.f32 %v1502_v7, %v1492_v25  ;;  %v1511_v30 = vmul.f32 %v1507_v51, %v1493_v48  ;;  %v5722_v7 = vpack.c.bf16 %v3933_v19, %v3932_v0  ;;  %v3953_v25 = vld [vmem:[%s6436_s15 + $0x148] sm:$0xff]  ;;  %v5782_v48 = vpack.c.bf16 %v3942_v22, %v3941_v23  ;;  %v3954_v51 = vld [vmem:[%s6436_s15 + $0x150] sm:$0xff]  ;;  %v3963_v16 = vld [vmem:[%s6436_s15 + $0x180] sm:$0xff] }
 0x20e   : > { %v1527_v38 = vadd.f32 %v5655_v34, %v1509_v47  ;;  %v5720_v34 = vpack.c.bf16 %v3922_v62, %v3921_v10  ;;  %v3952_v47 = vld [vmem:[%s6436_s15 + $0x140] sm:$0xff]  ;;  %v3957_v0 = vld [vmem:[%s6436_s15 + $0x168] sm:$0xff]  ;;  %v3958_v40 = vld [vmem:[%s6436_s15 + $0x170] sm:$0xff] }
 0x20f   : > { %v1528_v32 = vadd.f32 %v1520_v20, %v1510_v4  ;;  %v1529_v15 = vadd.f32 %v1525_v28, %v1511_v30  ;;  %v2508_v20 = vld [vmem:[%s6443_s16] sm:$0xff]  ;;  %v5784_v29 = vpack.c.bf16 %v3953_v25, %v3952_v47  ;;  %v5798_v4 = vpack.c.bf16 %v3944_v36, %v3943_v31  ;;  %v3946_v30 = vld [vmem:[%s6436_s15 + $0x128] sm:$0xff]  ;;  %v3965_v25 = vld [vmem:[%s6436_s15 + $0x190] sm:$0xff] }
 0x210   : > { %v5707_v24 = vmax.f32 %v1527_v38, 0.0  ;;  %2513 = vperm.xlu1 %5035, %v2508_v20   ;;  %v3955_v38 = vld [vmem:[%s6436_s15 + $0x158] sm:$0xff]  ;;  %v3956_v62 = vld [vmem:[%s6436_s15 + $0x160] sm:$0xff]  ;;  %v5840_v63 = vpack.c.bf16 %v3959_v46, %v3958_v40  ;;  %v3964_v60 = vld [vmem:[%s6436_s15 + $0x188] sm:$0xff]  ;;  %v6453_v20 = vmov 1  }
 0x211   : > { %v5725_v1 = vmax.f32 %v1528_v32, 0.0  ;;  %v5747_v11 = vmax.f32 %v1529_v15, 0.0  ;;  %v5800_v10 = vpack.c.bf16 %v3955_v38, %v3954_v51  ;;  %v3945_v32 = vld [vmem:[%s6436_s15 + $0x120] sm:$0xff]  ;;  %v5820_v28 = vpack.c.bf16 %v3957_v0, %v3956_v62  ;;  %v3948_v15 = vld [vmem:[%s6436_s15 + $0x138] sm:$0xff]  ;;  %v3975_v23 = vld [vmem:[%s6436_s15 + $0x1c8] sm:$0xff]  ;;  %5044 = vset.pattern.permute.xlu0 %v6453_v20 }
 0x212   : > { %4264 = vmatmul.mubr.msk.f32.vlgmr.msra.gmra.mrb[0].mxu1 %vm1541_vm2, %v5707_v24  ;;  %4289 = vmatmul.mubr.msk.f32.vlgmr.msra.gmra.mrb[2].mxu0 %vm1541_vm2, %v5707_v24  ;;  %v5818_v19 = vpack.c.bf16 %v3946_v30, %v3945_v32  ;;  %v5838_v58 = vpack.c.bf16 %v3948_v15, %v3947_v52  ;;  %6452 = vst [vmem:[#allocation15_spill] sm:$0xff] %v5840_v63  ;;  %v3974_v37 = vld [vmem:[%s6436_s15 + $0x1c0] sm:$0xff]  ;;  %v3966_v31 = vld [vmem:[%s6436_s15 + $0x198] sm:$0xff]  ;;  %v3976_v36 = vld [vmem:[%s6436_s15 + $0x1d0] sm:$0xff] }
 0x213   : > { %4744 = vmatpush3.bf16.msra.mxu1 %v5702_v21  ;;  %4756 = vmatpush3.bf16.msra.mxu0 %v5704_v6  ;;  %v5856_v22 = vpack.c.bf16 %v3964_v60, %v3963_v16  ;;  %v5858_v47 = vpack.c.bf16 %v3975_v23, %v3974_v37  ;;  %v3977_v51 = vld [vmem:[%s6436_s15 + $0x1d8] sm:$0xff]  ;;  %v5867_v38 = vld [vmem:[%s6451_s23] sm:$0xff]  ;;  %v5877_v32 = vpack.c.bf16 %v3966_v31, %v3965_v25  ;;  %v3979_v52 = vld [vmem:[%s6436_s15 + $0x1e8] sm:$0xff] }
 0x214   : > { %4266 = vmatprep.mubr.msk.f32.mxu1 %vm5112_vm0, %v6437_v9  ;;  %4291 = vmatprep.mubr.msk.f32.mxu0 %vm5112_vm0, %v6437_v9  ;;  %v5879_v30 = vpack.c.bf16 %v3977_v51, %v3976_v36  ;;  %v3967_v62 = vld [vmem:[%s6436_s15 + $0x1a0] sm:$0xff]  ;;  %v3969_v46 = vld [vmem:[%s6436_s15 + $0x1b0] sm:$0xff]  ;;  %v3970_v16 = vld [vmem:[%s6436_s15 + $0x1b8] sm:$0xff] }
 0x215   : > { %4745 = vmatprep.subr.bf16.mxu1 %v6438_v14  ;;  %4757 = vmatprep.subr.bf16.mxu0 %v6438_v14  ;;  %6454 = vst [vmem:[#allocation18_spill] sm:$0xff] %v5856_v22  ;;  %6455 = vst [vmem:[#allocation17_spill] sm:$0xff] %v5858_v47  ;;  %v3978_v0 = vld [vmem:[%s6436_s15 + $0x1e0] sm:$0xff]  ;;  %v3980_v60 = vld [vmem:[%s6436_s15 + $0x1f0] sm:$0xff]  ;;  %v5917_v23 = vpack.c.bf16 %v3970_v16, %v3969_v46 }
 0x216   : > { %4267 = vmatmul.mubr.msk.f32.gmra.mrb[2].mxu1 %vm1541_vm2, %v5725_v1  ;;  %4292 = vmatmul.mubr.msk.f32.gmra.mrb[4].mxu0 %vm1541_vm2, %v5725_v1  ;;  %6456 = vst [vmem:[#allocation27_spill] sm:$0xff] %v5877_v32  ;;  %6457 = vst [vmem:[#allocation20_spill] sm:$0xff] %v5879_v30  ;;  %v5899_v40 = vpack.c.bf16 %v3979_v52, %v3978_v0  ;;  %v3981_v37 = vld [vmem:[%s6436_s15 + $0x1f8] sm:$0xff]  ;;  %v3985_v31 = vld [vmem:[%s6436_s15 + $0x200] sm:$0xff] }
 0x217   : > { %4747 = vmatpush3.bf16.msra.mxu1 %v5720_v34  ;;  %4759 = vmatpush3.bf16.msra.mxu0 %v5722_v7  ;;  %6460 = vst [vmem:[#allocation25_spill] sm:$0xff] %v5917_v23  ;;  %v5919_v25 = vpack.c.bf16 %v3981_v37, %v3980_v60  ;;  %v3986_v36 = vld [vmem:[%s6436_s15 + $0x208] sm:$0xff]  ;;  %v2529_v51 = vld [vmem:[%s6444_s18] sm:$0xff]  ;;  %v3988_v0 = vld [vmem:[%s6436_s15 + $0x218] sm:$0xff] }
 0x218   : > { %4269 = vmatprep.mubr.msk.f32.mxu1 %vm5112_vm0, %v6437_v9  ;;  %4294 = vmatprep.mubr.msk.f32.mxu0 %vm5112_vm0, %v6437_v9  ;;  %6459 = vst [vmem:[#allocation26_spill] sm:$0xff] %v5899_v40  ;;  %v2510_v52 = vld [vmem:[%s6443_s16 + $0x10] sm:$0xff]  ;;  %v3989_v16 = vld [vmem:[%s6436_s15 + $0x220] sm:$0xff]  ;;  %v3990_v60 = vld [vmem:[%s6436_s15 + $0x228] sm:$0xff] }
 0x219   : > { %4748 = vmatprep.subr.bf16.mxu1 %v6438_v14  ;;  %4760 = vmatprep.subr.bf16.mxu0 %v6438_v14  ;;  %6461 = vst [vmem:[#allocation16_spill] sm:$0xff] %v5919_v25  ;;  %v2627_v37 = vld [vmem:[%s6463_s26] sm:$0xf]  ;;  %s3900_s26 = sshll.u32 %s6492_s10, 2 }
 0x21a   : > { %4270 = vmatmul.mubr.msk.f32.gmra.mrb[4].mxu1 %vm1541_vm2, %v5747_v11  ;;  %4295 = vmatmul.mubr.msk.f32.gmra.mrb[6].mxu0 %vm1541_vm2, %v5747_v11 }
 0x21b   : > { %4750 = vmatpush3.bf16.msra.mxu1 %v5742_v49  ;;  %4762 = vmatpush3.bf16.msra.mxu0 %v5744_v53 }
 0x21c   : > { %4751 = vmatprep.subr.bf16.mxu1 %v6438_v14  ;;  %4763 = vmatprep.subr.bf16.mxu0 %v6438_v14 }
 0x21d   : > { %4313 = vmatprep.mubr.msk.f32.mxu1 %vm5112_vm0, %v6437_v9  ;;  %4338 = vmatprep.mubr.msk.f32.mxu0 %vm5112_vm0, %v6437_v9 }
 0x21e   : > { %5037 = vset.pattern.permute.xlu1 %v6378_v41  ;;  %2677 = vperm.xlu0 %5044, %v5867_v38  }
 0x21f   : > { %4753 = vmatpush3.bf16.msra.mxu1 %v5764_v42  ;;  %4765 = vmatpush3.bf16.msra.mxu0 %v5766_v45 }
 0x220   : > { %4766 = vmatprep.subr.bf16.mxu1 %v6438_v14  ;;  %4778 = vmatprep.subr.bf16.mxu0 %v6438_v14 }
 0x221   : > { %2499 = vperm.xlu1 %5037, %v5637_v8   ;;  %v3968_v8 = vld [vmem:[%s6436_s15 + $0x1a8] sm:$0xff] }
 0x222   : > { %4314 = vmatmul.mubr.msk.f32.vlgmr.msra.gmra.mrb[6].mxu1 %vm1541_vm2, %v5707_v24  ;;  %4339 = vmatmul.mubr.msk.f32.vlgmr.msra.gmra.mrb[8].mxu0 %vm1541_vm2, %v5707_v24  ;;  %v5897_v15 = vpack.c.bf16 %v3968_v8, %v3967_v62  ;;  %v5933_v62 = vpack.c.bf16 %v3986_v36, %v3985_v31  ;;  %v3987_v8 = vld [vmem:[%s6436_s15 + $0x210] sm:$0xff]  ;;  %v5962_v31 = vpack.c.bf16 %v3990_v60, %v3989_v16  ;;  %v2646_v60 = vld [vmem:[%s6467_s28 + $0x8] sm:$0xff] }
 0x223   : > { %4768 = vmatpush3.bf16.msra.mxu1 %v5782_v48  ;;  %4780 = vmatpush3.bf16.msra.mxu0 %v5784_v29  ;;  %v5947_v46 = vpack.c.bf16 %v3988_v0, %v3987_v8  ;;  %v3991_v36 = vld [vmem:[%s6436_s15 + $0x230] sm:$0xff] }
 0x224   : > { %4316 = vmatprep.mubr.msk.f32.mxu1 %vm5112_vm0, %v6437_v9  ;;  %4341 = vmatprep.mubr.msk.f32.mxu0 %vm5112_vm0, %v6437_v9  ;;  %6458 = vst [vmem:[#allocation24_spill] sm:$0xff] %v5897_v15  ;;  %6462 = vst [vmem:[#allocation14_spill] sm:$0xff] %v5933_v62 }
 0x225   : > { %4769 = vmatprep.subr.bf16.mxu1 %v6438_v14  ;;  %4781 = vmatprep.subr.bf16.mxu0 %v6438_v14  ;;  %6464 = vst [vmem:[#allocation22_spill] sm:$0xff] %v5947_v46  ;;  %6465 = vst [vmem:[#allocation19_spill] sm:$0xff] %v5962_v31 }
 0x226   : > { %4317 = vmatmul.mubr.msk.f32.gmra.mrb[8].mxu1 %vm1541_vm2, %v5725_v1  ;;  %4342 = vmatmul.mubr.msk.f32.gmra.mrb[10].mxu0 %vm1541_vm2, %v5725_v1 }
 0x227   : > { %4771 = vmatpush3.bf16.msra.mxu1 %v5798_v4  ;;  %4783 = vmatpush3.bf16.msra.mxu0 %v5800_v10 }
 0x228   : > { %4319 = vmatprep.mubr.msk.f32.mxu1 %vm5112_vm0, %v6437_v9  ;;  %4344 = vmatprep.mubr.msk.f32.mxu0 %vm5112_vm0, %v6437_v9 }
 0x229   : > { %4772 = vmatprep.subr.bf16.mxu1 %v6438_v14  ;;  %4784 = vmatprep.subr.bf16.mxu0 %v6438_v14 }
 0x22a   : > { %4320 = vmatmul.mubr.msk.f32.gmra.mrb[10].mxu1 %vm1541_vm2, %v5747_v11  ;;  %4345 = vmatmul.mubr.msk.f32.gmra.mrb[12].mxu0 %vm1541_vm2, %v5747_v11 }
 0x22b   : > { %4774 = vmatpush3.bf16.msra.mxu1 %v5818_v19  ;;  %4786 = vmatpush3.bf16.msra.mxu0 %v5820_v28 }
 0x22c   : > { %4775 = vmatprep.subr.bf16.mxu1 %v6438_v14  ;;  %4787 = vmatprep.subr.bf16.mxu0 %v6438_v14 }
 0x22d   : > { %4363 = vmatprep.mubr.msk.f32.mxu1 %vm5112_vm0, %v6437_v9  ;;  %4388 = vmatprep.mubr.msk.f32.mxu0 %vm5112_vm0, %v6437_v9 }
 0x22e   : > { %5038 = vset.pattern.permute.xlu1 %v6445_v18 }
 0x22f   : > { %4777 = vmatpush3.bf16.msra.mxu1 %v5838_v58  ;;  %4789 = vmatpush3.bf16.msra.mxu0 %v5840_v63 }
 0x230   : > { %4790 = vmatprep.subr.bf16.mxu1 %v6438_v14  ;;  %4802 = vmatprep.subr.bf16.mxu0 %v6438_v14 }
 0x231   : > { %2534 = vperm.xlu1 %5038, %v2529_v51   ;;  %v3992_v51 = vld [vmem:[%s6436_s15 + $0x238] sm:$0xff] }
 0x232   : > { %4364 = vmatmul.mubr.msk.f32.vlgmr.msra.gmra.mrb[12].mxu1 %vm1541_vm2, %v5707_v24  ;;  %4389 = vmatmul.mubr.msk.f32.vlgmr.msra.gmra.mrb[14].mxu0 %vm1541_vm2, %v5707_v24  ;;  %v5974_v8 = vpack.c.bf16 %v3992_v51, %v3991_v36  ;;  %v2649_v36 = vld [vmem:[%s6468_s1 + $0x8] sm:$0xff]  ;;  %v2650_v51 = vld [vmem:[%s6468_s1 + $0x10] sm:$0xff] }
 0x233   : > { %4792 = vmatpush3.bf16.msra.mxu1 %v5856_v22  ;;  %4804 = vmatpush3.bf16.msra.mxu0 %v5858_v47 }
 0x234   : > { %4366 = vmatprep.mubr.msk.f32.mxu1 %vm5112_vm0, %v6437_v9  ;;  %4391 = vmatprep.mubr.msk.f32.mxu0 %vm5112_vm0, %v6437_v9  ;;  %6466 = vst [vmem:[#allocation23_spill] sm:$0xff] %v5974_v8 }
 0x235   : > { %4793 = vmatprep.subr.bf16.mxu1 %v6438_v14  ;;  %4805 = vmatprep.subr.bf16.mxu0 %v6438_v14 }
 0x236   : > { %4367 = vmatmul.mubr.msk.f32.gmra.mrb[14].mxu1 %vm1541_vm2, %v5725_v1  ;;  %4392 = vmatmul.mubr.msk.f32.gmra.mrb[16].mxu0 %vm1541_vm2, %v5725_v1 }
 0x237   : > { %4795 = vmatpush3.bf16.msra.mxu1 %v5877_v32  ;;  %4807 = vmatpush3.bf16.msra.mxu0 %v5879_v30 }
 0x238   : > { %4369 = vmatprep.mubr.msk.f32.mxu1 %vm5112_vm0, %v6437_v9  ;;  %4394 = vmatprep.mubr.msk.f32.mxu0 %vm5112_vm0, %v6437_v9 }
 0x239   : > { %4796 = vmatprep.subr.bf16.mxu1 %v6438_v14  ;;  %4808 = vmatprep.subr.bf16.mxu0 %v6438_v14 }
 0x23a   : > { %4370 = vmatmul.mubr.msk.f32.gmra.mrb[16].mxu1 %vm1541_vm2, %v5747_v11  ;;  %4395 = vmatmul.mubr.msk.f32.gmra.mrb[18].mxu0 %vm1541_vm2, %v5747_v11 }
 0x23b   : > { %4798 = vmatpush3.bf16.msra.mxu1 %v5897_v15  ;;  %4810 = vmatpush3.bf16.msra.mxu0 %v5899_v40 }
 0x23c   : > { %4799 = vmatprep.subr.bf16.mxu1 %v6438_v14  ;;  %4811 = vmatprep.subr.bf16.mxu0 %v6438_v14 }
 0x23d   : > { %4413 = vmatprep.mubr.msk.f32.mxu1 %vm5112_vm0, %v6437_v9  ;;  %4438 = vmatprep.mubr.msk.f32.mxu0 %vm5112_vm0, %v6437_v9 }
 0x23e   : > { %2523 = vperm.xlu1 %5038, %v2510_v52   ;;  %v6024_v52 = vld [vmem:[%s6469_s2 + $0x8] sm:$0xff] }
 0x23f   : > { %4801 = vmatpush3.bf16.msra.mxu1 %v5917_v23  ;;  %4813 = vmatpush3.bf16.msra.mxu0 %v5919_v25 }
 0x240   : > { %4814 = vmatprep.subr.bf16.mxu1 %v6438_v14  ;;  %4826 = vmatprep.subr.bf16.mxu0 %v6438_v14 }
 0x242   : > { %4414 = vmatmul.mubr.msk.f32.vlgmr.msra.gmra.mrb[18].mxu1 %vm1541_vm2, %v5707_v24  ;;  %4439 = vmatmul.mubr.msk.f32.vlgmr.msra.gmra.mrb[20].mxu0 %vm1541_vm2, %v5707_v24 }
 0x243   : > { %4816 = vmatpush3.bf16.msra.mxu1 %v5933_v62  ;;  %4416 = vmatprep.mubr.msk.f32.mxu1 %vm5112_vm0, %v6437_v9 }
 0x244   : > { %4441 = vmatprep.mubr.msk.f32.mxu0 %vm5112_vm0, %v6437_v9  ;;  %4817 = vmatprep.subr.bf16.mxu1 %v6438_v14 }
 0x245   : > { %2630 = vperm.xlu1 %5038, %v2627_v37  }
 0x246   : > { %4417 = vmatmul.mubr.msk.f32.gmra.mrb[20].mxu1 %vm1541_vm2, %v5725_v1  ;;  %4442 = vmatmul.mubr.msk.f32.gmra.mrb[22].mxu0 %vm1541_vm2, %v5725_v1 }
 0x247   : > { %4819 = vmatpush3.bf16.msra.mxu1 %v5947_v46  ;;  %4419 = vmatprep.mubr.msk.f32.mxu1 %vm5112_vm0, %v6437_v9 }
 0x248   : > { %4444 = vmatprep.mubr.msk.f32.mxu0 %vm5112_vm0, %v6437_v9  ;;  %4820 = vmatprep.subr.bf16.mxu1 %v6438_v14 }
 0x249   : > { %2656 = vperm.xlu1 %5038, %v5867_v38  }
 0x24a   : > { %4420 = vmatmul.mubr.msk.f32.gmra.mrb[22].mxu1 %vm1541_vm2, %v5747_v11  ;;  %4445 = vmatmul.mubr.msk.f32.gmra.mrb[24].mxu0 %vm1541_vm2, %v5747_v11 }
 0x24b   : > { %4822 = vmatpush3.bf16.msra.mxu1 %v5962_v31  ;;  %4463 = vmatprep.mubr.msk.f32.mxu1 %vm5112_vm0, %v6437_v9 }
 0x24c   : > { %4823 = vmatprep.subr.bf16.mxu1 %v6438_v14  ;;  %4478 = vmatprep.mubr.msk.f32.mxu0 %vm5112_vm0, %v6437_v9 }
 0x24d   : > { %5039 = vset.pattern.permute.xlu1 %v6439_v26 }
 0x24e   : > { %2699 = vperm.xlu1 %5039, %v5867_v38  }
 0x24f   : > { %4825 = vmatpush3.bf16.msra.mxu1 %v5974_v8 }
 0x250   : > { %4829 = vmatprep.subr.bf16.mxu1 %v6438_v14 }
 0x252   : > { %4464 = vmatmul.mubr.msk.f32.vlgmr.msra.gmra.mrb[24].mxu1 %vm1541_vm2, %v5707_v24  ;;  %5040 = vset.pattern.permute.xlu1 %v6442_v27  ;;  %v2645_v24 = vld [vmem:[%s6467_s28] sm:$0xff] }
 0x253   : > { %4466 = vmatprep.mubr.msk.f32.mxu1 %vm5112_vm0, %v6437_v9  ;;  %4831 = vmatpush3.bf16.msra.mxu1 %v5589_v54  ;;  %v1634_v54 = vpop.permute.xlu1 %1633 }
 0x254   : > { %4832 = vmatprep.subr.bf16.mxu1 %v6438_v14  ;;  %2721 = vperm.xlu1 %5040, %v5867_v38   ;;  %v2648_v38 = vld [vmem:[%s6468_s1] sm:$0xff] }
 0x256   : > { %4467 = vmatmul.mubr.msk.f32.gmra.mrb[26].mxu1 %vm1541_vm2, %v5725_v1  ;;  %v2644_v1 = vld [vmem:[%s6451_s23 + $0x10] sm:$0xff] }
 0x257   : > { %4469 = vmatprep.mubr.msk.f32.mxu1 %vm5112_vm0, %v6437_v9  ;;  %4834 = vmatpush3.bf16.msra.mxu1 %v5601_v13  ;;  %v1743_v13 = vpop.permute.xlu1 %1742 }
 0x258   : > { %4835 = vmatprep.subr.bf16.mxu1 %v6438_v14  ;;  %5041 = vset.pattern.permute.xlu1 %v6453_v20 }
 0x259   : > { %2681 = vperm.xlu1 %5041, %v5691_v59   ;;  %2685 = vperm.xlu0 %5044, %v2644_v1  }
 0x25a   : > { %4470 = vmatmul.mubr.msk.f32.gmra.mrb[28].mxu1 %vm1541_vm2, %v5747_v11 }
 0x25b   : > { %4497 = vmatprep.mubr.msk.f32.mxu1 %vm5112_vm0, %v6437_v9  ;;  %4837 = vmatpush3.bf16.msra.mxu1 %v5613_v17  ;;  %v6013_v11 = vpop.permute.xlu1 %1849 }
 0x25c   : > { %4838 = vmatprep.subr.bf16.mxu1 %v6438_v14 }
 0x25d   : > { %5042 = vset.pattern.permute.xlu1 %v6445_v18  ;;  %5047 = vset.pattern.permute.xlu0 %v6442_v27 }
 0x25e   : > { %2744 = vperm.xlu1 %5042, %v2645_v24   ;;  %2729 = vperm.xlu0 %5047, %v2644_v1   ;;  %v1639_v24 = vpop.permute.xlu0 %1638 }
 0x25f   : > { %4840 = vmatpush3.bf16.msra.mxu1 %v5625_v55  ;;  %v6017_v17 = vpop.permute.xlu1 %1853  ;;  %v2647_v55 = vld [vmem:[%s6467_s28 + $0x10] sm:$0xff] }
 0x260   : > { %4853 = vmatprep.subr.bf16.mxu1 %v6438_v14 }
 0x262   : > { %2762 = vperm.xlu1 %5042, %v2648_v38   ;;  %5049 = vset.pattern.permute.xlu0 %v6445_v18  ;;  %v6041_v38 = vld [vmem:[%s6469_s2] sm:$0xff] }
 0x263   : > { %v6021_v0 = vpop.permute.xlu1 %1960  ;;  %2754 = vperm.xlu0 %5049, %v2647_v55  }
 0x266   : > { %2666 = vperm.xlu1 %5042, %v2644_v1  }
 0x267   : > { %2877 = vperm.xlu0 %5049, %v6024_v52   ;;  %v1644_v16 = vpop.permute.xlu1 %1643 }
 0x26a   : > { %5045 = vset.pattern.permute.xlu1 %v6442_v27 }
 0x26b   : > { %2725 = vperm.xlu1 %5045, %v5691_v59   ;;  %5051 = vset.pattern.permute.xlu0 %v6453_v20  ;;  %v6033_v37 = vpop.permute.xlu1 %2063 }
 0x26c   : > { %2976 = vperm.xlu0 %5051, %v6024_v52  }
 0x26f   : > { %5046 = vset.pattern.permute.xlu1 %v6439_v26  ;;  %v6037_v59 = vpop.permute.xlu1 %2067 }
 0x270   : > { %2707 = vperm.xlu1 %5046, %v2644_v1   ;;  %v1747_v1 = vpop.permute.xlu0 %1746 }
 0x273   : > { %v6043_v55 = vpop.permute.xlu1 %2170 }
 0x274   : > { %5048 = vset.pattern.permute.xlu1 %v6445_v18  ;;  %v1751_v41 = vpop.permute.xlu0 %1750 }
 0x275   : > { %2749 = vperm.xlu1 %5048, %v2646_v60  }
 0x277   : > { %v6047_v35 = vpop.permute.xlu1 %2174 }
 0x278   : > { %v1858_v15 = vpop.permute.xlu0 %1857 }
 0x279   : > { %2767 = vperm.xlu1 %5048, %v2649_v36  }
 0x27b   : > { %v6052_v30 = vpop.permute.xlu1 %2277 }
 0x27d   : > { %2772 = vperm.xlu1 %5048, %v2650_v51  }
 0x281   : > { %2872 = vperm.xlu1 %5048, %v6041_v38  }
 0x285   : > { %5050 = vset.pattern.permute.xlu1 %v6453_v20 }
 0x286   : > { %2972 = vperm.xlu1 %5050, %v6041_v38  }
 0x28a   : > { %5052 = vset.pattern.permute.xlu1 %v6439_v26 }
 0x28b   : > { %3070 = vperm.xlu1 %5052, %v6041_v38  }
 0x28f   : > { %3074 = vperm.xlu1 %5052, %v6024_v52  }
 0x293   : > { %5053 = vset.pattern.permute.xlu1 %v6442_v27 }
 0x294   : > { %3172 = vperm.xlu1 %5053, %v6024_v52  }
 0x298   : > { %5054 = vset.pattern.permute.xlu1 %v6445_v18 }
 0x2e5   : > { %v1617_v60 = vpop.f32.mrb[0].mxu1  ;;  %v1727_v36 = vpop.f32.mrb[2].mxu0 }
 0x2e6   : > { %v1646_v12 = vmul.f32 %v1634_v54, %v1617_v60  ;;  %v1753_v56 = vmul.f32 %v1743_v13, %v1727_v36  ;;  %v4265_v2 = vpop.f32.mrb[1].mxu1  ;;  %v4290_v51 = vpop.f32.mrb[3].mxu0 }
 0x2e8   : > { %v1756_v8 = vadd.f32 %v1753_v56, %v1646_v12 }
 0x2e9   : > { %v1622_v31 = vpop.f32.mrb[2].mxu1  ;;  %v1732_v46 = vpop.f32.mrb[4].mxu0 }
 0x2ea   : > { %v1647_v62 = vmul.f32 %v1639_v24, %v1622_v31  ;;  %v1754_v20 = vmul.f32 %v1747_v1, %v1732_v46  ;;  %v4268_v25 = vpop.f32.mrb[3].mxu1  ;;  %v4293_v23 = vpop.f32.mrb[5].mxu0 }
 0x2eb   : > { %v1957_v46 = vpop.permute.xlu0 %1956  ;;  %v6057_v25 = vpop.permute.xlu1 %2281 }
 0x2ec   : > { %v1757_v40 = vadd.f32 %v1754_v20, %v1647_v62 }
 0x2ed   : > { %v1627_v32 = vpop.f32.mrb[4].mxu1  ;;  %v1737_v54 = vpop.f32.mrb[6].mxu0 }
 0x2ee   : > { %v1648_v2 = vmul.f32 %v1644_v16, %v1627_v32  ;;  %v1755_v56 = vmul.f32 %v1751_v41, %v1737_v54  ;;  %v4271_v12 = vpop.f32.mrb[5].mxu1  ;;  %v4296_v13 = vpop.f32.mrb[7].mxu0 }
 0x2ef   : > { %v1965_v13 = vpop.permute.xlu0 %1964  ;;  %v2385_v47 = vpop.permute.xlu1 %2384 }
 0x2f0   : > { %v1758_v60 = vadd.f32 %v1755_v56, %v1648_v2 }
 0x2f5   : > { %v1834_v23 = vpop.f32.mrb[6].mxu1  ;;  %v1941_v62 = vpop.f32.mrb[8].mxu0 }
 0x2f6   : > { %v1860_v31 = vmul.f32 %v6013_v11, %v1834_v23  ;;  %v4315_v24 = vpop.f32.mrb[7].mxu1  ;;  %v4340_v1 = vpop.f32.mrb[9].mxu0  ;;  %v1967_v41 = vmul.f32 %v1957_v46, %v1941_v62 }
 0x2f8   : > { %v1863_v32 = vadd.f32 %v1860_v31, %v1756_v8  ;;  %v2072_v31 = vpop.permute.xlu0 %2071 }
 0x2f9   : > { %v1839_v16 = vpop.f32.mrb[8].mxu1  ;;  %v1946_v36 = vpop.f32.mrb[10].mxu0 }
 0x2fa   : > { %v1970_v51 = vadd.f32 %v1967_v41, %v1863_v32  ;;  %v1861_v20 = vmul.f32 %v6017_v17, %v1839_v16  ;;  %v4318_v54 = vpop.f32.mrb[9].mxu1  ;;  %v4343_v2 = vpop.f32.mrb[11].mxu0  ;;  %v1968_v12 = vmul.f32 %v6021_v0, %v1946_v36 }
 0x2fb   : > { %v2389_v32 = vpop.permute.xlu1 %2388 }
 0x2fc   : > { %v1864_v56 = vadd.f32 %v1861_v20, %v1757_v40 }
 0x2fd   : > { %v1844_v22 = vpop.f32.mrb[10].mxu1  ;;  %v1951_v11 = vpop.f32.mrb[12].mxu0 }
 0x2fe   : > { %v1971_v23 = vadd.f32 %v1968_v12, %v1864_v56  ;;  %v1862_v24 = vmul.f32 %v1858_v15, %v1844_v22  ;;  %v4321_v1 = vpop.f32.mrb[11].mxu1  ;;  %v4346_v63 = vpop.f32.mrb[13].mxu0  ;;  %v1969_v46 = vmul.f32 %v1965_v13, %v1951_v11 }
 0x2ff   : > { %v2179_v13 = vpop.permute.xlu0 %2178  ;;  %v2492_v11 = vpop.permute.xlu1 %2491 }
 0x300   : > { %v1865_v8 = vadd.f32 %v1862_v24, %v1758_v60 }
 0x302   : > { %v1972_v62 = vadd.f32 %v1969_v46, %v1865_v8 }
 0x305   : > { %v2048_v41 = vpop.f32.mrb[12].mxu1  ;;  %v2155_v17 = vpop.f32.mrb[14].mxu0 }
 0x306   : > { %v2074_v16 = vmul.f32 %v6033_v37, %v2048_v41  ;;  %v4365_v40 = vpop.f32.mrb[13].mxu1  ;;  %v4390_v20 = vpop.f32.mrb[15].mxu0  ;;  %v2181_v36 = vmul.f32 %v6043_v55, %v2155_v17 }
 0x308   : > { %v2077_v0 = vadd.f32 %v2074_v16, %v1970_v51  ;;  %v2496_v16 = vpop.permute.xlu1 %2495 }
 0x309   : > { %v2053_v54 = vpop.f32.mrb[14].mxu1  ;;  %v2160_v2 = vpop.f32.mrb[16].mxu0 }
 0x30a   : > { %v2184_v56 = vadd.f32 %v2181_v36, %v2077_v0  ;;  %v2075_v22 = vmul.f32 %v6037_v59, %v2053_v54  ;;  %v4368_v63 = vpop.f32.mrb[15].mxu1  ;;  %v4393_v15 = vpop.f32.mrb[17].mxu0  ;;  %v2182_v12 = vmul.f32 %v6047_v35, %v2160_v2 }
 0x30c   : > { %v2078_v60 = vadd.f32 %v2075_v22, %v1971_v23  ;;  %v2393_v54 = vpop.permute.xlu1 %2392 }
 0x30d   : > { %v2058_v24 = vpop.f32.mrb[16].mxu1  ;;  %v2165_v1 = vpop.f32.mrb[18].mxu0 }
 0x30e   : > { %v2185_v37 = vadd.f32 %v2182_v12, %v2078_v60  ;;  %v2076_v8 = vmul.f32 %v2072_v31, %v2058_v24  ;;  %v4371_v46 = vpop.f32.mrb[17].mxu1  ;;  %v4396_v51 = vpop.f32.mrb[19].mxu0  ;;  %v2183_v55 = vmul.f32 %v2179_v13, %v2165_v1 }
 0x310   : > { %v2079_v41 = vadd.f32 %v2076_v8, %v1972_v62  ;;  %v2286_v62 = vpop.permute.xlu0 %2285 }
 0x312   : > { %v2186_v17 = vadd.f32 %v2183_v55, %v2079_v41  ;;  %v2514_v41 = vpop.permute.xlu1 %2513 }
 0x315   : > { %v2262_v40 = vpop.f32.mrb[18].mxu1  ;;  %v2369_v20 = vpop.f32.mrb[20].mxu0 }
 0x316   : > { %v2288_v59 = vmul.f32 %v6052_v30, %v2262_v40  ;;  %v4415_v0 = vpop.f32.mrb[19].mxu1  ;;  %v4440_v23 = vpop.f32.mrb[21].mxu0  ;;  %v2395_v35 = vmul.f32 %v2385_v47, %v2369_v20 }
 0x317   : > { %v2500_v40 = vpop.permute.xlu1 %2499 }
 0x318   : > { %v2291_v36 = vadd.f32 %v2288_v59, %v2184_v56 }
 0x319   : > { %v2267_v2 = vpop.f32.mrb[20].mxu1  ;;  %v2374_v22 = vpop.f32.mrb[22].mxu0 }
 0x31a   : > { %v2398_v63 = vadd.f32 %v2395_v35, %v2291_v36  ;;  %v2289_v31 = vmul.f32 %v6057_v25, %v2267_v2  ;;  %v4418_v15 = vpop.f32.mrb[21].mxu1  ;;  %v4443_v60 = vpop.f32.mrb[23].mxu0  ;;  %v2396_v13 = vmul.f32 %v2389_v32, %v2374_v22 }
 0x31b   : > { %v2519_v25 = vpop.permute.xlu0 %2518  ;;  %v2535_v2 = vpop.permute.xlu1 %2534 }
 0x31c   : > { %v2292_v12 = vadd.f32 %v2289_v31, %v2185_v37 }
 0x31d   : > { %v2272_v24 = vpop.f32.mrb[22].mxu1  ;;  %v2379_v1 = vpop.f32.mrb[24].mxu0 }
 0x31e   : > { %v2399_v8 = vadd.f32 %v2396_v13, %v2292_v12  ;;  %v2290_v46 = vmul.f32 %v2286_v62, %v2272_v24  ;;  %v4421_v30 = vpop.f32.mrb[23].mxu1  ;;  %v4446_v51 = vpop.f32.mrb[25].mxu0  ;;  %v2397_v47 = vmul.f32 %v2393_v54, %v2379_v1 }
 0x31f   : > { %v2540_v31 = vpop.permute.xlu0 %2539  ;;  %v2524_v24 = vpop.permute.xlu1 %2523 }
 0x320   : > { %v2293_v56 = vadd.f32 %v2290_v46, %v2186_v17 }
 0x322   : > { %v2400_v55 = vadd.f32 %v2397_v47, %v2293_v56  ;;  %v6086_v47 = vld [vmem:[%s6469_s2 + $0x10] sm:$0xff] }
 0x323   : > { %2882 = vperm.xlu1 %5054, %v6086_v47   ;;  %2980 = vperm.xlu0 %5051, %v6086_v47  }
 0x325   : > { %v2476_v20 = vpop.f32.mrb[24].mxu1 }
 0x326   : > { %v2502_v59 = vmul.f32 %v2492_v11, %v2476_v20  ;;  %v4465_v0 = vpop.f32.mrb[25].mxu1 }
 0x327   : > { %5056 = vset.pattern.permute.xlu0 %v6439_v26 }
 0x328   : > { %v2505_v23 = vadd.f32 %v2502_v59, %v2398_v63  ;;  %v2545_v63 = vpop.permute.xlu0 %2544  ;;  %3078 = vperm.xlu0 %5056, %v6086_v47   ;;  %v6474_v59 = vmov 6  }
 0x329   : > { %v2481_v36 = vpop.f32.mrb[26].mxu1 }
 0x32a   : > { %v2526_v35 = vmul.f32 %v2514_v41, %v2505_v23  ;;  %v2503_v37 = vmul.f32 %v2496_v16, %v2481_v36  ;;  %v4468_v32 = vpop.f32.mrb[27].mxu1  ;;  %v2631_v41 = vpop.permute.xlu1 %2630 }
 0x32c   : > { %v2506_v22 = vadd.f32 %v2503_v37, %v2399_v8  ;;  %v2547_v60 = vadd.f32 %v2535_v2, %v2526_v35  ;;  %v2553_v8 = vld [vmem:[%s6470_s0] sm:$0xf]  ;;  %5057 = vset.pattern.permute.xlu0 %v6442_v27  ;;  %v2638_v26 = vpop.permute.xlu0 %2637  ;;  %v6476_v35 = vmov 7   ;;  %v3676_v37 = vld [vmem:[%s6473_s11 + $0x8] sm:$0xff]  ;;  %s900_s0 = scalar_lea.vmem %s5272_s4, %s3900_s26 }
 0x32d   : > { %v2486_v15 = vpop.f32.mrb[28].mxu1  ;;  %3168 = vperm.xlu0 %5057, %v6041_v38  }
 0x32e   : > { %v2527_v62 = vmul.f32 %v2519_v25, %v2506_v22  ;;  %v2504_v17 = vmul.f32 %v2500_v40, %v2486_v15  ;;  %v4471_v54 = vpop.f32.mrb[29].mxu1  ;;  %v2550_v11 = vmax.f32 %v2547_v60, 0.0  ;;  %v2657_v56 = vpop.permute.xlu1 %2656  ;;  %v6472_v40 = vmov 5   ;;  %v3697_v15 = vld [vmem:[%s6475_s22 + $0x8] sm:$0xff] }
 0x330   : > { %v2548_v12 = vadd.f32 %v2540_v31, %v2527_v62  ;;  %v2507_v13 = vadd.f32 %v2504_v17, %v2400_v55  ;;  %v2662_v27 = vpop.permute.xlu0 %2661 }
 0x331   : > { %3176 = vperm.xlu0 %5057, %v6086_v47  }
 0x332   : > { %v2551_v1 = vmax.f32 %v2548_v12, 0.0  ;;  %v2528_v46 = vmul.f32 %v2524_v24, %v2507_v13  ;;  %v3698_v24 = vld [vmem:[%s6475_s22 + $0x10] sm:$0xff] }
 0x334   : > { %v2549_v30 = vadd.f32 %v2545_v63, %v2528_v46  ;;  %v4827_v51 = vpack.c.bf16 %v2551_v1, %v2550_v11  ;;  %v2704_v25 = vpop.permute.xlu0 %2703 }
 0x336   : > { %4828 = vmatpush3.bf16.msra.mxu0 %v4827_v51  ;;  %v2552_v16 = vmax.f32 %v2549_v30, 0.0 }
 0x337   : > { %4476 = vmatprep.subr.mxu0 %v6437_v9 }
 0x338   : > { %v2678_v32 = vpop.permute.xlu0 %2677 }
 0x33a   : > { %4477 = vmatpush3.msra.mxu0 %v2552_v16 }
 0x33b   : > { %4479 = vmatmul.mubr.msk.f32.vlgmr.msra.gmra.mrb[26].mxu0 %vm1306_vm1, %v2553_v8  ;;  %4841 = vmatprep.subr.bf16.mxu0 %v6438_v14 }
 0x33c   : > { %4843 = vmatpush3.bf16.msra.mxu0 %v5592_v61  ;;  %4522 = vmatprep.mubr.msk.f32.mxu0 %vm5112_vm0, %v6437_v9  ;;  %v6083_v61 = vpop.permute.xlu1 %2699  ;;  %v2686_v17 = vpop.permute.xlu0 %2685 }
 0x33d   : > { %4844 = vmatprep.subr.bf16.mxu0 %v6438_v14 }
 0x340   : > { %4846 = vmatpush3.bf16.msra.mxu0 %v5604_v57  ;;  %v6088_v55 = vpop.permute.xlu1 %2721  ;;  %v6471_v57 = vmov 4  }
 0x341   : > { %4847 = vmatprep.subr.bf16.mxu0 %v6438_v14  ;;  %5055 = vset.pattern.permute.xlu1 %v6471_v57 }
 0x342   : > { %3266 = vperm.xlu1 %5055, %v6041_v38   ;;  %5060 = vset.pattern.permute.xlu0 %v6471_v57  ;;  %v2730_v57 = vpop.permute.xlu0 %2729 }
 0x343   : > { %3274 = vperm.xlu0 %5060, %v6086_v47  }
 0x344   : > { %4849 = vmatpush3.bf16.msra.mxu0 %v5616_v44  ;;  %v2682_v44 = vpop.permute.xlu1 %2681 }
 0x345   : > { %4850 = vmatprep.subr.bf16.mxu0 %v6438_v14 }
 0x346   : > { %3270 = vperm.xlu1 %5055, %v6024_v52  }
 0x347   : > { %5062 = vset.pattern.permute.xlu0 %v6472_v40 }
 0x348   : > { %4852 = vmatpush3.bf16.msra.mxu0 %v5628_v5  ;;  %v6099_v5 = vpop.permute.xlu1 %2744  ;;  %3372 = vperm.xlu0 %5062, %v6086_v47  }
 0x349   : > { %4865 = vmatprep.subr.bf16.mxu0 %v6438_v14 }
 0x34a   : > { %5058 = vset.pattern.permute.xlu1 %v6472_v40 }
 0x34b   : > { %3364 = vperm.xlu1 %5058, %v6041_v38  }
 0x34c   : > { %v6104_v20 = vpop.permute.xlu1 %2762  ;;  %5064 = vset.pattern.permute.xlu0 %v6474_v59 }
 0x34d   : > { %3470 = vperm.xlu0 %5064, %v6086_v47  }
 0x34f   : > { %3368 = vperm.xlu1 %5058, %v6024_v52  }
 0x350   : > { %v2667_v0 = vpop.permute.xlu1 %2666 }
 0x351   : > { %5067 = vset.pattern.permute.xlu0 %v6445_v18 }
 0x352   : > { %3685 = vperm.xlu0 %5067, %v3676_v37  }
 0x353   : > { %5059 = vset.pattern.permute.xlu1 %v6474_v59 }
 0x354   : > { %3462 = vperm.xlu1 %5059, %v6041_v38   ;;  %v2726_v23 = vpop.permute.xlu1 %2725 }
 0x356   : > { %3706 = vperm.xlu0 %5067, %v3697_v15  }
 0x358   : > { %3466 = vperm.xlu1 %5059, %v6024_v52   ;;  %v2708_v62 = vpop.permute.xlu1 %2707 }
 0x35a   : > { %3711 = vperm.xlu0 %5067, %v3698_v24  }
 0x35c   : > { %5061 = vset.pattern.permute.xlu1 %v6476_v35 }
 0x35d   : > { %3560 = vperm.xlu1 %5061, %v6041_v38  }
 0x361   : > { %3564 = vperm.xlu1 %5061, %v6024_v52  }
 0x40e   : > { %v2623_v36 = vpop.f32.mrb[26].mxu0 }
 0x40f   : > { %v2633_v2 = vmul.f32 %v2631_v41, %v2623_v36  ;;  %v4480_v22 = vpop.f32.mrb[27].mxu0 }
 0x411   : > { %v2640_v31 = vadd.f32 %v2638_v26, %v2633_v2 }
 0x413   : > { %v6122_v60 = vadd.f32 %v2640_v31, %v5673_v33  ;;  %v6477_v33 = vmov 8  }
 0x414   : > { %5063 = vset.pattern.permute.xlu1 %v6477_v33 }
 0x415   : > { %v2672_v54 = vrot.slane %v6122_v60, %v6446_v3  ;;  %v2691_v12 = vrot.slane %v6122_v60, %v6447_v39  ;;  %v2713_v13 = vrot.slane %v6122_v60, %v6448_v50  ;;  %v2735_v46 = vrot.slane %v6122_v60, %v6450_v43  ;;  %3658 = vperm.xlu1 %5063, %v6041_v38   ;;  %v2750_v3 = vpop.permute.xlu1 %2749 }
 0x417   : > { %v2673_v11 = vmul.f32 %v2672_v54, %v2657_v56  ;;  %v2675_v1 = vmul.f32 %v2672_v54, %v2667_v0  ;;  %v2692_v63 = vmul.f32 %v2691_v12, %v2678_v32  ;;  %v2694_v30 = vmul.f32 %v2691_v12, %v2686_v17  ;;  %v3801_v56 = vld [vmem:[%s5267_s27] sm:$0xf] }
 0x418   : > { %v2674_v51 = vmul.f32 %v2672_v54, %v2662_v27  ;;  %v2693_v39 = vmul.f32 %v2691_v12, %v2682_v44  ;;  %v2714_v50 = vmul.f32 %v2713_v13, %v6083_v61  ;;  %v2716_v41 = vmul.f32 %v2713_v13, %v2708_v62  ;;  %3804 = vperm.xlu0 %5067, %v3801_v56  }
 0x419   : > { %v2695_v16 = vadd.f32 %v2692_v63, %v2673_v11  ;;  %v2697_v8 = vadd.f32 %v2694_v30, %v2675_v1  ;;  %v2715_v26 = vmul.f32 %v2713_v13, %v2704_v25  ;;  %v2736_v59 = vmul.f32 %v2735_v46, %v6088_v55  ;;  %3662 = vperm.xlu1 %5063, %v6024_v52   ;;  %v2768_v32 = vpop.permute.xlu1 %2767  ;;  %v2755_v25 = vpop.permute.xlu0 %2754 }
 0x41a   : > { %v2696_v40 = vadd.f32 %v2693_v39, %v2674_v51  ;;  %v2737_v38 = vmul.f32 %v2735_v46, %v2726_v23  ;;  %v2738_v27 = vmul.f32 %v2735_v46, %v2730_v57 }
 0x41b   : > { %v2717_v43 = vadd.f32 %v2714_v50, %v2695_v16  ;;  %v2719_v0 = vadd.f32 %v2716_v41, %v2697_v8 }
 0x41c   : > { %v2718_v36 = vadd.f32 %v2715_v26, %v2696_v40 }
 0x41d   : > { %v2739_v44 = vadd.f32 %v2736_v59, %v2717_v43  ;;  %v2741_v2 = vadd.f32 %v2738_v27, %v2719_v0  ;;  %5065 = vset.pattern.permute.xlu1 %v6476_v35  ;;  %v2773_v15 = vpop.permute.xlu1 %2772  ;;  %v6490_v35 = vld [vmem:[#allocation23_spill] sm:$0xff]  ;;  %v2878_v1 = vpop.permute.xlu0 %2877 }
 0x41e   : > { %v2740_v37 = vadd.f32 %v2737_v38, %v2718_v36  ;;  %3568 = vperm.xlu1 %5065, %v6086_v47  }
 0x41f   : > { %v2757_v61 = vmul.f32 %v6099_v5, %v2739_v44  ;;  %v2759_v23 = vmul.f32 %v2755_v25, %v2741_v2 }
 0x420   : > { %v2758_v22 = vmul.f32 %v2750_v3, %v2740_v37 }
 0x421   : > { %v2775_v55 = vadd.f32 %v6104_v20, %v2757_v61  ;;  %v2777_v20 = vadd.f32 %v2773_v15, %v2759_v23 }
 0x422   : > { %v2776_v52 = vadd.f32 %v2768_v32, %v2758_v22  ;;  %5066 = vset.pattern.permute.xlu1 %v6445_v18 }
 0x423   : > { %v6144_v31 = vmax.f32 %v2775_v55, 0.0 }
 0x424   : > { %v6153_v5 = vmax.f32 %v2776_v52, 0.0 }
 0x425   : > { %4498 = vmatmul.mubr.msk.f32.vlgmr.msra.gmra.mrb[30].mxu1 %vm1541_vm2, %v6144_v31  ;;  %4523 = vmatmul.mubr.msk.f32.vlgmr.msra.gmra.mrb[28].mxu0 %vm1541_vm2, %v6144_v31 }
 0x426   : > { %4855 = vmatpush3.bf16.msra.mxu1 %v5702_v21  ;;  %4867 = vmatpush3.bf16.msra.mxu0 %v5704_v6  ;;  %v6167_v21 = vmax.f32 %v2777_v20, 0.0  ;;  %v3675_v6 = vld [vmem:[%s6473_s11] sm:$0xff] }
 0x427   : > { %4500 = vmatprep.mubr.msk.f32.mxu1 %vm5112_vm0, %v6437_v9  ;;  %4525 = vmatprep.mubr.msk.f32.mxu0 %vm5112_vm0, %v6437_v9 }
 0x428   : > { %4856 = vmatprep.subr.bf16.mxu1 %v6438_v14  ;;  %4868 = vmatprep.subr.bf16.mxu0 %v6438_v14 }
 0x429   : > { %4501 = vmatmul.mubr.msk.f32.gmra.mrb[32].mxu1 %vm1541_vm2, %v6153_v5  ;;  %4526 = vmatmul.mubr.msk.f32.gmra.mrb[30].mxu0 %vm1541_vm2, %v6153_v5 }
 0x42a   : > { %4858 = vmatpush3.bf16.msra.mxu1 %v5720_v34  ;;  %4870 = vmatpush3.bf16.msra.mxu0 %v5722_v7  ;;  %v6478_v34 = vld [vmem:[#allocation15_spill] sm:$0xff]  ;;  %v6479_v7 = vld [vmem:[#allocation18_spill] sm:$0xff] }
 0x42b   : > { %4503 = vmatprep.mubr.msk.f32.mxu1 %vm5112_vm0, %v6437_v9  ;;  %4528 = vmatprep.mubr.msk.f32.mxu0 %vm5112_vm0, %v6437_v9 }
 0x42c   : > { %4859 = vmatprep.subr.bf16.mxu1 %v6438_v14  ;;  %4871 = vmatprep.subr.bf16.mxu0 %v6438_v14 }
 0x42d   : > { %4504 = vmatmul.mubr.msk.f32.gmra.mrb[34].mxu1 %vm1541_vm2, %v6167_v21  ;;  %4529 = vmatmul.mubr.msk.f32.gmra.mrb[32].mxu0 %vm1541_vm2, %v6167_v21 }
 0x42e   : > { %4861 = vmatpush3.bf16.msra.mxu1 %v5742_v49  ;;  %4873 = vmatpush3.bf16.msra.mxu0 %v5744_v53  ;;  %v6480_v49 = vld [vmem:[#allocation17_spill] sm:$0xff]  ;;  %v6481_v53 = vld [vmem:[#allocation27_spill] sm:$0xff] }
 0x42f   : > { %4862 = vmatprep.subr.bf16.mxu1 %v6438_v14  ;;  %4874 = vmatprep.subr.bf16.mxu0 %v6438_v14 }
 0x430   : > { %4547 = vmatprep.mubr.msk.f32.mxu1 %vm5112_vm0, %v6437_v9  ;;  %4572 = vmatprep.mubr.msk.f32.mxu0 %vm5112_vm0, %v6437_v9 }
 0x431   : > { %3680 = vperm.xlu1 %5066, %v3675_v6  }
 0x432   : > { %4864 = vmatpush3.bf16.msra.mxu1 %v5764_v42  ;;  %4876 = vmatpush3.bf16.msra.mxu0 %v5766_v45  ;;  %v6482_v42 = vld [vmem:[#allocation20_spill] sm:$0xff] }
 0x433   : > { %4877 = vmatprep.subr.bf16.mxu1 %v6438_v14  ;;  %4889 = vmatprep.subr.bf16.mxu0 %v6438_v14  ;;  %v6483_v45 = vld [vmem:[#allocation24_spill] sm:$0xff] }
 0x435   : > { %4548 = vmatmul.mubr.msk.f32.vlgmr.msra.gmra.mrb[36].mxu1 %vm1541_vm2, %v6144_v31  ;;  %4573 = vmatmul.mubr.msk.f32.vlgmr.msra.gmra.mrb[34].mxu0 %vm1541_vm2, %v6144_v31 }
 0x436   : > { %4879 = vmatpush3.bf16.msra.mxu1 %v5782_v48  ;;  %4891 = vmatpush3.bf16.msra.mxu0 %v5784_v29  ;;  %v6484_v48 = vld [vmem:[#allocation26_spill] sm:$0xff] }
 0x437   : > { %4550 = vmatprep.mubr.msk.f32.mxu1 %vm5112_vm0, %v6437_v9  ;;  %4575 = vmatprep.mubr.msk.f32.mxu0 %vm5112_vm0, %v6437_v9  ;;  %v3696_v29 = vld [vmem:[%s6475_s22] sm:$0xff] }
 0x438   : > { %4880 = vmatprep.subr.bf16.mxu1 %v6438_v14  ;;  %4892 = vmatprep.subr.bf16.mxu0 %v6438_v14 }
 0x439   : > { %4551 = vmatmul.mubr.msk.f32.gmra.mrb[38].mxu1 %vm1541_vm2, %v6153_v5  ;;  %4576 = vmatmul.mubr.msk.f32.gmra.mrb[36].mxu0 %vm1541_vm2, %v6153_v5 }
 0x43a   : > { %4882 = vmatpush3.bf16.msra.mxu1 %v5798_v4  ;;  %4894 = vmatpush3.bf16.msra.mxu0 %v5800_v10  ;;  %v6485_v4 = vld [vmem:[#allocation25_spill] sm:$0xff]  ;;  %v6486_v10 = vld [vmem:[#allocation16_spill] sm:$0xff] }
 0x43b   : > { %4553 = vmatprep.mubr.msk.f32.mxu1 %vm5112_vm0, %v6437_v9  ;;  %4578 = vmatprep.mubr.msk.f32.mxu0 %vm5112_vm0, %v6437_v9 }
 0x43c   : > { %4883 = vmatprep.subr.bf16.mxu1 %v6438_v14  ;;  %4895 = vmatprep.subr.bf16.mxu0 %v6438_v14 }
 0x43d   : > { %4554 = vmatmul.mubr.msk.f32.gmra.mrb[40].mxu1 %vm1541_vm2, %v6167_v21  ;;  %4579 = vmatmul.mubr.msk.f32.gmra.mrb[38].mxu0 %vm1541_vm2, %v6167_v21 }
 0x43e   : > { %4885 = vmatpush3.bf16.msra.mxu1 %v5818_v19  ;;  %4897 = vmatpush3.bf16.msra.mxu0 %v5820_v28  ;;  %v3677_v19 = vld [vmem:[%s6473_s11 + $0x10] sm:$0xff]  ;;  %v6487_v28 = vld [vmem:[#allocation14_spill] sm:$0xff] }
 0x43f   : > { %4886 = vmatprep.subr.bf16.mxu1 %v6438_v14  ;;  %4898 = vmatprep.subr.bf16.mxu0 %v6438_v14 }
 0x440   : > { %4597 = vmatprep.mubr.msk.f32.mxu1 %vm5112_vm0, %v6437_v9  ;;  %4622 = vmatprep.mubr.msk.f32.mxu0 %vm5112_vm0, %v6437_v9 }
 0x441   : > { %5068 = vset.pattern.permute.xlu1 %v6477_v33  ;;  %v2977_v33 = vpop.permute.xlu0 %2976 }
 0x442   : > { %4888 = vmatpush3.bf16.msra.mxu1 %v5838_v58  ;;  %4900 = vmatpush3.bf16.msra.mxu0 %v6478_v34  ;;  %v6488_v58 = vld [vmem:[#allocation22_spill] sm:$0xff] }
 0x443   : > { %4901 = vmatprep.subr.bf16.mxu1 %v6438_v14  ;;  %4913 = vmatprep.subr.bf16.mxu0 %v6438_v14 }
 0x444   : > { %3666 = vperm.xlu1 %5068, %v6086_v47   ;;  %v6489_v47 = vld [vmem:[#allocation19_spill] sm:$0xff] }
 0x445   : > { %4598 = vmatmul.mubr.msk.f32.vlgmr.msra.gmra.mrb[42].mxu1 %vm1541_vm2, %v6144_v31  ;;  %4623 = vmatmul.mubr.msk.f32.vlgmr.msra.gmra.mrb[40].mxu0 %vm1541_vm2, %v6144_v31  ;;  %v2981_v63 = vpop.permute.xlu0 %2980 }
 0x446   : > { %4903 = vmatpush3.bf16.msra.mxu1 %v6479_v7  ;;  %4915 = vmatpush3.bf16.msra.mxu0 %v6480_v49 }
 0x447   : > { %4600 = vmatprep.mubr.msk.f32.mxu1 %vm5112_vm0, %v6437_v9  ;;  %4625 = vmatprep.mubr.msk.f32.mxu0 %vm5112_vm0, %v6437_v9 }
 0x448   : > { %4904 = vmatprep.subr.bf16.mxu1 %v6438_v14  ;;  %4916 = vmatprep.subr.bf16.mxu0 %v6438_v14 }
 0x449   : > { %4601 = vmatmul.mubr.msk.f32.gmra.mrb[44].mxu1 %vm1541_vm2, %v6153_v5  ;;  %4626 = vmatmul.mubr.msk.f32.gmra.mrb[42].mxu0 %vm1541_vm2, %v6153_v5  ;;  %v3079_v38 = vpop.permute.xlu0 %3078 }
 0x44a   : > { %4906 = vmatpush3.bf16.msra.mxu1 %v6481_v53  ;;  %4918 = vmatpush3.bf16.msra.mxu0 %v6482_v42 }
 0x44b   : > { %4603 = vmatprep.mubr.msk.f32.mxu1 %vm5112_vm0, %v6437_v9  ;;  %4628 = vmatprep.mubr.msk.f32.mxu0 %vm5112_vm0, %v6437_v9 }
 0x44c   : > { %4907 = vmatprep.subr.bf16.mxu1 %v6438_v14  ;;  %4919 = vmatprep.subr.bf16.mxu0 %v6438_v14 }
 0x44d   : > { %4604 = vmatmul.mubr.msk.f32.gmra.mrb[46].mxu1 %vm1541_vm2, %v6167_v21  ;;  %4629 = vmatmul.mubr.msk.f32.gmra.mrb[44].mxu0 %vm1541_vm2, %v6167_v21  ;;  %v3169_v25 = vpop.permute.xlu0 %3168 }
 0x44e   : > { %4909 = vmatpush3.bf16.msra.mxu1 %v6483_v45  ;;  %4921 = vmatpush3.bf16.msra.mxu0 %v6484_v48 }
 0x44f   : > { %4910 = vmatprep.subr.bf16.mxu1 %v6438_v14  ;;  %4922 = vmatprep.subr.bf16.mxu0 %v6438_v14 }
 0x450   : > { %4647 = vmatprep.mubr.msk.f32.mxu1 %vm5112_vm0, %v6437_v9  ;;  %4672 = vmatprep.mubr.msk.f32.mxu0 %vm5112_vm0, %v6437_v9 }
 0x451   : > { %5069 = vset.pattern.permute.xlu1 %v6445_v18  ;;  %v3794_v18 = vld [vmem:[%s5262_s20] sm:$0xf] }
 0x452   : > { %4912 = vmatpush3.bf16.msra.mxu1 %v6485_v4  ;;  %4924 = vmatpush3.bf16.msra.mxu0 %v6486_v10 }
 0x453   : > { %4925 = vmatprep.subr.bf16.mxu1 %v6438_v14  ;;  %3701 = vperm.xlu1 %5069, %v3696_v29   ;;  %v3177_v29 = vpop.permute.xlu0 %3176 }
 0x454   : > { %4937 = vmatprep.subr.bf16.mxu0 %v6438_v14 }
 0x455   : > { %4648 = vmatmul.mubr.msk.f32.vlgmr.msra.gmra.mrb[48].mxu1 %vm1541_vm2, %v6144_v31  ;;  %4673 = vmatmul.mubr.msk.f32.vlgmr.msra.gmra.mrb[46].mxu0 %vm1541_vm2, %v6144_v31 }
 0x456   : > { %4927 = vmatpush3.bf16.msra.mxu1 %v6487_v28  ;;  %4650 = vmatprep.mubr.msk.f32.mxu1 %vm5112_vm0, %v6437_v9 }
 0x457   : > { %4675 = vmatprep.mubr.msk.f32.mxu0 %vm5112_vm0, %v6437_v9  ;;  %4928 = vmatprep.subr.bf16.mxu1 %v6438_v14 }
 0x458   : > { %3690 = vperm.xlu1 %5069, %v3677_v19  }
 0x459   : > { %4651 = vmatmul.mubr.msk.f32.gmra.mrb[50].mxu1 %vm1541_vm2, %v6153_v5  ;;  %4676 = vmatmul.mubr.msk.f32.gmra.mrb[48].mxu0 %vm1541_vm2, %v6153_v5 }
 0x45a   : > { %4930 = vmatpush3.bf16.msra.mxu1 %v6488_v58  ;;  %4653 = vmatprep.mubr.msk.f32.mxu1 %vm5112_vm0, %v6437_v9 }
 0x45b   : > { %4678 = vmatprep.mubr.msk.f32.mxu0 %vm5112_vm0, %v6437_v9  ;;  %4931 = vmatprep.subr.bf16.mxu1 %v6438_v14 }
 0x45c   : > { %3797 = vperm.xlu1 %5069, %v3794_v18  }
 0x45d   : > { %4654 = vmatmul.mubr.msk.f32.gmra.mrb[52].mxu1 %vm1541_vm2, %v6167_v21  ;;  %4679 = vmatmul.mubr.msk.f32.gmra.mrb[50].mxu0 %vm1541_vm2, %v6167_v21 }
 0x45e   : > { %4933 = vmatpush3.bf16.msra.mxu1 %v6489_v47  ;;  %4697 = vmatprep.mubr.msk.f32.mxu1 %vm5112_vm0, %v6437_v9 }
 0x45f   : > { %4934 = vmatprep.subr.bf16.mxu1 %v6438_v14  ;;  %4712 = vmatprep.mubr.msk.f32.mxu0 %vm5112_vm0, %v6437_v9  ;;  %v2873_v14 = vpop.permute.xlu1 %2872 }
 0x462   : > { %4936 = vmatpush3.bf16.msra.mxu1 %v6490_v35 }
 0x463   : > { %v2973_v62 = vpop.permute.xlu1 %2972 }
 0x465   : > { %4698 = vmatmul.mubr.msk.f32.vlgmr.msra.gmra.mrb[54].mxu1 %vm1541_vm2, %v6144_v31 }
 0x466   : > { %4700 = vmatprep.mubr.msk.f32.mxu1 %vm5112_vm0, %v6437_v9 }
 0x467   : > { %v3071_v17 = vpop.permute.xlu1 %3070 }
 0x469   : > { %4701 = vmatmul.mubr.msk.f32.gmra.mrb[56].mxu1 %vm1541_vm2, %v6153_v5 }
 0x46a   : > { %4703 = vmatprep.mubr.msk.f32.mxu1 %vm5112_vm0, %v6437_v9 }
 0x46b   : > { %v3075_v54 = vpop.permute.xlu1 %3074 }
 0x46d   : > { %4704 = vmatmul.mubr.msk.f32.gmra.mrb[58].mxu1 %vm1541_vm2, %v6167_v21 }
 0x46f   : > { %v3173_v12 = vpop.permute.xlu1 %3172 }
 0x473   : > { %v2883_v13 = vpop.permute.xlu1 %2882 }
 0x477   : > { %v3267_v24 = vpop.permute.xlu1 %3266 }
 0x47b   : > { %v6319_v11 = vpop.permute.xlu1 %3270 }
 0x47f   : > { %v3365_v46 = vpop.permute.xlu1 %3364 }
 0x483   : > { %v6321_v30 = vpop.permute.xlu1 %3368 }
 0x487   : > { %v6323_v36 = vpop.permute.xlu1 %3462 }
 0x48b   : > { %v6325_v55 = vpop.permute.xlu1 %3466 }
 0x48f   : > { %v3561_v4 = vpop.permute.xlu1 %3560 }
 0x4f8   : > { %v2856_v3 = vpop.f32.mrb[30].mxu1  ;;  %v2957_v51 = vpop.f32.mrb[28].mxu0 }
 0x4f9   : > { %v2885_v39 = vmul.f32 %v2873_v14, %v2856_v3  ;;  %v2983_v16 = vmul.f32 %v2973_v62, %v2957_v51  ;;  %v4499_v8 = vpop.f32.mrb[31].mxu1  ;;  %v4524_v50 = vpop.f32.mrb[29].mxu0 }
 0x4fb   : > { %v2986_v41 = vadd.f32 %v2983_v16, %v2885_v39 }
 0x4fc   : > { %v2861_v56 = vpop.f32.mrb[32].mxu1  ;;  %v2962_v57 = vpop.f32.mrb[30].mxu0 }
 0x4fd   : > { %v2886_v40 = vmul.f32 %v2878_v1, %v2861_v56  ;;  %v2984_v26 = vmul.f32 %v2977_v33, %v2962_v57  ;;  %v4502_v59 = vpop.f32.mrb[33].mxu1  ;;  %v4527_v43 = vpop.f32.mrb[31].mxu0 }
 0x4ff   : > { %v2987_v0 = vadd.f32 %v2984_v26, %v2886_v40 }
 0x500   : > { %v2866_v44 = vpop.f32.mrb[34].mxu1  ;;  %v2967_v27 = vpop.f32.mrb[32].mxu0 }
 0x501   : > { %v2887_v37 = vmul.f32 %v2883_v13, %v2866_v44  ;;  %v2985_v32 = vmul.f32 %v2981_v63, %v2967_v27  ;;  %v4505_v61 = vpop.f32.mrb[35].mxu1  ;;  %v4530_v2 = vpop.f32.mrb[33].mxu0 }
 0x502   : > { %v3565_v13 = vpop.permute.xlu1 %3564 }
 0x503   : > { %v2988_v22 = vadd.f32 %v2985_v32, %v2887_v37 }
 0x506   : > { %v3659_v59 = vpop.permute.xlu1 %3658 }
 0x508   : > { %v3055_v31 = vpop.f32.mrb[36].mxu1  ;;  %v3153_v52 = vpop.f32.mrb[34].mxu0 }
 0x509   : > { %v3081_v23 = vmul.f32 %v3071_v17, %v3055_v31  ;;  %v4549_v15 = vpop.f32.mrb[37].mxu1  ;;  %v4574_v5 = vpop.f32.mrb[35].mxu0  ;;  %v3179_v21 = vmul.f32 %v3169_v25, %v3153_v52 }
 0x50a   : > { %v3275_v17 = vpop.permute.xlu0 %3274  ;;  %v3663_v61 = vpop.permute.xlu1 %3662 }
 0x50b   : > { %v3084_v20 = vadd.f32 %v3081_v23, %v2986_v41 }
 0x50c   : > { %v3060_v6 = vpop.f32.mrb[38].mxu1  ;;  %v3158_v34 = vpop.f32.mrb[36].mxu0 }
 0x50d   : > { %v3182_v7 = vadd.f32 %v3179_v21, %v3084_v20  ;;  %v3082_v49 = vmul.f32 %v3075_v54, %v3060_v6  ;;  %v4552_v53 = vpop.f32.mrb[39].mxu1  ;;  %v4577_v42 = vpop.f32.mrb[37].mxu0  ;;  %v3180_v48 = vmul.f32 %v3173_v12, %v3158_v34 }
 0x50e   : > { %v3373_v26 = vpop.permute.xlu0 %3372  ;;  %v3569_v23 = vpop.permute.xlu1 %3568 }
 0x50f   : > { %v3085_v45 = vadd.f32 %v3082_v49, %v2987_v0 }
 0x510   : > { %v3065_v10 = vpop.f32.mrb[40].mxu1  ;;  %v3163_v19 = vpop.f32.mrb[38].mxu0 }
 0x511   : > { %v3183_v28 = vadd.f32 %v3180_v48, %v3085_v45  ;;  %v3083_v18 = vmul.f32 %v3079_v38, %v3065_v10  ;;  %v4555_v58 = vpop.f32.mrb[41].mxu1  ;;  %v4580_v47 = vpop.f32.mrb[39].mxu0  ;;  %v3181_v14 = vmul.f32 %v3177_v29, %v3163_v19 }
 0x512   : > { %v3471_v53 = vpop.permute.xlu0 %3470  ;;  %v3681_v19 = vpop.permute.xlu1 %3680 }
 0x513   : > { %v3086_v35 = vadd.f32 %v3083_v18, %v2988_v22 }
 0x515   : > { %v3184_v62 = vadd.f32 %v3181_v14, %v3086_v35 }
 0x516   : > { %v3667_v58 = vpop.permute.xlu1 %3666 }
 0x518   : > { %v3251_v1 = vpop.f32.mrb[42].mxu1  ;;  %v3349_v33 = vpop.f32.mrb[40].mxu0 }
 0x519   : > { %v3277_v54 = vmul.f32 %v3267_v24, %v3251_v1  ;;  %v4599_v63 = vpop.f32.mrb[43].mxu1  ;;  %v4624_v3 = vpop.f32.mrb[41].mxu0  ;;  %v3375_v12 = vmul.f32 %v3365_v46, %v3349_v33 }
 0x51b   : > { %v3280_v51 = vadd.f32 %v3277_v54, %v3182_v7  ;;  %v3702_v54 = vpop.permute.xlu1 %3701 }
 0x51c   : > { %v3256_v39 = vpop.f32.mrb[44].mxu1  ;;  %v3354_v16 = vpop.f32.mrb[42].mxu0 }
 0x51d   : > { %v3378_v8 = vadd.f32 %v3375_v12, %v3280_v51  ;;  %v3278_v50 = vmul.f32 %v6319_v11, %v3256_v39  ;;  %v4602_v41 = vpop.f32.mrb[45].mxu1  ;;  %v4627_v56 = vpop.f32.mrb[43].mxu0  ;;  %v3376_v40 = vmul.f32 %v6321_v30, %v3354_v16 }
 0x51f   : > { %v3281_v57 = vadd.f32 %v3278_v50, %v3183_v28  ;;  %v3691_v56 = vpop.permute.xlu1 %3690 }
 0x520   : > { %v3261_v43 = vpop.f32.mrb[46].mxu1  ;;  %v3359_v0 = vpop.f32.mrb[44].mxu0 }
 0x521   : > { %v3379_v38 = vadd.f32 %v3376_v40, %v3281_v57  ;;  %v3279_v24 = vmul.f32 %v3275_v17, %v3261_v43  ;;  %v4605_v44 = vpop.f32.mrb[47].mxu1  ;;  %v4630_v27 = vpop.f32.mrb[45].mxu0  ;;  %v3377_v46 = vmul.f32 %v3373_v26, %v3359_v0 }
 0x523   : > { %v3282_v37 = vadd.f32 %v3279_v24, %v3184_v62  ;;  %v3720_v24 = vld [vmem:[%s5257_s9] sm:$0xf]  ;;  %v3798_v44 = vpop.permute.xlu1 %3797 }
 0x525   : > { %v3380_v32 = vadd.f32 %v3377_v46, %v3282_v37 }
 0x528   : > { %v3447_v2 = vpop.f32.mrb[48].mxu1  ;;  %v3545_v22 = vpop.f32.mrb[46].mxu0 }
 0x529   : > { %v3473_v11 = vmul.f32 %v6323_v36, %v3447_v2  ;;  %v4649_v25 = vpop.f32.mrb[49].mxu1  ;;  %v4674_v31 = vpop.f32.mrb[47].mxu0  ;;  %v3571_v30 = vmul.f32 %v3561_v4, %v3545_v22 }
 0x52b   : > { %v3476_v52 = vadd.f32 %v3473_v11, %v3378_v8 }
 0x52c   : > { %v3452_v15 = vpop.f32.mrb[50].mxu1  ;;  %v3550_v5 = vpop.f32.mrb[48].mxu0 }
 0x52d   : > { %v3574_v20 = vadd.f32 %v3571_v30, %v3476_v52  ;;  %v3474_v21 = vmul.f32 %v6325_v55, %v3452_v15  ;;  %v4652_v6 = vpop.f32.mrb[51].mxu1  ;;  %v4677_v34 = vpop.f32.mrb[49].mxu0  ;;  %v3572_v49 = vmul.f32 %v3565_v13, %v3550_v5 }
 0x52e   : > { %v3686_v55 = vpop.permute.xlu0 %3685 }
 0x52f   : > { %v3477_v7 = vadd.f32 %v3474_v21, %v3379_v38 }
 0x530   : > { %v3457_v42 = vpop.f32.mrb[52].mxu1  ;;  %v3555_v45 = vpop.f32.mrb[50].mxu0 }
 0x531   : > { %v3575_v48 = vadd.f32 %v3572_v49, %v3477_v7  ;;  %v3475_v29 = vmul.f32 %v3471_v53, %v3457_v42  ;;  %v4655_v36 = vpop.f32.mrb[53].mxu1  ;;  %v4680_v10 = vpop.f32.mrb[51].mxu0  ;;  %v3573_v4 = vmul.f32 %v3569_v23, %v3555_v45 }
 0x532   : > { %v3707_v3 = vpop.permute.xlu0 %3706 }
 0x533   : > { %v3478_v28 = vadd.f32 %v3475_v29, %v3380_v32 }
 0x535   : > { %v3576_v18 = vadd.f32 %v3573_v4, %v3478_v28 }
 0x538   : > { %v3643_v47 = vpop.f32.mrb[54].mxu1 }
 0x539   : > { %v3669_v35 = vmul.f32 %v3659_v59, %v3643_v47  ;;  %v4699_v14 = vpop.f32.mrb[55].mxu1  ;;  %v3712_v59 = vpop.permute.xlu0 %3711 }
 0x53b   : > { %v3672_v62 = vadd.f32 %v3669_v35, %v3574_v20 }
 0x53c   : > { %v3648_v17 = vpop.f32.mrb[56].mxu1 }
 0x53d   : > { %v3693_v1 = vmul.f32 %v3681_v19, %v3672_v62  ;;  %v3670_v13 = vmul.f32 %v3663_v61, %v3648_v17  ;;  %v4702_v33 = vpop.f32.mrb[57].mxu1  ;;  %v3805_v32 = vpop.permute.xlu0 %3804 }
 0x53f   : > { %v3673_v63 = vadd.f32 %v3670_v13, %v3575_v48  ;;  %v3714_v12 = vadd.f32 %v3702_v54, %v3693_v1 }
 0x540   : > { %v3653_v51 = vpop.f32.mrb[58].mxu1 }
 0x541   : > { %v3694_v39 = vmul.f32 %v3686_v55, %v3673_v63  ;;  %v3671_v16 = vmul.f32 %v3667_v58, %v3653_v51  ;;  %v4705_v8 = vpop.f32.mrb[59].mxu1  ;;  %v3717_v57 = vmax.f32 %v3714_v12, 0.0 }
 0x543   : > { %v3715_v50 = vadd.f32 %v3707_v3, %v3694_v39  ;;  %v3674_v41 = vadd.f32 %v3671_v16, %v3576_v18 }
 0x545   : > { %v3718_v40 = vmax.f32 %v3715_v50, 0.0  ;;  %v3695_v26 = vmul.f32 %v3691_v56, %v3674_v41 }
 0x547   : > { %v3716_v43 = vadd.f32 %v3712_v59, %v3695_v26  ;;  %v4938_v0 = vpack.c.bf16 %v3718_v40, %v3717_v57 }
 0x549   : > { %4939 = vmatpush3.bf16.msra.mxu0 %v4938_v0  ;;  %v3719_v38 = vmax.f32 %v3716_v43, 0.0 }
 0x54a   : > { %4710 = vmatprep.subr.mxu0 %v6437_v9 }
 0x54d   : > { %4711 = vmatpush3.msra.mxu0 %v3719_v38 }
 0x54e   : > { %4713 = vmatmul.mubr.msk.f32.vlgmr.msra.gmra.mrb[52].mxu0 %vm1306_vm1, %v3720_v24 }
 0x621   : > { %v3790_v27 = vpop.f32.mrb[52].mxu0 }
 0x622   : > { %v3800_v37 = vmul.f32 %v3798_v44, %v3790_v27  ;;  %v4714_v46 = vpop.f32.mrb[53].mxu0 }
 0x624   : > { %v3807_v61 = vadd.f32 %v3805_v32, %v3800_v37 }
 0x626   : > { %v3808_v2 = vadd.f32 %v3807_v61, %v6122_v60 }
 0x628   : > { %3810 = vst.msk [vmem:[%s900_s0] sm:$0xf] %vm3809_vm3, %v3808_v2 }
 0x629 PF: > { %s69_s7 = sadd.s32 1, %s5076_s7  }
 0x62a   : > { %p66_p4 = scmp.ge.s32.totalorder %s69_s7, 4  }
 0x62c   :  { %68 = sbr.rel (!%p66_p4) target bundleno = 49 (0x31), region = 206 }

</bundles_post_ra>
